<compile_context>
chip_gen: v7x
topology: tpu7x:2x2x1
jax: 0.10.0
libtpu: 0.0.40
codegen_flags: <defaults>
</compile_context>

<pallas_src>
import functools

import jax
import jax.numpy as jnp
from jax.experimental import pallas as pl
from jax.experimental.pallas import tpu as pltpu


# ==========================================================================
# Fused kernel: ConvBlock x2 -> hoisted GRU projection -> scan -> MDN heads
# ==========================================================================
def _prosody_kernel(len_ref, x_ref,
                    w1_ref, b1_ref, g1_ref, be1_ref,
                    w2_ref, b2_ref, g2_ref, be2_ref,
                    wx_ref, wh_ref, bih_ref, bhh_ref,
                    wmdn_ref, bmdn_ref,
                    w_out, sig_out, mu_out,
                    gix_ref, outs_ref,
                    *, B, L, C, H, G, K1, K2):
    # len_ref : SMEM [B] int32 valid lengths (right-padded mask convention)
    # x_ref   : VMEM [B*L, C] f32 (rows ordered (b, l))
    # wN_ref  : VMEM [K*C, C] bf16 im2col conv weight (tap-major rows); bN/gN/beN [1, C]
    # wx_ref  : VMEM [C, 3H] bf16 (W_ih columns for the x part, transposed)
    # wh_ref  : VMEM [H, 6H] bf16 (concat of W_ih's h part and W_hh, transposed)
    # bih_ref / bhh_ref : VMEM [1, 3H] f32
    # wmdn_ref: VMEM [H, 2*G*H + G] bf16, columns = [sigma | mu | w]; bmdn [1, 2*G*H+G]
    # outputs : [B*L, G], [B*L, G*H], [B*L, G*H] f32
    # scratch : gix_ref [B*L, 3H] f32, outs_ref [B*L, H] f32
    H3 = 3 * H
    GH = G * H
    cdt = wx_ref.dtype                                   # bf16 MXU operand dtype

    # ---- validity column [B*L, 1] (built once, reused 5x) --------------------
    pos = jax.lax.broadcasted_iota(jnp.int32, (L, 1), 0)
    pos_bl = jnp.concatenate([pos] * B, axis=0)                          # [B*L, 1]
    len_bl = jnp.concatenate(
        [jnp.full((L, 1), len_ref[b], dtype=jnp.int32) for b in range(B)], axis=0)
    valid = pos_bl < len_bl                                              # [B*L, 1] bool

    # ---- ConvBlock = Conv1d('same') -> LayerNorm(C) -> ReLU -> mask ----------
    def conv_ln_relu(xs, K, w_r, b_r, g_r, be_r):
        pad = (K - 1) // 2
        rows = []
        for b in range(B):
            xb = xs[b]                                                   # [L, C] f32
            taps = []
            for t in range(K):
                off = t - pad                                            # x[l + off]
                if off < 0:
                    blk = jnp.concatenate(
                        [jnp.zeros((-off, C), jnp.float32), xb[:L + off, :]], axis=0)
                elif off > 0:
                    blk = jnp.concatenate(
                        [xb[off:, :], jnp.zeros((off, C), jnp.float32)], axis=0)
                else:
                    blk = xb
                taps.append(blk)
            rows.append(jnp.concatenate(taps, axis=-1))                  # [L, K*C]
        xw = jnp.concatenate(rows, axis=0).astype(cdt)                   # [B*L, K*C]
        acc = jnp.dot(xw, w_r[...], preferred_element_type=jnp.float32) + b_r[...]
        mean = jnp.mean(acc, axis=-1, keepdims=True)
        var = jnp.mean((acc - mean) ** 2, axis=-1, keepdims=True)
        y = (acc - mean) * jax.lax.rsqrt(var + 1e-5) * g_r[...] + be_r[...]
        y = jnp.maximum(y, 0.0)
        return jnp.where(valid, y, 0.0)                                  # [B*L, C]

    x0 = [x_ref[b * L:(b + 1) * L, :] for b in range(B)]
    y1 = conv_ln_relu(x0, K1, w1_ref, b1_ref, g1_ref, be1_ref)
    # TODO(synk): training-mode F.dropout between conv blocks not implemented
    # (inference semantics: no-op).
    x1 = [y1[b * L:(b + 1) * L, :] for b in range(B)]
    y2 = conv_ln_relu(x1, K2, w2_ref, b2_ref, g2_ref, be2_ref)

    # ---- (1) hoisted GRU input projection for ALL timesteps ------------------
    gix_ref[...] = (jnp.dot(y2.astype(cdt), wx_ref[...],
                            preferred_element_type=jnp.float32) + bih_ref[...])

    # ---- (2) recurrence: one fused [B,H]x[H,6H] matmul per step --------------
    # PyTorch gate order (r, z, n); p_input_t = concat(x_t, h_{t-1}); h_0 = 0.
    def step(l, h):
        gi_x = jnp.concatenate(
            [gix_ref[pl.ds(b * L + l, 1), :] for b in range(B)], axis=0)  # [B, 3H]
        hh = jnp.dot(h.astype(cdt), wh_ref[...],
                     preferred_element_type=jnp.float32)                  # [B, 6H]
        gi = gi_x + hh[:, :H3]
        gh = hh[:, H3:] + bhh_ref[...]
        r = jax.nn.sigmoid(gi[:, :H] + gh[:, :H])
        z = jax.nn.sigmoid(gi[:, H:2 * H] + gh[:, H:2 * H])
        n = jnp.tanh(gi[:, 2 * H:] + r * gh[:, 2 * H:])
        h_new = (1.0 - z) * n + z * h
        for b in range(B):
            outs_ref[pl.ds(b * L + l, 1), :] = h_new[b:b + 1, :]
        return h_new

    jax.lax.fori_loop(0, L, step, jnp.zeros((B, H), jnp.float32), unroll=True)

    # ---- (3) fused MDN heads: one [B*L, H] x [H, 2*G*H + G] matmul -----------
    z_all = (jnp.dot(outs_ref[...].astype(cdt), wmdn_ref[...],
                     preferred_element_type=jnp.float32) + bmdn_ref[...])
    sig = jnp.exp(z_all[:, :GH])
    mu = z_all[:, GH:2 * GH]
    logits = z_all[:, 2 * GH:]
    logits = logits - jnp.max(logits, axis=-1, keepdims=True)
    e = jnp.exp(logits)
    wmix = e / jnp.sum(e, axis=-1, keepdims=True)

    # ---- (4) final masked_fill (eval mode: w -> 1e-9, sigma/mu -> 0) ---------
    w_out[...] = jnp.where(valid, wmix, 1e-9)
    sig_out[...] = jnp.where(valid, sig, 0.0)
    mu_out[...] = jnp.where(valid, mu, 0.0)


# ==========================================================================
# ProsodyPredictor forward (wrapper / glue)
# ==========================================================================
def prosody_predictor_forward(params, h_text, mask=None):
    B, L, C = h_text.shape
    if mask is None:
        lengths = jnp.full((B,), L, dtype=jnp.int32)
    else:
        # NOTE: mask assumed right-padded (True = padded); kernel rebuilds it in-VPU
        # from per-example lengths instead of streaming a lane-sparse [B, L, 1] operand.
        lengths = jnp.sum(jnp.logical_not(mask), axis=1).astype(jnp.int32)

    c1, c2 = params["conv_stack"]
    gp, mp = params["gru"], params["mdn"]
    H = gp["wh"].shape[0]
    G = mp["b"].shape[1] // (2 * H + 1)    # fused head width = G*(2H + 1)
    GH = G * H
    K1 = c1["w"].shape[0] // C
    K2 = c2["w"].shape[0] // C

    x_flat = h_text.astype(jnp.float32).reshape(B * L, C)
    kernel = functools.partial(_prosody_kernel, B=B, L=L, C=C, H=H, G=G, K1=K1, K2=K2)

    w, sig, mu = pl.pallas_call(
        kernel,
        out_shape=(jax.ShapeDtypeStruct((B * L, G), jnp.float32),
                   jax.ShapeDtypeStruct((B * L, GH), jnp.float32),
                   jax.ShapeDtypeStruct((B * L, GH), jnp.float32)),
        in_specs=[pl.BlockSpec(memory_space=pltpu.MemorySpace.SMEM)]
        + [pl.BlockSpec(memory_space=pltpu.MemorySpace.VMEM)] * 15,
        out_specs=(pl.BlockSpec(memory_space=pltpu.MemorySpace.VMEM),
                   pl.BlockSpec(memory_space=pltpu.MemorySpace.VMEM),
                   pl.BlockSpec(memory_space=pltpu.MemorySpace.VMEM)),
        scratch_shapes=[pltpu.VMEM((B * L, 3 * H), jnp.float32),
                        pltpu.VMEM((B * L, H), jnp.float32)],
    )(lengths, x_flat,
      c1["w"], c1["b"], c1["gamma"], c1["beta"],
      c2["w"], c2["b"], c2["gamma"], c2["beta"],
      gp["wx"], gp["wh"], gp["bih"], gp["bhh"],
      mp["w"], mp["b"])

    return (w.reshape(B, L, G),
            sig.reshape(B, L, G, H),
            mu.reshape(B, L, G, H))


# ==========================================================================
# Deterministic synthetic parameter construction (PyTorch-equivalent inits)
# ==========================================================================
def init_params(key, d_model, kernel_sizes, num_gaussians):
    C = d_model
    H = 2 * d_model
    G = num_gaussians
    keys = jax.random.split(key, 8)
    params = {"conv_stack": []}

    for i in range(2):
        K = kernel_sizes[i]
        assert K % 2 == 1, "ConvNorm 'same' padding requires an odd kernel size"
        kw, kb = jax.random.split(keys[i])
        # Conv1d weight [C_out, C_in, K], xavier_uniform with tanh gain (5/3)
        fan = C * K
        limit = (5.0 / 3.0) * (6.0 / (fan + fan)) ** 0.5
        w = jax.random.uniform(kw, (C, C, K), minval=-limit, maxval=limit)
        # im2col weight: rows ordered tap-major then c_in -> [K*C_in, C_out]
        w_kc = jnp.transpose(w, (2, 1, 0)).reshape(K * C, C)
        b_lim = 1.0 / (C * K) ** 0.5
        bias = jax.random.uniform(kb, (1, C), minval=-b_lim, maxval=b_lim)
        params["conv_stack"].append({
            "w": w_kc.astype(jnp.bfloat16),          # MXU operand
            "b": bias.astype(jnp.float32),
            "gamma": jnp.ones((1, C), jnp.float32),
            "beta": jnp.zeros((1, C), jnp.float32),
        })

    # GRUCell(input = 3*d_model, hidden = 2*d_model); uniform(-1/sqrt(H), 1/sqrt(H))
    in_sz = 3 * d_model
    std = 1.0 / (H ** 0.5)
    k1, k2, k3, k4 = jax.random.split(keys[2], 4)
    wih = jax.random.uniform(k1, (3 * H, in_sz), minval=-std, maxval=std)
    whh = jax.random.uniform(k2, (3 * H, H), minval=-std, maxval=std)
    bih = jax.random.uniform(k3, (1, 3 * H), minval=-std, maxval=std)
    bhh = jax.random.uniform(k4, (1, 3 * H), minval=-std, maxval=std)
    params["gru"] = {
        "wx": wih[:, :d_model].T.astype(jnp.bfloat16),                       # [C, 3H]
        "wh": jnp.concatenate([wih[:, d_model:].T, whh.T], axis=1)           # [H, 6H]
                 .astype(jnp.bfloat16),
        "bih": bih.astype(jnp.float32),
        "bhh": bhh.astype(jnp.float32),
    }

    # MDN linear layers (in=H, out={G, G*H, G*H}) fused as columns [sigma | mu | w]
    def linear(k, n_out, n_in):
        ka, kb_ = jax.random.split(k)
        lim = 1.0 / (n_in ** 0.5)
        w_ = jax.random.uniform(ka, (n_out, n_in), minval=-lim, maxval=lim)
        b_ = jax.random.uniform(kb_, (1, n_out), minval=-lim, maxval=lim)
        return w_.T, b_

    ww_t, bw = linear(keys[3], G, H)
    ws_t, bs = linear(keys[4], G * H, H)
    wm_t, bm = linear(keys[5], G * H, H)
    params["mdn"] = {
        "w": jnp.concatenate([ws_t, wm_t, ww_t], axis=1).astype(jnp.bfloat16),
        "b": jnp.concatenate([bs, bm, bw], axis=1).astype(jnp.float32),
    }
    return params


if __name__ == "__main__":
    key = jax.random.PRNGKey(0)
    B, L, d_model = 2, 8, 32
    kernel_sizes = (3, 3)
    num_gaussians = 4

    k_params, k_input = jax.random.split(key)
    params = init_params(k_params, d_model, kernel_sizes, num_gaussians)
    h_text = jax.random.normal(k_input, (B, L, d_model), dtype=jnp.float32)
    lengths = jnp.array([8, 6], dtype=jnp.int32)
    mask = jnp.arange(L)[None, :] >= lengths[:, None]   # [B, L] bool, True = padded

    fwd = jax.jit(prosody_predictor_forward)
    w, sigma, mu = fwd(params, h_text, mask)
    jax.block_until_ready((w, sigma, mu))

    assert w.shape == (B, L, num_gaussians)
    assert sigma.shape == (B, L, num_gaussians, 2 * d_model)
    assert mu.shape == (B, L, num_gaussians, 2 * d_model)
    print("KERNEL_OK")
</pallas_src>

<mosaic_0001>
module attributes {stable_mosaic.version = 11 : i64} {
  func.func @_prosody_kernel(%arg0: memref<2xi32, #tpu.memory_space<smem>>, %arg1: memref<16x32xf32, #tpu.memory_space<vmem>>, %arg2: memref<96x32xbf16, #tpu.memory_space<vmem>>, %arg3: memref<1x32xf32, #tpu.memory_space<vmem>>, %arg4: memref<1x32xf32, #tpu.memory_space<vmem>>, %arg5: memref<1x32xf32, #tpu.memory_space<vmem>>, %arg6: memref<96x32xbf16, #tpu.memory_space<vmem>>, %arg7: memref<1x32xf32, #tpu.memory_space<vmem>>, %arg8: memref<1x32xf32, #tpu.memory_space<vmem>>, %arg9: memref<1x32xf32, #tpu.memory_space<vmem>>, %arg10: memref<32x192xbf16, #tpu.memory_space<vmem>>, %arg11: memref<64x384xbf16, #tpu.memory_space<vmem>>, %arg12: memref<1x192xf32, #tpu.memory_space<vmem>>, %arg13: memref<1x192xf32, #tpu.memory_space<vmem>>, %arg14: memref<64x516xbf16, #tpu.memory_space<vmem>>, %arg15: memref<1x516xf32, #tpu.memory_space<vmem>>, %arg16: memref<16x4xf32, #tpu.memory_space<vmem>>, %arg17: memref<16x256xf32, #tpu.memory_space<vmem>>, %arg18: memref<16x256xf32, #tpu.memory_space<vmem>>, %arg19: memref<16x192xf32, #tpu.memory_space<vmem>>, %arg20: memref<16x64xf32, #tpu.memory_space<vmem>>) attributes {dimension_semantics = [], scalar_prefetch = 0 : i64, scratch_operands = 2 : i64, tpu.core_type = #tpu.core_type<tc>} {
    %0 = tpu.iota {dimensions = array<i32: 0>} : vector<8x1xi32>
    %1 = tpu.concatenate %0, %0 in 0 : vector<8x1xi32>, vector<8x1xi32> -> vector<16x1xi32>
    %c0 = arith.constant 0 : index
    %2 = memref.load %arg0[%c0] : memref<2xi32, #tpu.memory_space<smem>>
    %3 = vector.broadcast %2 : i32 to vector<8x1xi32>
    %c1 = arith.constant 1 : index
    %4 = memref.load %arg0[%c1] : memref<2xi32, #tpu.memory_space<smem>>
    %5 = vector.broadcast %4 : i32 to vector<8x1xi32>
    %6 = tpu.concatenate %3, %5 in 0 : vector<8x1xi32>, vector<8x1xi32> -> vector<16x1xi32>
    %7 = arith.cmpi slt, %1, %6 : vector<16x1xi32>
    %c0_0 = arith.constant 0 : index
    %c0_1 = arith.constant 0 : index
    %8 = vector.load %arg1[%c0_0, %c0_1] : memref<16x32xf32, #tpu.memory_space<vmem>>, vector<8x32xf32>
    %c8 = arith.constant 8 : index
    %c0_2 = arith.constant 0 : index
    %9 = vector.load %arg1[%c8, %c0_2] : memref<16x32xf32, #tpu.memory_space<vmem>>, vector<8x32xf32>
    %cst = arith.constant 0.000000e+00 : f32
    %10 = vector.broadcast %cst : f32 to vector<1x32xf32>
    %11 = vector.extract_strided_slice %8 {offsets = [0, 0], sizes = [7, 32], strides = [1, 1]} : vector<8x32xf32> to vector<7x32xf32>
    %12 = tpu.concatenate %10, %11 in 0 : vector<1x32xf32>, vector<7x32xf32> -> vector<8x32xf32>
    %13 = vector.extract_strided_slice %8 {offsets = [1, 0], sizes = [7, 32], strides = [1, 1]} : vector<8x32xf32> to vector<7x32xf32>
    %cst_3 = arith.constant 0.000000e+00 : f32
    %14 = vector.broadcast %cst_3 : f32 to vector<1x32xf32>
    %15 = tpu.concatenate %13, %14 in 0 : vector<7x32xf32>, vector<1x32xf32> -> vector<8x32xf32>
    %16 = tpu.concatenate %12, %8, %15 in 1 : vector<8x32xf32>, vector<8x32xf32>, vector<8x32xf32> -> vector<8x96xf32>
    %cst_4 = arith.constant 0.000000e+00 : f32
    %17 = vector.broadcast %cst_4 : f32 to vector<1x32xf32>
    %18 = vector.extract_strided_slice %9 {offsets = [0, 0], sizes = [7, 32], strides = [1, 1]} : vector<8x32xf32> to vector<7x32xf32>
    %19 = tpu.concatenate %17, %18 in 0 : vector<1x32xf32>, vector<7x32xf32> -> vector<8x32xf32>
    %20 = vector.extract_strided_slice %9 {offsets = [1, 0], sizes = [7, 32], strides = [1, 1]} : vector<8x32xf32> to vector<7x32xf32>
    %cst_5 = arith.constant 0.000000e+00 : f32
    %21 = vector.broadcast %cst_5 : f32 to vector<1x32xf32>
    %22 = tpu.concatenate %20, %21 in 0 : vector<7x32xf32>, vector<1x32xf32> -> vector<8x32xf32>
    %23 = tpu.concatenate %19, %9, %22 in 1 : vector<8x32xf32>, vector<8x32xf32>, vector<8x32xf32> -> vector<8x96xf32>
    %24 = tpu.concatenate %16, %23 in 0 : vector<8x96xf32>, vector<8x96xf32> -> vector<16x96xf32>
    %25 = arith.truncf %24 : vector<16x96xf32> to vector<16x96xbf16>
    %c0_6 = arith.constant 0 : index
    %c0_7 = arith.constant 0 : index
    %26 = vector.load %arg2[%c0_6, %c0_7] : memref<96x32xbf16, #tpu.memory_space<vmem>>, vector<96x32xbf16>
    %cst_8 = arith.constant dense<0.000000e+00> : vector<16x32xf32>
    %27 = tpu.matmul %25, %26, %cst_8 {dimension_numbers = #tpu.dot_dimension_numbers<[1], [0], [0], [1], [0, 0, 1, 1], [], []>} : vector<16x96xbf16>, vector<96x32xbf16>, vector<16x32xf32> -> vector<16x32xf32>
    %c0_9 = arith.constant 0 : index
    %c0_10 = arith.constant 0 : index
    %28 = vector.load %arg3[%c0_9, %c0_10] : memref<1x32xf32, #tpu.memory_space<vmem>>, vector<1x32xf32>
    %29 = vector.broadcast %28 : vector<1x32xf32> to vector<16x32xf32>
    %30 = arith.addf %27, %29 : vector<16x32xf32>
    %cst_11 = arith.constant dense<0.000000e+00> : vector<16xf32>
    %31 = vector.multi_reduction <add>, %30, %cst_11 [1] : vector<16x32xf32> to vector<16xf32>
    %32 = vector.shape_cast %31 : vector<16xf32> to vector<16x1xf32>
    %cst_12 = arith.constant 3.200000e+01 : f32
    %33 = vector.broadcast %cst_12 : f32 to vector<16x1xf32>
    %34 = arith.divf %32, %33 : vector<16x1xf32>
    %35 = vector.broadcast %34 : vector<16x1xf32> to vector<16x32xf32>
    %36 = arith.subf %30, %35 : vector<16x32xf32>
    %37 = arith.mulf %36, %36 : vector<16x32xf32>
    %cst_13 = arith.constant dense<0.000000e+00> : vector<16xf32>
    %38 = vector.multi_reduction <add>, %37, %cst_13 [1] : vector<16x32xf32> to vector<16xf32>
    %39 = vector.shape_cast %38 : vector<16xf32> to vector<16x1xf32>
    %cst_14 = arith.constant 3.200000e+01 : f32
    %40 = vector.broadcast %cst_14 : f32 to vector<16x1xf32>
    %41 = arith.divf %39, %40 : vector<16x1xf32>
    %42 = vector.broadcast %34 : vector<16x1xf32> to vector<16x32xf32>
    %43 = arith.subf %30, %42 : vector<16x32xf32>
    %cst_15 = arith.constant 9.99999974E-6 : f32
    %44 = vector.broadcast %cst_15 : f32 to vector<16x1xf32>
    %45 = arith.addf %41, %44 : vector<16x1xf32>
    %46 = math.rsqrt %45 : vector<16x1xf32>
    %47 = vector.broadcast %46 : vector<16x1xf32> to vector<16x32xf32>
    %48 = arith.mulf %43, %47 : vector<16x32xf32>
    %c0_16 = arith.constant 0 : index
    %c0_17 = arith.constant 0 : index
    %49 = vector.load %arg4[%c0_16, %c0_17] : memref<1x32xf32, #tpu.memory_space<vmem>>, vector<1x32xf32>
    %50 = vector.broadcast %49 : vector<1x32xf32> to vector<16x32xf32>
    %51 = arith.mulf %48, %50 : vector<16x32xf32>
    %c0_18 = arith.constant 0 : index
    %c0_19 = arith.constant 0 : index
    %52 = vector.load %arg5[%c0_18, %c0_19] : memref<1x32xf32, #tpu.memory_space<vmem>>, vector<1x32xf32>
    %53 = vector.broadcast %52 : vector<1x32xf32> to vector<16x32xf32>
    %54 = arith.addf %51, %53 : vector<16x32xf32>
    %cst_20 = arith.constant 0.000000e+00 : f32
    %55 = vector.broadcast %cst_20 : f32 to vector<16x32xf32>
    %56 = arith.maximumf %54, %55 : vector<16x32xf32>
    %cst_21 = arith.constant 0.000000e+00 : f32
    %57 = vector.shape_cast %7 : vector<16x1xi1> to vector<16x1xi1>
    %58 = vector.broadcast %57 : vector<16x1xi1> to vector<16x32xi1>
    %59 = vector.broadcast %cst_21 : f32 to vector<16x32xf32>
    %60 = arith.select %58, %56, %59 : vector<16x32xi1>, vector<16x32xf32>
    %61 = vector.extract_strided_slice %60 {offsets = [0, 0], sizes = [8, 32], strides = [1, 1]} : vector<16x32xf32> to vector<8x32xf32>
    %62 = vector.extract_strided_slice %60 {offsets = [8, 0], sizes = [8, 32], strides = [1, 1]} : vector<16x32xf32> to vector<8x32xf32>
    %cst_22 = arith.constant 0.000000e+00 : f32
    %63 = vector.broadcast %cst_22 : f32 to vector<1x32xf32>
    %64 = vector.extract_strided_slice %61 {offsets = [0, 0], sizes = [7, 32], strides = [1, 1]} : vector<8x32xf32> to vector<7x32xf32>
    %65 = tpu.concatenate %63, %64 in 0 : vector<1x32xf32>, vector<7x32xf32> -> vector<8x32xf32>
    %66 = vector.extract_strided_slice %61 {offsets = [1, 0], sizes = [7, 32], strides = [1, 1]} : vector<8x32xf32> to vector<7x32xf32>
    %cst_23 = arith.constant 0.000000e+00 : f32
    %67 = vector.broadcast %cst_23 : f32 to vector<1x32xf32>
    %68 = tpu.concatenate %66, %67 in 0 : vector<7x32xf32>, vector<1x32xf32> -> vector<8x32xf32>
    %69 = tpu.concatenate %65, %61, %68 in 1 : vector<8x32xf32>, vector<8x32xf32>, vector<8x32xf32> -> vector<8x96xf32>
    %cst_24 = arith.constant 0.000000e+00 : f32
    %70 = vector.broadcast %cst_24 : f32 to vector<1x32xf32>
    %71 = vector.extract_strided_slice %62 {offsets = [0, 0], sizes = [7, 32], strides = [1, 1]} : vector<8x32xf32> to vector<7x32xf32>
    %72 = tpu.concatenate %70, %71 in 0 : vector<1x32xf32>, vector<7x32xf32> -> vector<8x32xf32>
    %73 = vector.extract_strided_slice %62 {offsets = [1, 0], sizes = [7, 32], strides = [1, 1]} : vector<8x32xf32> to vector<7x32xf32>
    %cst_25 = arith.constant 0.000000e+00 : f32
    %74 = vector.broadcast %cst_25 : f32 to vector<1x32xf32>
    %75 = tpu.concatenate %73, %74 in 0 : vector<7x32xf32>, vector<1x32xf32> -> vector<8x32xf32>
    %76 = tpu.concatenate %72, %62, %75 in 1 : vector<8x32xf32>, vector<8x32xf32>, vector<8x32xf32> -> vector<8x96xf32>
    %77 = tpu.concatenate %69, %76 in 0 : vector<8x96xf32>, vector<8x96xf32> -> vector<16x96xf32>
    %78 = arith.truncf %77 : vector<16x96xf32> to vector<16x96xbf16>
    %c0_26 = arith.constant 0 : index
    %c0_27 = arith.constant 0 : index
    %79 = vector.load %arg6[%c0_26, %c0_27] : memref<96x32xbf16, #tpu.memory_space<vmem>>, vector<96x32xbf16>
    %cst_28 = arith.constant dense<0.000000e+00> : vector<16x32xf32>
    %80 = tpu.matmul %78, %79, %cst_28 {dimension_numbers = #tpu.dot_dimension_numbers<[1], [0], [0], [1], [0, 0, 1, 1], [], []>} : vector<16x96xbf16>, vector<96x32xbf16>, vector<16x32xf32> -> vector<16x32xf32>
    %c0_29 = arith.constant 0 : index
    %c0_30 = arith.constant 0 : index
    %81 = vector.load %arg7[%c0_29, %c0_30] : memref<1x32xf32, #tpu.memory_space<vmem>>, vector<1x32xf32>
    %82 = vector.broadcast %81 : vector<1x32xf32> to vector<16x32xf32>
    %83 = arith.addf %80, %82 : vector<16x32xf32>
    %cst_31 = arith.constant dense<0.000000e+00> : vector<16xf32>
    %84 = vector.multi_reduction <add>, %83, %cst_31 [1] : vector<16x32xf32> to vector<16xf32>
    %85 = vector.shape_cast %84 : vector<16xf32> to vector<16x1xf32>
    %cst_32 = arith.constant 3.200000e+01 : f32
    %86 = vector.broadcast %cst_32 : f32 to vector<16x1xf32>
    %87 = arith.divf %85, %86 : vector<16x1xf32>
    %88 = vector.broadcast %87 : vector<16x1xf32> to vector<16x32xf32>
    %89 = arith.subf %83, %88 : vector<16x32xf32>
    %90 = arith.mulf %89, %89 : vector<16x32xf32>
    %cst_33 = arith.constant dense<0.000000e+00> : vector<16xf32>
    %91 = vector.multi_reduction <add>, %90, %cst_33 [1] : vector<16x32xf32> to vector<16xf32>
    %92 = vector.shape_cast %91 : vector<16xf32> to vector<16x1xf32>
    %cst_34 = arith.constant 3.200000e+01 : f32
    %93 = vector.broadcast %cst_34 : f32 to vector<16x1xf32>
    %94 = arith.divf %92, %93 : vector<16x1xf32>
    %95 = vector.broadcast %87 : vector<16x1xf32> to vector<16x32xf32>
    %96 = arith.subf %83, %95 : vector<16x32xf32>
    %cst_35 = arith.constant 9.99999974E-6 : f32
    %97 = vector.broadcast %cst_35 : f32 to vector<16x1xf32>
    %98 = arith.addf %94, %97 : vector<16x1xf32>
    %99 = math.rsqrt %98 : vector<16x1xf32>
    %100 = vector.broadcast %99 : vector<16x1xf32> to vector<16x32xf32>
    %101 = arith.mulf %96, %100 : vector<16x32xf32>
    %c0_36 = arith.constant 0 : index
    %c0_37 = arith.constant 0 : index
    %102 = vector.load %arg8[%c0_36, %c0_37] : memref<1x32xf32, #tpu.memory_space<vmem>>, vector<1x32xf32>
    %103 = vector.broadcast %102 : vector<1x32xf32> to vector<16x32xf32>
    %104 = arith.mulf %101, %103 : vector<16x32xf32>
    %c0_38 = arith.constant 0 : index
    %c0_39 = arith.constant 0 : index
    %105 = vector.load %arg9[%c0_38, %c0_39] : memref<1x32xf32, #tpu.memory_space<vmem>>, vector<1x32xf32>
    %106 = vector.broadcast %105 : vector<1x32xf32> to vector<16x32xf32>
    %107 = arith.addf %104, %106 : vector<16x32xf32>
    %cst_40 = arith.constant 0.000000e+00 : f32
    %108 = vector.broadcast %cst_40 : f32 to vector<16x32xf32>
    %109 = arith.maximumf %107, %108 : vector<16x32xf32>
    %cst_41 = arith.constant 0.000000e+00 : f32
    %110 = vector.shape_cast %7 : vector<16x1xi1> to vector<16x1xi1>
    %111 = vector.broadcast %110 : vector<16x1xi1> to vector<16x32xi1>
    %112 = vector.broadcast %cst_41 : f32 to vector<16x32xf32>
    %113 = arith.select %111, %109, %112 : vector<16x32xi1>, vector<16x32xf32>
    %114 = arith.truncf %113 : vector<16x32xf32> to vector<16x32xbf16>
    %c0_42 = arith.constant 0 : index
    %c0_43 = arith.constant 0 : index
    %115 = vector.load %arg10[%c0_42, %c0_43] : memref<32x192xbf16, #tpu.memory_space<vmem>>, vector<32x192xbf16>
    %cst_44 = arith.constant dense<0.000000e+00> : vector<16x192xf32>
    %116 = tpu.matmul %114, %115, %cst_44 {dimension_numbers = #tpu.dot_dimension_numbers<[1], [0], [0], [1], [0, 0, 1, 1], [], []>} : vector<16x32xbf16>, vector<32x192xbf16>, vector<16x192xf32> -> vector<16x192xf32>
    %c0_45 = arith.constant 0 : index
    %c0_46 = arith.constant 0 : index
    %117 = vector.load %arg12[%c0_45, %c0_46] : memref<1x192xf32, #tpu.memory_space<vmem>>, vector<1x192xf32>
    %118 = vector.broadcast %117 : vector<1x192xf32> to vector<16x192xf32>
    %119 = arith.addf %116, %118 : vector<16x192xf32>
    %c0_47 = arith.constant 0 : index
    %c0_48 = arith.constant 0 : index
    %120 = vector.load %arg19[%c0_47, %c0_48] : memref<16x192xf32, #tpu.memory_space<vmem>>, vector<16x192xf32>
    tpu.vector_store %arg19[%c0_47, %c0_48], %119 {strides = array<i32>} : memref<16x192xf32, #tpu.memory_space<vmem>>, vector<16x192xf32>,
    %cst_49 = arith.constant 0.000000e+00 : f32
    %121 = vector.broadcast %cst_49 : f32 to vector<2x64xf32>
    %c0_i32 = arith.constant 0 : i32
    %c0_i32_50 = arith.constant 0 : i32
    %122 = arith.addi %c0_i32_50, %c0_i32 : i32
    %123 = arith.index_cast %122 : i32 to index
    %c0_51 = arith.constant 0 : index
    %124 = vector.load %arg19[%123, %c0_51] : memref<16x192xf32, #tpu.memory_space<vmem>>, vector<1x192xf32>
    %c8_i32 = arith.constant 8 : i32
    %125 = arith.addi %c8_i32, %c0_i32 : i32
    %126 = arith.index_cast %125 : i32 to index
    %c0_52 = arith.constant 0 : index
    %127 = vector.load %arg19[%126, %c0_52] : memref<16x192xf32, #tpu.memory_space<vmem>>, vector<1x192xf32>
    %128 = tpu.concatenate %124, %127 in 0 : vector<1x192xf32>, vector<1x192xf32> -> vector<2x192xf32>
    %129 = arith.truncf %121 : vector<2x64xf32> to vector<2x64xbf16>
    %c0_53 = arith.constant 0 : index
    %c0_54 = arith.constant 0 : index
    %130 = vector.load %arg11[%c0_53, %c0_54] : memref<64x384xbf16, #tpu.memory_space<vmem>>, vector<64x384xbf16>
    %cst_55 = arith.constant dense<0.000000e+00> : vector<2x384xf32>
    %131 = tpu.matmul %129, %130, %cst_55 {dimension_numbers = #tpu.dot_dimension_numbers<[1], [0], [0], [1], [0, 0, 1, 1], [], []>} : vector<2x64xbf16>, vector<64x384xbf16>, vector<2x384xf32> -> vector<2x384xf32>
    %132 = vector.extract_strided_slice %131 {offsets = [0, 0], sizes = [2, 192], strides = [1, 1]} : vector<2x384xf32> to vector<2x192xf32>
    %133 = arith.addf %128, %132 : vector<2x192xf32>
    %134 = vector.extract_strided_slice %131 {offsets = [0, 192], sizes = [2, 192], strides = [1, 1]} : vector<2x384xf32> to vector<2x192xf32>
    %c0_56 = arith.constant 0 : index
    %c0_57 = arith.constant 0 : index
    %135 = vector.load %arg13[%c0_56, %c0_57] : memref<1x192xf32, #tpu.memory_space<vmem>>, vector<1x192xf32>
    %136 = vector.broadcast %135 : vector<1x192xf32> to vector<2x192xf32>
    %137 = arith.addf %134, %136 : vector<2x192xf32>
    %138 = vector.extract_strided_slice %133 {offsets = [0, 0], sizes = [2, 64], strides = [1, 1]} : vector<2x192xf32> to vector<2x64xf32>
    %139 = vector.extract_strided_slice %137 {offsets = [0, 0], sizes = [2, 64], strides = [1, 1]} : vector<2x192xf32> to vector<2x64xf32>
    %140 = arith.addf %138, %139 : vector<2x64xf32>
    %141 = arith.negf %140 : vector<2x64xf32>
    %142 = math.exp %141 : vector<2x64xf32>
    %cst_58 = arith.constant 1.000000e+00 : f32
    %143 = vector.broadcast %cst_58 : f32 to vector<2x64xf32>
    %144 = arith.addf %143, %142 : vector<2x64xf32>
    %145 = arith.divf %143, %144 : vector<2x64xf32>
    %146 = vector.extract_strided_slice %133 {offsets = [0, 64], sizes = [2, 64], strides = [1, 1]} : vector<2x192xf32> to vector<2x64xf32>
    %147 = vector.extract_strided_slice %137 {offsets = [0, 64], sizes = [2, 64], strides = [1, 1]} : vector<2x192xf32> to vector<2x64xf32>
    %148 = arith.addf %146, %147 : vector<2x64xf32>
    %149 = arith.negf %148 : vector<2x64xf32>
    %150 = math.exp %149 : vector<2x64xf32>
    %cst_59 = arith.constant 1.000000e+00 : f32
    %151 = vector.broadcast %cst_59 : f32 to vector<2x64xf32>
    %152 = arith.addf %151, %150 : vector<2x64xf32>
    %153 = arith.divf %151, %152 : vector<2x64xf32>
    %154 = vector.extract_strided_slice %133 {offsets = [0, 128], sizes = [2, 64], strides = [1, 1]} : vector<2x192xf32> to vector<2x64xf32>
    %155 = vector.extract_strided_slice %137 {offsets = [0, 128], sizes = [2, 64], strides = [1, 1]} : vector<2x192xf32> to vector<2x64xf32>
    %156 = arith.mulf %145, %155 : vector<2x64xf32>
    %157 = arith.addf %154, %156 : vector<2x64xf32>
    %158 = math.tanh %157 : vector<2x64xf32>
    %cst_60 = arith.constant 1.000000e+00 : f32
    %159 = vector.broadcast %cst_60 : f32 to vector<2x64xf32>
    %160 = arith.subf %159, %153 : vector<2x64xf32>
    %161 = arith.mulf %160, %158 : vector<2x64xf32>
    %162 = arith.mulf %153, %121 : vector<2x64xf32>
    %163 = arith.addf %161, %162 : vector<2x64xf32>
    %164 = vector.extract_strided_slice %163 {offsets = [0, 0], sizes = [1, 64], strides = [1, 1]} : vector<2x64xf32> to vector<1x64xf32>
    %c0_i32_61 = arith.constant 0 : i32
    %165 = arith.addi %c0_i32_61, %c0_i32 : i32
    %166 = arith.index_cast %165 : i32 to index
    %c0_62 = arith.constant 0 : index
    %167 = vector.load %arg20[%166, %c0_62] : memref<16x64xf32, #tpu.memory_space<vmem>>, vector<1x64xf32>
    tpu.vector_store %arg20[%166, %c0_62], %164 {strides = array<i32>} : memref<16x64xf32, #tpu.memory_space<vmem>>, vector<1x64xf32>,
    %168 = vector.extract_strided_slice %163 {offsets = [1, 0], sizes = [1, 64], strides = [1, 1]} : vector<2x64xf32> to vector<1x64xf32>
    %c8_i32_63 = arith.constant 8 : i32
    %169 = arith.addi %c8_i32_63, %c0_i32 : i32
    %170 = arith.index_cast %169 : i32 to index
    %c0_64 = arith.constant 0 : index
    %171 = vector.load %arg20[%170, %c0_64] : memref<16x64xf32, #tpu.memory_space<vmem>>, vector<1x64xf32>
    tpu.vector_store %arg20[%170, %c0_64], %168 {strides = array<i32>} : memref<16x64xf32, #tpu.memory_space<vmem>>, vector<1x64xf32>,
    %c1_i32 = arith.constant 1 : i32
    %c0_i32_65 = arith.constant 0 : i32
    %172 = arith.addi %c0_i32_65, %c1_i32 : i32
    %173 = arith.index_cast %172 : i32 to index
    %c0_66 = arith.constant 0 : index
    %174 = vector.load %arg19[%173, %c0_66] : memref<16x192xf32, #tpu.memory_space<vmem>>, vector<1x192xf32>
    %c8_i32_67 = arith.constant 8 : i32
    %175 = arith.addi %c8_i32_67, %c1_i32 : i32
    %176 = arith.index_cast %175 : i32 to index
    %c0_68 = arith.constant 0 : index
    %177 = vector.load %arg19[%176, %c0_68] : memref<16x192xf32, #tpu.memory_space<vmem>>, vector<1x192xf32>
    %178 = tpu.concatenate %174, %177 in 0 : vector<1x192xf32>, vector<1x192xf32> -> vector<2x192xf32>
    %179 = arith.truncf %163 : vector<2x64xf32> to vector<2x64xbf16>
    %c0_69 = arith.constant 0 : index
    %c0_70 = arith.constant 0 : index
    %180 = vector.load %arg11[%c0_69, %c0_70] : memref<64x384xbf16, #tpu.memory_space<vmem>>, vector<64x384xbf16>
    %cst_71 = arith.constant dense<0.000000e+00> : vector<2x384xf32>
    %181 = tpu.matmul %179, %180, %cst_71 {dimension_numbers = #tpu.dot_dimension_numbers<[1], [0], [0], [1], [0, 0, 1, 1], [], []>} : vector<2x64xbf16>, vector<64x384xbf16>, vector<2x384xf32> -> vector<2x384xf32>
    %182 = vector.extract_strided_slice %181 {offsets = [0, 0], sizes = [2, 192], strides = [1, 1]} : vector<2x384xf32> to vector<2x192xf32>
    %183 = arith.addf %178, %182 : vector<2x192xf32>
    %184 = vector.extract_strided_slice %181 {offsets = [0, 192], sizes = [2, 192], strides = [1, 1]} : vector<2x384xf32> to vector<2x192xf32>
    %c0_72 = arith.constant 0 : index
    %c0_73 = arith.constant 0 : index
    %185 = vector.load %arg13[%c0_72, %c0_73] : memref<1x192xf32, #tpu.memory_space<vmem>>, vector<1x192xf32>
    %186 = vector.broadcast %185 : vector<1x192xf32> to vector<2x192xf32>
    %187 = arith.addf %184, %186 : vector<2x192xf32>
    %188 = vector.extract_strided_slice %183 {offsets = [0, 0], sizes = [2, 64], strides = [1, 1]} : vector<2x192xf32> to vector<2x64xf32>
    %189 = vector.extract_strided_slice %187 {offsets = [0, 0], sizes = [2, 64], strides = [1, 1]} : vector<2x192xf32> to vector<2x64xf32>
    %190 = arith.addf %188, %189 : vector<2x64xf32>
    %191 = arith.negf %190 : vector<2x64xf32>
    %192 = math.exp %191 : vector<2x64xf32>
    %cst_74 = arith.constant 1.000000e+00 : f32
    %193 = vector.broadcast %cst_74 : f32 to vector<2x64xf32>
    %194 = arith.addf %193, %192 : vector<2x64xf32>
    %195 = arith.divf %193, %194 : vector<2x64xf32>
    %196 = vector.extract_strided_slice %183 {offsets = [0, 64], sizes = [2, 64], strides = [1, 1]} : vector<2x192xf32> to vector<2x64xf32>
    %197 = vector.extract_strided_slice %187 {offsets = [0, 64], sizes = [2, 64], strides = [1, 1]} : vector<2x192xf32> to vector<2x64xf32>
    %198 = arith.addf %196, %197 : vector<2x64xf32>
    %199 = arith.negf %198 : vector<2x64xf32>
    %200 = math.exp %199 : vector<2x64xf32>
    %cst_75 = arith.constant 1.000000e+00 : f32
    %201 = vector.broadcast %cst_75 : f32 to vector<2x64xf32>
    %202 = arith.addf %201, %200 : vector<2x64xf32>
    %203 = arith.divf %201, %202 : vector<2x64xf32>
    %204 = vector.extract_strided_slice %183 {offsets = [0, 128], sizes = [2, 64], strides = [1, 1]} : vector<2x192xf32> to vector<2x64xf32>
    %205 = vector.extract_strided_slice %187 {offsets = [0, 128], sizes = [2, 64], strides = [1, 1]} : vector<2x192xf32> to vector<2x64xf32>
    %206 = arith.mulf %195, %205 : vector<2x64xf32>
    %207 = arith.addf %204, %206 : vector<2x64xf32>
    %208 = math.tanh %207 : vector<2x64xf32>
    %cst_76 = arith.constant 1.000000e+00 : f32
    %209 = vector.broadcast %cst_76 : f32 to vector<2x64xf32>
    %210 = arith.subf %209, %203 : vector<2x64xf32>
    %211 = arith.mulf %210, %208 : vector<2x64xf32>
    %212 = arith.mulf %203, %163 : vector<2x64xf32>
    %213 = arith.addf %211, %212 : vector<2x64xf32>
    %214 = vector.extract_strided_slice %213 {offsets = [0, 0], sizes = [1, 64], strides = [1, 1]} : vector<2x64xf32> to vector<1x64xf32>
    %c0_i32_77 = arith.constant 0 : i32
    %215 = arith.addi %c0_i32_77, %c1_i32 : i32
    %216 = arith.index_cast %215 : i32 to index
    %c0_78 = arith.constant 0 : index
    %217 = vector.load %arg20[%216, %c0_78] : memref<16x64xf32, #tpu.memory_space<vmem>>, vector<1x64xf32>
    tpu.vector_store %arg20[%216, %c0_78], %214 {strides = array<i32>} : memref<16x64xf32, #tpu.memory_space<vmem>>, vector<1x64xf32>,
    %218 = vector.extract_strided_slice %213 {offsets = [1, 0], sizes = [1, 64], strides = [1, 1]} : vector<2x64xf32> to vector<1x64xf32>
    %c8_i32_79 = arith.constant 8 : i32
    %219 = arith.addi %c8_i32_79, %c1_i32 : i32
    %220 = arith.index_cast %219 : i32 to index
    %c0_80 = arith.constant 0 : index
    %221 = vector.load %arg20[%220, %c0_80] : memref<16x64xf32, #tpu.memory_space<vmem>>, vector<1x64xf32>
    tpu.vector_store %arg20[%220, %c0_80], %218 {strides = array<i32>} : memref<16x64xf32, #tpu.memory_space<vmem>>, vector<1x64xf32>,
    %c2_i32 = arith.constant 2 : i32
    %c0_i32_81 = arith.constant 0 : i32
    %222 = arith.addi %c0_i32_81, %c2_i32 : i32
    %223 = arith.index_cast %222 : i32 to index
    %c0_82 = arith.constant 0 : index
    %224 = vector.load %arg19[%223, %c0_82] : memref<16x192xf32, #tpu.memory_space<vmem>>, vector<1x192xf32>
    %c8_i32_83 = arith.constant 8 : i32
    %225 = arith.addi %c8_i32_83, %c2_i32 : i32
    %226 = arith.index_cast %225 : i32 to index
    %c0_84 = arith.constant 0 : index
    %227 = vector.load %arg19[%226, %c0_84] : memref<16x192xf32, #tpu.memory_space<vmem>>, vector<1x192xf32>
    %228 = tpu.concatenate %224, %227 in 0 : vector<1x192xf32>, vector<1x192xf32> -> vector<2x192xf32>
    %229 = arith.truncf %213 : vector<2x64xf32> to vector<2x64xbf16>
    %c0_85 = arith.constant 0 : index
    %c0_86 = arith.constant 0 : index
    %230 = vector.load %arg11[%c0_85, %c0_86] : memref<64x384xbf16, #tpu.memory_space<vmem>>, vector<64x384xbf16>
    %cst_87 = arith.constant dense<0.000000e+00> : vector<2x384xf32>
    %231 = tpu.matmul %229, %230, %cst_87 {dimension_numbers = #tpu.dot_dimension_numbers<[1], [0], [0], [1], [0, 0, 1, 1], [], []>} : vector<2x64xbf16>, vector<64x384xbf16>, vector<2x384xf32> -> vector<2x384xf32>
    %232 = vector.extract_strided_slice %231 {offsets = [0, 0], sizes = [2, 192], strides = [1, 1]} : vector<2x384xf32> to vector<2x192xf32>
    %233 = arith.addf %228, %232 : vector<2x192xf32>
    %234 = vector.extract_strided_slice %231 {offsets = [0, 192], sizes = [2, 192], strides = [1, 1]} : vector<2x384xf32> to vector<2x192xf32>
    %c0_88 = arith.constant 0 : index
    %c0_89 = arith.constant 0 : index
    %235 = vector.load %arg13[%c0_88, %c0_89] : memref<1x192xf32, #tpu.memory_space<vmem>>, vector<1x192xf32>
    %236 = vector.broadcast %235 : vector<1x192xf32> to vector<2x192xf32>
    %237 = arith.addf %234, %236 : vector<2x192xf32>
    %238 = vector.extract_strided_slice %233 {offsets = [0, 0], sizes = [2, 64], strides = [1, 1]} : vector<2x192xf32> to vector<2x64xf32>
    %239 = vector.extract_strided_slice %237 {offsets = [0, 0], sizes = [2, 64], strides = [1, 1]} : vector<2x192xf32> to vector<2x64xf32>
    %240 = arith.addf %238, %239 : vector<2x64xf32>
    %241 = arith.negf %240 : vector<2x64xf32>
    %242 = math.exp %241 : vector<2x64xf32>
    %cst_90 = arith.constant 1.000000e+00 : f32
    %243 = vector.broadcast %cst_90 : f32 to vector<2x64xf32>
    %244 = arith.addf %243, %242 : vector<2x64xf32>
    %245 = arith.divf %243, %244 : vector<2x64xf32>
    %246 = vector.extract_strided_slice %233 {offsets = [0, 64], sizes = [2, 64], strides = [1, 1]} : vector<2x192xf32> to vector<2x64xf32>
    %247 = vector.extract_strided_slice %237 {offsets = [0, 64], sizes = [2, 64], strides = [1, 1]} : vector<2x192xf32> to vector<2x64xf32>
    %248 = arith.addf %246, %247 : vector<2x64xf32>
    %249 = arith.negf %248 : vector<2x64xf32>
    %250 = math.exp %249 : vector<2x64xf32>
    %cst_91 = arith.constant 1.000000e+00 : f32
    %251 = vector.broadcast %cst_91 : f32 to vector<2x64xf32>
    %252 = arith.addf %251, %250 : vector<2x64xf32>
    %253 = arith.divf %251, %252 : vector<2x64xf32>
    %254 = vector.extract_strided_slice %233 {offsets = [0, 128], sizes = [2, 64], strides = [1, 1]} : vector<2x192xf32> to vector<2x64xf32>
    %255 = vector.extract_strided_slice %237 {offsets = [0, 128], sizes = [2, 64], strides = [1, 1]} : vector<2x192xf32> to vector<2x64xf32>
    %256 = arith.mulf %245, %255 : vector<2x64xf32>
    %257 = arith.addf %254, %256 : vector<2x64xf32>
    %258 = math.tanh %257 : vector<2x64xf32>
    %cst_92 = arith.constant 1.000000e+00 : f32
    %259 = vector.broadcast %cst_92 : f32 to vector<2x64xf32>
    %260 = arith.subf %259, %253 : vector<2x64xf32>
    %261 = arith.mulf %260, %258 : vector<2x64xf32>
    %262 = arith.mulf %253, %213 : vector<2x64xf32>
    %263 = arith.addf %261, %262 : vector<2x64xf32>
    %264 = vector.extract_strided_slice %263 {offsets = [0, 0], sizes = [1, 64], strides = [1, 1]} : vector<2x64xf32> to vector<1x64xf32>
    %c0_i32_93 = arith.constant 0 : i32
    %265 = arith.addi %c0_i32_93, %c2_i32 : i32
    %266 = arith.index_cast %265 : i32 to index
    %c0_94 = arith.constant 0 : index
    %267 = vector.load %arg20[%266, %c0_94] : memref<16x64xf32, #tpu.memory_space<vmem>>, vector<1x64xf32>
    tpu.vector_store %arg20[%266, %c0_94], %264 {strides = array<i32>} : memref<16x64xf32, #tpu.memory_space<vmem>>, vector<1x64xf32>,
    %268 = vector.extract_strided_slice %263 {offsets = [1, 0], sizes = [1, 64], strides = [1, 1]} : vector<2x64xf32> to vector<1x64xf32>
    %c8_i32_95 = arith.constant 8 : i32
    %269 = arith.addi %c8_i32_95, %c2_i32 : i32
    %270 = arith.index_cast %269 : i32 to index
    %c0_96 = arith.constant 0 : index
    %271 = vector.load %arg20[%270, %c0_96] : memref<16x64xf32, #tpu.memory_space<vmem>>, vector<1x64xf32>
    tpu.vector_store %arg20[%270, %c0_96], %268 {strides = array<i32>} : memref<16x64xf32, #tpu.memory_space<vmem>>, vector<1x64xf32>,
    %c3_i32 = arith.constant 3 : i32
    %c0_i32_97 = arith.constant 0 : i32
    %272 = arith.addi %c0_i32_97, %c3_i32 : i32
    %273 = arith.index_cast %272 : i32 to index
    %c0_98 = arith.constant 0 : index
    %274 = vector.load %arg19[%273, %c0_98] : memref<16x192xf32, #tpu.memory_space<vmem>>, vector<1x192xf32>
    %c8_i32_99 = arith.constant 8 : i32
    %275 = arith.addi %c8_i32_99, %c3_i32 : i32
    %276 = arith.index_cast %275 : i32 to index
    %c0_100 = arith.constant 0 : index
    %277 = vector.load %arg19[%276, %c0_100] : memref<16x192xf32, #tpu.memory_space<vmem>>, vector<1x192xf32>
    %278 = tpu.concatenate %274, %277 in 0 : vector<1x192xf32>, vector<1x192xf32> -> vector<2x192xf32>
    %279 = arith.truncf %263 : vector<2x64xf32> to vector<2x64xbf16>
    %c0_101 = arith.constant 0 : index
    %c0_102 = arith.constant 0 : index
    %280 = vector.load %arg11[%c0_101, %c0_102] : memref<64x384xbf16, #tpu.memory_space<vmem>>, vector<64x384xbf16>
    %cst_103 = arith.constant dense<0.000000e+00> : vector<2x384xf32>
    %281 = tpu.matmul %279, %280, %cst_103 {dimension_numbers = #tpu.dot_dimension_numbers<[1], [0], [0], [1], [0, 0, 1, 1], [], []>} : vector<2x64xbf16>, vector<64x384xbf16>, vector<2x384xf32> -> vector<2x384xf32>
    %282 = vector.extract_strided_slice %281 {offsets = [0, 0], sizes = [2, 192], strides = [1, 1]} : vector<2x384xf32> to vector<2x192xf32>
    %283 = arith.addf %278, %282 : vector<2x192xf32>
    %284 = vector.extract_strided_slice %281 {offsets = [0, 192], sizes = [2, 192], strides = [1, 1]} : vector<2x384xf32> to vector<2x192xf32>
    %c0_104 = arith.constant 0 : index
    %c0_105 = arith.constant 0 : index
    %285 = vector.load %arg13[%c0_104, %c0_105] : memref<1x192xf32, #tpu.memory_space<vmem>>, vector<1x192xf32>
    %286 = vector.broadcast %285 : vector<1x192xf32> to vector<2x192xf32>
    %287 = arith.addf %284, %286 : vector<2x192xf32>
    %288 = vector.extract_strided_slice %283 {offsets = [0, 0], sizes = [2, 64], strides = [1, 1]} : vector<2x192xf32> to vector<2x64xf32>
    %289 = vector.extract_strided_slice %287 {offsets = [0, 0], sizes = [2, 64], strides = [1, 1]} : vector<2x192xf32> to vector<2x64xf32>
    %290 = arith.addf %288, %289 : vector<2x64xf32>
    %291 = arith.negf %290 : vector<2x64xf32>
    %292 = math.exp %291 : vector<2x64xf32>
    %cst_106 = arith.constant 1.000000e+00 : f32
    %293 = vector.broadcast %cst_106 : f32 to vector<2x64xf32>
    %294 = arith.addf %293, %292 : vector<2x64xf32>
    %295 = arith.divf %293, %294 : vector<2x64xf32>
    %296 = vector.extract_strided_slice %283 {offsets = [0, 64], sizes = [2, 64], strides = [1, 1]} : vector<2x192xf32> to vector<2x64xf32>
    %297 = vector.extract_strided_slice %287 {offsets = [0, 64], sizes = [2, 64], strides = [1, 1]} : vector<2x192xf32> to vector<2x64xf32>
    %298 = arith.addf %296, %297 : vector<2x64xf32>
    %299 = arith.negf %298 : vector<2x64xf32>
    %300 = math.exp %299 : vector<2x64xf32>
    %cst_107 = arith.constant 1.000000e+00 : f32
    %301 = vector.broadcast %cst_107 : f32 to vector<2x64xf32>
    %302 = arith.addf %301, %300 : vector<2x64xf32>
    %303 = arith.divf %301, %302 : vector<2x64xf32>
    %304 = vector.extract_strided_slice %283 {offsets = [0, 128], sizes = [2, 64], strides = [1, 1]} : vector<2x192xf32> to vector<2x64xf32>
    %305 = vector.extract_strided_slice %287 {offsets = [0, 128], sizes = [2, 64], strides = [1, 1]} : vector<2x192xf32> to vector<2x64xf32>
    %306 = arith.mulf %295, %305 : vector<2x64xf32>
    %307 = arith.addf %304, %306 : vector<2x64xf32>
    %308 = math.tanh %307 : vector<2x64xf32>
    %cst_108 = arith.constant 1.000000e+00 : f32
    %309 = vector.broadcast %cst_108 : f32 to vector<2x64xf32>
    %310 = arith.subf %309, %303 : vector<2x64xf32>
    %311 = arith.mulf %310, %308 : vector<2x64xf32>
    %312 = arith.mulf %303, %263 : vector<2x64xf32>
    %313 = arith.addf %311, %312 : vector<2x64xf32>
    %314 = vector.extract_strided_slice %313 {offsets = [0, 0], sizes = [1, 64], strides = [1, 1]} : vector<2x64xf32> to vector<1x64xf32>
    %c0_i32_109 = arith.constant 0 : i32
    %315 = arith.addi %c0_i32_109, %c3_i32 : i32
    %316 = arith.index_cast %315 : i32 to index
    %c0_110 = arith.constant 0 : index
    %317 = vector.load %arg20[%316, %c0_110] : memref<16x64xf32, #tpu.memory_space<vmem>>, vector<1x64xf32>
    tpu.vector_store %arg20[%316, %c0_110], %314 {strides = array<i32>} : memref<16x64xf32, #tpu.memory_space<vmem>>, vector<1x64xf32>,
    %318 = vector.extract_strided_slice %313 {offsets = [1, 0], sizes = [1, 64], strides = [1, 1]} : vector<2x64xf32> to vector<1x64xf32>
    %c8_i32_111 = arith.constant 8 : i32
    %319 = arith.addi %c8_i32_111, %c3_i32 : i32
    %320 = arith.index_cast %319 : i32 to index
    %c0_112 = arith.constant 0 : index
    %321 = vector.load %arg20[%320, %c0_112] : memref<16x64xf32, #tpu.memory_space<vmem>>, vector<1x64xf32>
    tpu.vector_store %arg20[%320, %c0_112], %318 {strides = array<i32>} : memref<16x64xf32, #tpu.memory_space<vmem>>, vector<1x64xf32>,
    %c4_i32 = arith.constant 4 : i32
    %c0_i32_113 = arith.constant 0 : i32
    %322 = arith.addi %c0_i32_113, %c4_i32 : i32
    %323 = arith.index_cast %322 : i32 to index
    %c0_114 = arith.constant 0 : index
    %324 = vector.load %arg19[%323, %c0_114] : memref<16x192xf32, #tpu.memory_space<vmem>>, vector<1x192xf32>
    %c8_i32_115 = arith.constant 8 : i32
    %325 = arith.addi %c8_i32_115, %c4_i32 : i32
    %326 = arith.index_cast %325 : i32 to index
    %c0_116 = arith.constant 0 : index
    %327 = vector.load %arg19[%326, %c0_116] : memref<16x192xf32, #tpu.memory_space<vmem>>, vector<1x192xf32>
    %328 = tpu.concatenate %324, %327 in 0 : vector<1x192xf32>, vector<1x192xf32> -> vector<2x192xf32>
    %329 = arith.truncf %313 : vector<2x64xf32> to vector<2x64xbf16>
    %c0_117 = arith.constant 0 : index
    %c0_118 = arith.constant 0 : index
    %330 = vector.load %arg11[%c0_117, %c0_118] : memref<64x384xbf16, #tpu.memory_space<vmem>>, vector<64x384xbf16>
    %cst_119 = arith.constant dense<0.000000e+00> : vector<2x384xf32>
    %331 = tpu.matmul %329, %330, %cst_119 {dimension_numbers = #tpu.dot_dimension_numbers<[1], [0], [0], [1], [0, 0, 1, 1], [], []>} : vector<2x64xbf16>, vector<64x384xbf16>, vector<2x384xf32> -> vector<2x384xf32>
    %332 = vector.extract_strided_slice %331 {offsets = [0, 0], sizes = [2, 192], strides = [1, 1]} : vector<2x384xf32> to vector<2x192xf32>
    %333 = arith.addf %328, %332 : vector<2x192xf32>
    %334 = vector.extract_strided_slice %331 {offsets = [0, 192], sizes = [2, 192], strides = [1, 1]} : vector<2x384xf32> to vector<2x192xf32>
    %c0_120 = arith.constant 0 : index
    %c0_121 = arith.constant 0 : index
    %335 = vector.load %arg13[%c0_120, %c0_121] : memref<1x192xf32, #tpu.memory_space<vmem>>, vector<1x192xf32>
    %336 = vector.broadcast %335 : vector<1x192xf32> to vector<2x192xf32>
    %337 = arith.addf %334, %336 : vector<2x192xf32>
    %338 = vector.extract_strided_slice %333 {offsets = [0, 0], sizes = [2, 64], strides = [1, 1]} : vector<2x192xf32> to vector<2x64xf32>
    %339 = vector.extract_strided_slice %337 {offsets = [0, 0], sizes = [2, 64], strides = [1, 1]} : vector<2x192xf32> to vector<2x64xf32>
    %340 = arith.addf %338, %339 : vector<2x64xf32>
    %341 = arith.negf %340 : vector<2x64xf32>
    %342 = math.exp %341 : vector<2x64xf32>
    %cst_122 = arith.constant 1.000000e+00 : f32
    %343 = vector.broadcast %cst_122 : f32 to vector<2x64xf32>
    %344 = arith.addf %343, %342 : vector<2x64xf32>
    %345 = arith.divf %343, %344 : vector<2x64xf32>
    %346 = vector.extract_strided_slice %333 {offsets = [0, 64], sizes = [2, 64], strides = [1, 1]} : vector<2x192xf32> to vector<2x64xf32>
    %347 = vector.extract_strided_slice %337 {offsets = [0, 64], sizes = [2, 64], strides = [1, 1]} : vector<2x192xf32> to vector<2x64xf32>
    %348 = arith.addf %346, %347 : vector<2x64xf32>
    %349 = arith.negf %348 : vector<2x64xf32>
    %350 = math.exp %349 : vector<2x64xf32>
    %cst_123 = arith.constant 1.000000e+00 : f32
    %351 = vector.broadcast %cst_123 : f32 to vector<2x64xf32>
    %352 = arith.addf %351, %350 : vector<2x64xf32>
    %353 = arith.divf %351, %352 : vector<2x64xf32>
    %354 = vector.extract_strided_slice %333 {offsets = [0, 128], sizes = [2, 64], strides = [1, 1]} : vector<2x192xf32> to vector<2x64xf32>
    %355 = vector.extract_strided_slice %337 {offsets = [0, 128], sizes = [2, 64], strides = [1, 1]} : vector<2x192xf32> to vector<2x64xf32>
    %356 = arith.mulf %345, %355 : vector<2x64xf32>
    %357 = arith.addf %354, %356 : vector<2x64xf32>
    %358 = math.tanh %357 : vector<2x64xf32>
    %cst_124 = arith.constant 1.000000e+00 : f32
    %359 = vector.broadcast %cst_124 : f32 to vector<2x64xf32>
    %360 = arith.subf %359, %353 : vector<2x64xf32>
    %361 = arith.mulf %360, %358 : vector<2x64xf32>
    %362 = arith.mulf %353, %313 : vector<2x64xf32>
    %363 = arith.addf %361, %362 : vector<2x64xf32>
    %364 = vector.extract_strided_slice %363 {offsets = [0, 0], sizes = [1, 64], strides = [1, 1]} : vector<2x64xf32> to vector<1x64xf32>
    %c0_i32_125 = arith.constant 0 : i32
    %365 = arith.addi %c0_i32_125, %c4_i32 : i32
    %366 = arith.index_cast %365 : i32 to index
    %c0_126 = arith.constant 0 : index
    %367 = vector.load %arg20[%366, %c0_126] : memref<16x64xf32, #tpu.memory_space<vmem>>, vector<1x64xf32>
    tpu.vector_store %arg20[%366, %c0_126], %364 {strides = array<i32>} : memref<16x64xf32, #tpu.memory_space<vmem>>, vector<1x64xf32>,
    %368 = vector.extract_strided_slice %363 {offsets = [1, 0], sizes = [1, 64], strides = [1, 1]} : vector<2x64xf32> to vector<1x64xf32>
    %c8_i32_127 = arith.constant 8 : i32
    %369 = arith.addi %c8_i32_127, %c4_i32 : i32
    %370 = arith.index_cast %369 : i32 to index
    %c0_128 = arith.constant 0 : index
    %371 = vector.load %arg20[%370, %c0_128] : memref<16x64xf32, #tpu.memory_space<vmem>>, vector<1x64xf32>
    tpu.vector_store %arg20[%370, %c0_128], %368 {strides = array<i32>} : memref<16x64xf32, #tpu.memory_space<vmem>>, vector<1x64xf32>,
    %c5_i32 = arith.constant 5 : i32
    %c0_i32_129 = arith.constant 0 : i32
    %372 = arith.addi %c0_i32_129, %c5_i32 : i32
    %373 = arith.index_cast %372 : i32 to index
    %c0_130 = arith.constant 0 : index
    %374 = vector.load %arg19[%373, %c0_130] : memref<16x192xf32, #tpu.memory_space<vmem>>, vector<1x192xf32>
    %c8_i32_131 = arith.constant 8 : i32
    %375 = arith.addi %c8_i32_131, %c5_i32 : i32
    %376 = arith.index_cast %375 : i32 to index
    %c0_132 = arith.constant 0 : index
    %377 = vector.load %arg19[%376, %c0_132] : memref<16x192xf32, #tpu.memory_space<vmem>>, vector<1x192xf32>
    %378 = tpu.concatenate %374, %377 in 0 : vector<1x192xf32>, vector<1x192xf32> -> vector<2x192xf32>
    %379 = arith.truncf %363 : vector<2x64xf32> to vector<2x64xbf16>
    %c0_133 = arith.constant 0 : index
    %c0_134 = arith.constant 0 : index
    %380 = vector.load %arg11[%c0_133, %c0_134] : memref<64x384xbf16, #tpu.memory_space<vmem>>, vector<64x384xbf16>
    %cst_135 = arith.constant dense<0.000000e+00> : vector<2x384xf32>
    %381 = tpu.matmul %379, %380, %cst_135 {dimension_numbers = #tpu.dot_dimension_numbers<[1], [0], [0], [1], [0, 0, 1, 1], [], []>} : vector<2x64xbf16>, vector<64x384xbf16>, vector<2x384xf32> -> vector<2x384xf32>
    %382 = vector.extract_strided_slice %381 {offsets = [0, 0], sizes = [2, 192], strides = [1, 1]} : vector<2x384xf32> to vector<2x192xf32>
    %383 = arith.addf %378, %382 : vector<2x192xf32>
    %384 = vector.extract_strided_slice %381 {offsets = [0, 192], sizes = [2, 192], strides = [1, 1]} : vector<2x384xf32> to vector<2x192xf32>
    %c0_136 = arith.constant 0 : index
    %c0_137 = arith.constant 0 : index
    %385 = vector.load %arg13[%c0_136, %c0_137] : memref<1x192xf32, #tpu.memory_space<vmem>>, vector<1x192xf32>
    %386 = vector.broadcast %385 : vector<1x192xf32> to vector<2x192xf32>
    %387 = arith.addf %384, %386 : vector<2x192xf32>
    %388 = vector.extract_strided_slice %383 {offsets = [0, 0], sizes = [2, 64], strides = [1, 1]} : vector<2x192xf32> to vector<2x64xf32>
    %389 = vector.extract_strided_slice %387 {offsets = [0, 0], sizes = [2, 64], strides = [1, 1]} : vector<2x192xf32> to vector<2x64xf32>
    %390 = arith.addf %388, %389 : vector<2x64xf32>
    %391 = arith.negf %390 : vector<2x64xf32>
    %392 = math.exp %391 : vector<2x64xf32>
    %cst_138 = arith.constant 1.000000e+00 : f32
    %393 = vector.broadcast %cst_138 : f32 to vector<2x64xf32>
    %394 = arith.addf %393, %392 : vector<2x64xf32>
    %395 = arith.divf %393, %394 : vector<2x64xf32>
    %396 = vector.extract_strided_slice %383 {offsets = [0, 64], sizes = [2, 64], strides = [1, 1]} : vector<2x192xf32> to vector<2x64xf32>
    %397 = vector.extract_strided_slice %387 {offsets = [0, 64], sizes = [2, 64], strides = [1, 1]} : vector<2x192xf32> to vector<2x64xf32>
    %398 = arith.addf %396, %397 : vector<2x64xf32>
    %399 = arith.negf %398 : vector<2x64xf32>
    %400 = math.exp %399 : vector<2x64xf32>
    %cst_139 = arith.constant 1.000000e+00 : f32
    %401 = vector.broadcast %cst_139 : f32 to vector<2x64xf32>
    %402 = arith.addf %401, %400 : vector<2x64xf32>
    %403 = arith.divf %401, %402 : vector<2x64xf32>
    %404 = vector.extract_strided_slice %383 {offsets = [0, 128], sizes = [2, 64], strides = [1, 1]} : vector<2x192xf32> to vector<2x64xf32>
    %405 = vector.extract_strided_slice %387 {offsets = [0, 128], sizes = [2, 64], strides = [1, 1]} : vector<2x192xf32> to vector<2x64xf32>
    %406 = arith.mulf %395, %405 : vector<2x64xf32>
    %407 = arith.addf %404, %406 : vector<2x64xf32>
    %408 = math.tanh %407 : vector<2x64xf32>
    %cst_140 = arith.constant 1.000000e+00 : f32
    %409 = vector.broadcast %cst_140 : f32 to vector<2x64xf32>
    %410 = arith.subf %409, %403 : vector<2x64xf32>
    %411 = arith.mulf %410, %408 : vector<2x64xf32>
    %412 = arith.mulf %403, %363 : vector<2x64xf32>
    %413 = arith.addf %411, %412 : vector<2x64xf32>
    %414 = vector.extract_strided_slice %413 {offsets = [0, 0], sizes = [1, 64], strides = [1, 1]} : vector<2x64xf32> to vector<1x64xf32>
    %c0_i32_141 = arith.constant 0 : i32
    %415 = arith.addi %c0_i32_141, %c5_i32 : i32
    %416 = arith.index_cast %415 : i32 to index
    %c0_142 = arith.constant 0 : index
    %417 = vector.load %arg20[%416, %c0_142] : memref<16x64xf32, #tpu.memory_space<vmem>>, vector<1x64xf32>
    tpu.vector_store %arg20[%416, %c0_142], %414 {strides = array<i32>} : memref<16x64xf32, #tpu.memory_space<vmem>>, vector<1x64xf32>,
    %418 = vector.extract_strided_slice %413 {offsets = [1, 0], sizes = [1, 64], strides = [1, 1]} : vector<2x64xf32> to vector<1x64xf32>
    %c8_i32_143 = arith.constant 8 : i32
    %419 = arith.addi %c8_i32_143, %c5_i32 : i32
    %420 = arith.index_cast %419 : i32 to index
    %c0_144 = arith.constant 0 : index
    %421 = vector.load %arg20[%420, %c0_144] : memref<16x64xf32, #tpu.memory_space<vmem>>, vector<1x64xf32>
    tpu.vector_store %arg20[%420, %c0_144], %418 {strides = array<i32>} : memref<16x64xf32, #tpu.memory_space<vmem>>, vector<1x64xf32>,
    %c6_i32 = arith.constant 6 : i32
    %c0_i32_145 = arith.constant 0 : i32
    %422 = arith.addi %c0_i32_145, %c6_i32 : i32
    %423 = arith.index_cast %422 : i32 to index
    %c0_146 = arith.constant 0 : index
    %424 = vector.load %arg19[%423, %c0_146] : memref<16x192xf32, #tpu.memory_space<vmem>>, vector<1x192xf32>
    %c8_i32_147 = arith.constant 8 : i32
    %425 = arith.addi %c8_i32_147, %c6_i32 : i32
    %426 = arith.index_cast %425 : i32 to index
    %c0_148 = arith.constant 0 : index
    %427 = vector.load %arg19[%426, %c0_148] : memref<16x192xf32, #tpu.memory_space<vmem>>, vector<1x192xf32>
    %428 = tpu.concatenate %424, %427 in 0 : vector<1x192xf32>, vector<1x192xf32> -> vector<2x192xf32>
    %429 = arith.truncf %413 : vector<2x64xf32> to vector<2x64xbf16>
    %c0_149 = arith.constant 0 : index
    %c0_150 = arith.constant 0 : index
    %430 = vector.load %arg11[%c0_149, %c0_150] : memref<64x384xbf16, #tpu.memory_space<vmem>>, vector<64x384xbf16>
    %cst_151 = arith.constant dense<0.000000e+00> : vector<2x384xf32>
    %431 = tpu.matmul %429, %430, %cst_151 {dimension_numbers = #tpu.dot_dimension_numbers<[1], [0], [0], [1], [0, 0, 1, 1], [], []>} : vector<2x64xbf16>, vector<64x384xbf16>, vector<2x384xf32> -> vector<2x384xf32>
    %432 = vector.extract_strided_slice %431 {offsets = [0, 0], sizes = [2, 192], strides = [1, 1]} : vector<2x384xf32> to vector<2x192xf32>
    %433 = arith.addf %428, %432 : vector<2x192xf32>
    %434 = vector.extract_strided_slice %431 {offsets = [0, 192], sizes = [2, 192], strides = [1, 1]} : vector<2x384xf32> to vector<2x192xf32>
    %c0_152 = arith.constant 0 : index
    %c0_153 = arith.constant 0 : index
    %435 = vector.load %arg13[%c0_152, %c0_153] : memref<1x192xf32, #tpu.memory_space<vmem>>, vector<1x192xf32>
    %436 = vector.broadcast %435 : vector<1x192xf32> to vector<2x192xf32>
    %437 = arith.addf %434, %436 : vector<2x192xf32>
    %438 = vector.extract_strided_slice %433 {offsets = [0, 0], sizes = [2, 64], strides = [1, 1]} : vector<2x192xf32> to vector<2x64xf32>
    %439 = vector.extract_strided_slice %437 {offsets = [0, 0], sizes = [2, 64], strides = [1, 1]} : vector<2x192xf32> to vector<2x64xf32>
    %440 = arith.addf %438, %439 : vector<2x64xf32>
    %441 = arith.negf %440 : vector<2x64xf32>
    %442 = math.exp %441 : vector<2x64xf32>
    %cst_154 = arith.constant 1.000000e+00 : f32
    %443 = vector.broadcast %cst_154 : f32 to vector<2x64xf32>
    %444 = arith.addf %443, %442 : vector<2x64xf32>
    %445 = arith.divf %443, %444 : vector<2x64xf32>
    %446 = vector.extract_strided_slice %433 {offsets = [0, 64], sizes = [2, 64], strides = [1, 1]} : vector<2x192xf32> to vector<2x64xf32>
    %447 = vector.extract_strided_slice %437 {offsets = [0, 64], sizes = [2, 64], strides = [1, 1]} : vector<2x192xf32> to vector<2x64xf32>
    %448 = arith.addf %446, %447 : vector<2x64xf32>
    %449 = arith.negf %448 : vector<2x64xf32>
    %450 = math.exp %449 : vector<2x64xf32>
    %cst_155 = arith.constant 1.000000e+00 : f32
    %451 = vector.broadcast %cst_155 : f32 to vector<2x64xf32>
    %452 = arith.addf %451, %450 : vector<2x64xf32>
    %453 = arith.divf %451, %452 : vector<2x64xf32>
    %454 = vector.extract_strided_slice %433 {offsets = [0, 128], sizes = [2, 64], strides = [1, 1]} : vector<2x192xf32> to vector<2x64xf32>
    %455 = vector.extract_strided_slice %437 {offsets = [0, 128], sizes = [2, 64], strides = [1, 1]} : vector<2x192xf32> to vector<2x64xf32>
    %456 = arith.mulf %445, %455 : vector<2x64xf32>
    %457 = arith.addf %454, %456 : vector<2x64xf32>
    %458 = math.tanh %457 : vector<2x64xf32>
    %cst_156 = arith.constant 1.000000e+00 : f32
    %459 = vector.broadcast %cst_156 : f32 to vector<2x64xf32>
    %460 = arith.subf %459, %453 : vector<2x64xf32>
    %461 = arith.mulf %460, %458 : vector<2x64xf32>
    %462 = arith.mulf %453, %413 : vector<2x64xf32>
    %463 = arith.addf %461, %462 : vector<2x64xf32>
    %464 = vector.extract_strided_slice %463 {offsets = [0, 0], sizes = [1, 64], strides = [1, 1]} : vector<2x64xf32> to vector<1x64xf32>
    %c0_i32_157 = arith.constant 0 : i32
    %465 = arith.addi %c0_i32_157, %c6_i32 : i32
    %466 = arith.index_cast %465 : i32 to index
    %c0_158 = arith.constant 0 : index
    %467 = vector.load %arg20[%466, %c0_158] : memref<16x64xf32, #tpu.memory_space<vmem>>, vector<1x64xf32>
    tpu.vector_store %arg20[%466, %c0_158], %464 {strides = array<i32>} : memref<16x64xf32, #tpu.memory_space<vmem>>, vector<1x64xf32>,
    %468 = vector.extract_strided_slice %463 {offsets = [1, 0], sizes = [1, 64], strides = [1, 1]} : vector<2x64xf32> to vector<1x64xf32>
    %c8_i32_159 = arith.constant 8 : i32
    %469 = arith.addi %c8_i32_159, %c6_i32 : i32
    %470 = arith.index_cast %469 : i32 to index
    %c0_160 = arith.constant 0 : index
    %471 = vector.load %arg20[%470, %c0_160] : memref<16x64xf32, #tpu.memory_space<vmem>>, vector<1x64xf32>
    tpu.vector_store %arg20[%470, %c0_160], %468 {strides = array<i32>} : memref<16x64xf32, #tpu.memory_space<vmem>>, vector<1x64xf32>,
    %c7_i32 = arith.constant 7 : i32
    %c0_i32_161 = arith.constant 0 : i32
    %472 = arith.addi %c0_i32_161, %c7_i32 : i32
    %473 = arith.index_cast %472 : i32 to index
    %c0_162 = arith.constant 0 : index
    %474 = vector.load %arg19[%473, %c0_162] : memref<16x192xf32, #tpu.memory_space<vmem>>, vector<1x192xf32>
    %c8_i32_163 = arith.constant 8 : i32
    %475 = arith.addi %c8_i32_163, %c7_i32 : i32
    %476 = arith.index_cast %475 : i32 to index
    %c0_164 = arith.constant 0 : index
    %477 = vector.load %arg19[%476, %c0_164] : memref<16x192xf32, #tpu.memory_space<vmem>>, vector<1x192xf32>
    %478 = tpu.concatenate %474, %477 in 0 : vector<1x192xf32>, vector<1x192xf32> -> vector<2x192xf32>
    %479 = arith.truncf %463 : vector<2x64xf32> to vector<2x64xbf16>
    %c0_165 = arith.constant 0 : index
    %c0_166 = arith.constant 0 : index
    %480 = vector.load %arg11[%c0_165, %c0_166] : memref<64x384xbf16, #tpu.memory_space<vmem>>, vector<64x384xbf16>
    %cst_167 = arith.constant dense<0.000000e+00> : vector<2x384xf32>
    %481 = tpu.matmul %479, %480, %cst_167 {dimension_numbers = #tpu.dot_dimension_numbers<[1], [0], [0], [1], [0, 0, 1, 1], [], []>} : vector<2x64xbf16>, vector<64x384xbf16>, vector<2x384xf32> -> vector<2x384xf32>
    %482 = vector.extract_strided_slice %481 {offsets = [0, 0], sizes = [2, 192], strides = [1, 1]} : vector<2x384xf32> to vector<2x192xf32>
    %483 = arith.addf %478, %482 : vector<2x192xf32>
    %484 = vector.extract_strided_slice %481 {offsets = [0, 192], sizes = [2, 192], strides = [1, 1]} : vector<2x384xf32> to vector<2x192xf32>
    %c0_168 = arith.constant 0 : index
    %c0_169 = arith.constant 0 : index
    %485 = vector.load %arg13[%c0_168, %c0_169] : memref<1x192xf32, #tpu.memory_space<vmem>>, vector<1x192xf32>
    %486 = vector.broadcast %485 : vector<1x192xf32> to vector<2x192xf32>
    %487 = arith.addf %484, %486 : vector<2x192xf32>
    %488 = vector.extract_strided_slice %483 {offsets = [0, 0], sizes = [2, 64], strides = [1, 1]} : vector<2x192xf32> to vector<2x64xf32>
    %489 = vector.extract_strided_slice %487 {offsets = [0, 0], sizes = [2, 64], strides = [1, 1]} : vector<2x192xf32> to vector<2x64xf32>
    %490 = arith.addf %488, %489 : vector<2x64xf32>
    %491 = arith.negf %490 : vector<2x64xf32>
    %492 = math.exp %491 : vector<2x64xf32>
    %cst_170 = arith.constant 1.000000e+00 : f32
    %493 = vector.broadcast %cst_170 : f32 to vector<2x64xf32>
    %494 = arith.addf %493, %492 : vector<2x64xf32>
    %495 = arith.divf %493, %494 : vector<2x64xf32>
    %496 = vector.extract_strided_slice %483 {offsets = [0, 64], sizes = [2, 64], strides = [1, 1]} : vector<2x192xf32> to vector<2x64xf32>
    %497 = vector.extract_strided_slice %487 {offsets = [0, 64], sizes = [2, 64], strides = [1, 1]} : vector<2x192xf32> to vector<2x64xf32>
    %498 = arith.addf %496, %497 : vector<2x64xf32>
    %499 = arith.negf %498 : vector<2x64xf32>
    %500 = math.exp %499 : vector<2x64xf32>
    %cst_171 = arith.constant 1.000000e+00 : f32
    %501 = vector.broadcast %cst_171 : f32 to vector<2x64xf32>
    %502 = arith.addf %501, %500 : vector<2x64xf32>
    %503 = arith.divf %501, %502 : vector<2x64xf32>
    %504 = vector.extract_strided_slice %483 {offsets = [0, 128], sizes = [2, 64], strides = [1, 1]} : vector<2x192xf32> to vector<2x64xf32>
    %505 = vector.extract_strided_slice %487 {offsets = [0, 128], sizes = [2, 64], strides = [1, 1]} : vector<2x192xf32> to vector<2x64xf32>
    %506 = arith.mulf %495, %505 : vector<2x64xf32>
    %507 = arith.addf %504, %506 : vector<2x64xf32>
    %508 = math.tanh %507 : vector<2x64xf32>
    %cst_172 = arith.constant 1.000000e+00 : f32
    %509 = vector.broadcast %cst_172 : f32 to vector<2x64xf32>
    %510 = arith.subf %509, %503 : vector<2x64xf32>
    %511 = arith.mulf %510, %508 : vector<2x64xf32>
    %512 = arith.mulf %503, %463 : vector<2x64xf32>
    %513 = arith.addf %511, %512 : vector<2x64xf32>
    %514 = vector.extract_strided_slice %513 {offsets = [0, 0], sizes = [1, 64], strides = [1, 1]} : vector<2x64xf32> to vector<1x64xf32>
    %c0_i32_173 = arith.constant 0 : i32
    %515 = arith.addi %c0_i32_173, %c7_i32 : i32
    %516 = arith.index_cast %515 : i32 to index
    %c0_174 = arith.constant 0 : index
    %517 = vector.load %arg20[%516, %c0_174] : memref<16x64xf32, #tpu.memory_space<vmem>>, vector<1x64xf32>
    tpu.vector_store %arg20[%516, %c0_174], %514 {strides = array<i32>} : memref<16x64xf32, #tpu.memory_space<vmem>>, vector<1x64xf32>,
    %518 = vector.extract_strided_slice %513 {offsets = [1, 0], sizes = [1, 64], strides = [1, 1]} : vector<2x64xf32> to vector<1x64xf32>
    %c8_i32_175 = arith.constant 8 : i32
    %519 = arith.addi %c8_i32_175, %c7_i32 : i32
    %520 = arith.index_cast %519 : i32 to index
    %c0_176 = arith.constant 0 : index
    %521 = vector.load %arg20[%520, %c0_176] : memref<16x64xf32, #tpu.memory_space<vmem>>, vector<1x64xf32>
    tpu.vector_store %arg20[%520, %c0_176], %518 {strides = array<i32>} : memref<16x64xf32, #tpu.memory_space<vmem>>, vector<1x64xf32>,
    %c8_i32_177 = arith.constant 8 : i32
    %c0_178 = arith.constant 0 : index
    %c0_179 = arith.constant 0 : index
    %522 = vector.load %arg20[%c0_178, %c0_179] : memref<16x64xf32, #tpu.memory_space<vmem>>, vector<16x64xf32>
    %523 = arith.truncf %522 : vector<16x64xf32> to vector<16x64xbf16>
    %c0_180 = arith.constant 0 : index
    %c0_181 = arith.constant 0 : index
    %524 = vector.load %arg14[%c0_180, %c0_181] : memref<64x516xbf16, #tpu.memory_space<vmem>>, vector<64x516xbf16>
    %cst_182 = arith.constant dense<0.000000e+00> : vector<16x516xf32>
    %525 = tpu.matmul %523, %524, %cst_182 {dimension_numbers = #tpu.dot_dimension_numbers<[1], [0], [0], [1], [0, 0, 1, 1], [], []>} : vector<16x64xbf16>, vector<64x516xbf16>, vector<16x516xf32> -> vector<16x516xf32>
    %c0_183 = arith.constant 0 : index
    %c0_184 = arith.constant 0 : index
    %526 = vector.load %arg15[%c0_183, %c0_184] : memref<1x516xf32, #tpu.memory_space<vmem>>, vector<1x516xf32>
    %527 = vector.broadcast %526 : vector<1x516xf32> to vector<16x516xf32>
    %528 = arith.addf %525, %527 : vector<16x516xf32>
    %529 = vector.extract_strided_slice %528 {offsets = [0, 0], sizes = [16, 256], strides = [1, 1]} : vector<16x516xf32> to vector<16x256xf32>
    %530 = math.exp %529 : vector<16x256xf32>
    %531 = vector.extract_strided_slice %528 {offsets = [0, 256], sizes = [16, 256], strides = [1, 1]} : vector<16x516xf32> to vector<16x256xf32>
    %532 = vector.extract_strided_slice %528 {offsets = [0, 512], sizes = [16, 4], strides = [1, 1]} : vector<16x516xf32> to vector<16x4xf32>
    %cst_185 = arith.constant dense<0xFF800000> : vector<16xf32>
    %533 = vector.multi_reduction <maximumf>, %532, %cst_185 [1] : vector<16x4xf32> to vector<16xf32>
    %534 = vector.shape_cast %533 : vector<16xf32> to vector<16x1xf32>
    %535 = vector.broadcast %534 : vector<16x1xf32> to vector<16x4xf32>
    %536 = arith.subf %532, %535 : vector<16x4xf32>
    %537 = math.exp %536 : vector<16x4xf32>
    %cst_186 = arith.constant dense<0.000000e+00> : vector<16xf32>
    %538 = vector.multi_reduction <add>, %537, %cst_186 [1] : vector<16x4xf32> to vector<16xf32>
    %539 = vector.shape_cast %538 : vector<16xf32> to vector<16x1xf32>
    %540 = vector.broadcast %539 : vector<16x1xf32> to vector<16x4xf32>
    %541 = arith.divf %537, %540 : vector<16x4xf32>
    %cst_187 = arith.constant 9.99999971E-10 : f32
    %542 = vector.shape_cast %7 : vector<16x1xi1> to vector<16x1xi1>
    %543 = vector.broadcast %542 : vector<16x1xi1> to vector<16x4xi1>
    %544 = vector.broadcast %cst_187 : f32 to vector<16x4xf32>
    %545 = arith.select %543, %541, %544 : vector<16x4xi1>, vector<16x4xf32>
    %c0_188 = arith.constant 0 : index
    %c0_189 = arith.constant 0 : index
    %546 = vector.load %arg16[%c0_188, %c0_189] : memref<16x4xf32, #tpu.memory_space<vmem>>, vector<16x4xf32>
    tpu.vector_store %arg16[%c0_188, %c0_189], %545 {strides = array<i32>} : memref<16x4xf32, #tpu.memory_space<vmem>>, vector<16x4xf32>,
    %cst_190 = arith.constant 0.000000e+00 : f32
    %547 = vector.shape_cast %7 : vector<16x1xi1> to vector<16x1xi1>
    %548 = vector.broadcast %547 : vector<16x1xi1> to vector<16x256xi1>
    %549 = vector.broadcast %cst_190 : f32 to vector<16x256xf32>
    %550 = arith.select %548, %530, %549 : vector<16x256xi1>, vector<16x256xf32>
    %c0_191 = arith.constant 0 : index
    %c0_192 = arith.constant 0 : index
    %551 = vector.load %arg17[%c0_191, %c0_192] : memref<16x256xf32, #tpu.memory_space<vmem>>, vector<16x256xf32>
    tpu.vector_store %arg17[%c0_191, %c0_192], %550 {strides = array<i32>} : memref<16x256xf32, #tpu.memory_space<vmem>>, vector<16x256xf32>,
    %cst_193 = arith.constant 0.000000e+00 : f32
    %552 = vector.shape_cast %7 : vector<16x1xi1> to vector<16x1xi1>
    %553 = vector.broadcast %552 : vector<16x1xi1> to vector<16x256xi1>
    %554 = vector.broadcast %cst_193 : f32 to vector<16x256xf32>
    %555 = arith.select %553, %531, %554 : vector<16x256xi1>, vector<16x256xf32>
    %c0_194 = arith.constant 0 : index
    %c0_195 = arith.constant 0 : index
    %556 = vector.load %arg18[%c0_194, %c0_195] : memref<16x256xf32, #tpu.memory_space<vmem>>, vector<16x256xf32>
    tpu.vector_store %arg18[%c0_194, %c0_195], %555 {strides = array<i32>} : memref<16x256xf32, #tpu.memory_space<vmem>>, vector<16x256xf32>,
    return
  }
}

</mosaic_0001>

<bundles_post_ra>
// kernel: prosody_predictor_forward.1
= control target key start
LH: loop header
LB: loop body
LE: loop exit
PB: predicated region body
PF: predicated region fallthrough
CT: control target
= control target key end

     0   :  { %s4699_s0 = inlined_call_operand.vmem [shape: s32[2], index: 0, kind: input, shape index: {}]   ;;  %s4700_s1 = inlined_call_operand.vmem [shape: f32[16,32], index: 1, kind: input, shape index: {}]   ;;  %s4701_s2 = inlined_call_operand.vmem [shape: bf16[96,32], index: 2, kind: input, shape index: {}]   ;;  %s4702_s3 = inlined_call_operand.vmem [shape: f32[1,32], index: 3, kind: input, shape index: {}]   ;;  %s4703_s4 = inlined_call_operand.hbm [shape: f32[1,32], index: 4, kind: input, shape index: {}]   ;;  %s4704_s5 = inlined_call_operand.hbm [shape: f32[1,32], index: 5, kind: input, shape index: {}]   ;;  %s4705_s6 = inlined_call_operand.vmem [shape: bf16[96,32], index: 6, kind: input, shape index: {}]   ;;  %s4706_s7 = inlined_call_operand.hbm [shape: f32[1,32], index: 7, kind: input, shape index: {}]   ;;  %s4707_s8 = inlined_call_operand.hbm [shape: f32[1,32], index: 8, kind: input, shape index: {}]   ;;  %s4708_s9 = inlined_call_operand.hbm [shape: f32[1,32], index: 9, kind: input, shape index: {}]   ;;  %s4709_s10 = inlined_call_operand.hbm [shape: bf16[32,192], index: 10, kind: input, shape index: {}]   ;;  %s4710_s11 = inlined_call_operand.hbm [shape: bf16[64,384], index: 11, kind: input, shape index: {}]   ;;  %s4711_s12 = inlined_call_operand.vmem [shape: f32[1,192], index: 12, kind: input, shape index: {}]   ;;  %s4712_s13 = inlined_call_operand.hbm [shape: f32[1,192], index: 13, kind: input, shape index: {}]   ;;  %s4713_s14 = inlined_call_operand.vmem [shape: bf16[64,516], index: 14, kind: input, shape index: {}]   ;;  %s4714_s15 = inlined_call_operand.vmem [shape: f32[1,516], index: 15, kind: input, shape index: {}]   ;;  %s4715_s16 = inlined_call_operand.vmem [shape: f32[16,4], index: 16, kind: output, shape index: {0}]   ;;  %s4716_s17 = inlined_call_operand.vmem [shape: f32[16,256], index: 17, kind: output, shape index: {1}]   ;;  %s4717_s18 = inlined_call_operand.vmem [shape: f32[16,256], index: 18, kind: output, shape index: {2}]  }
   0x1   :  { %4720 = sst [smem:[#allocation25_spill]] %s4699_s0 }
   0x2   :  { %4721 = sst [smem:[#allocation26_spill]] %s4700_s1 }
   0x3   :  { %4722 = sst [smem:[#allocation27_spill]] %s4701_s2 }
   0x4   :  { %24 = vsyncpa [#allocation6], 0 }
   0x5   :  { %25 = vsyncpa [#allocation5], 0 }
   0x6   :  { %26 = vsyncpa [#allocation9], 0 }
   0x7   :  { %27 = vsyncpa [#allocation12], 0 }
   0x8   :  { %28 = vsyncpa [#allocation15], 0 }
   0x9   :  { %29 = vsyncpa [#allocation18], 0  ;;  %s3862_s27 = smov [#allocation8]   ;;  %s3863_s29 = smov [#allocation11]  }
   0xa   :  { %s62_s28 = sshll.u32 %s3862_s27, 4  ;;  %s84_s30 = sshll.u32 %s3863_s29, 4  ;;  %s63_s28 = int_to_ptr.vmem [resolvable:$true] %s62_s28  ;;  %s85_s30 = int_to_ptr.vmem [resolvable:$true] %s84_s30 }
   0xb   :  { %s3662_s1 = scalar_lea.hbm %s4704_s5, 16 }
   0xc   :  { %p3663_p0 = scmp.ne.s32.totalorder %s4704_s5, %s3662_s1  ;;  %p3666_p1 = scmp.lt.u32.totalorder %s3662_s1, %s4704_s5 }
   0xe   :  { %p3668_p2 = pnand %p3666_p1, %p3663_p0 }
  0x10   :  { %3671 = shalt.err (!%p3668_p2)
}
  0x11   :  { %s3672_s23 = scalar_lea.vmem %s63_s28, 16  ;;  %s3676_s24 = scalar_lea.vmem %s63_s28, 32 }
  0x12   :  { %p3673_p3 = scmp.ne.s32.totalorder %s63_s28, %s3672_s23  ;;  %p3677_p4 = scmp.lt.s32.totalorder %s63_s28, %s63_s28 }
  0x13   :  { %p3678_p5 = scmp.lt.s32.totalorder %s3676_s24, %s3672_s23 }
  0x15   :  { %p3679_p6 = por %p3678_p5, %p3677_p4 }
  0x17   :  { %p3680_p7 = pnand %p3679_p6, %p3673_p3 }
  0x19   :  { %3683 = shalt.err (!%p3680_p7)
}
  0x1a   :  { %65 = dma.hbm_to_vmem [thread:$0]  %s4704_s5, 16, %s63_s28, [#allocation9]  }
  0x1b   :  { %s3684_s0 = scalar_lea.hbm %s4707_s8, 16 }
  0x1c   :  { %p3685_p8 = scmp.ne.s32.totalorder %s4707_s8, %s3684_s0  ;;  %p3688_p9 = scmp.lt.u32.totalorder %s3684_s0, %s4707_s8 }
  0x1e   :  { %p3690_p10 = pnand %p3688_p9, %p3685_p8 }
  0x20   :  { %3693 = shalt.err (!%p3690_p10)
}
  0x21   :  { %s3694_s22 = scalar_lea.vmem %s85_s30, 16  ;;  %s3698_s2 = scalar_lea.vmem %s85_s30, 32 }
  0x22   :  { %p3695_p11 = scmp.ne.s32.totalorder %s85_s30, %s3694_s22  ;;  %p3699_p12 = scmp.lt.s32.totalorder %s85_s30, %s85_s30 }
  0x23   :  { %p3700_p13 = scmp.lt.s32.totalorder %s3698_s2, %s3694_s22 }
  0x25   :  { %p3701_p0 = por %p3700_p13, %p3699_p12 }
  0x27   :  { %p3702_p1 = pnand %p3701_p0, %p3695_p11 }
  0x29   :  { %3705 = shalt.err (!%p3702_p1)
}
  0x2a   :  { %87 = dma.hbm_to_vmem [thread:$0]  %s4707_s8, 16, %s85_s30, [#allocation12]  }
  0x2b   :  { %s3864_s23 = smov [#allocation14]   ;;  %s4723_s27 = sld [smem:[#allocation25_spill]] }
  0x2c   :  { %s103_s24 = sshll.u32 %s3864_s23, 4  ;;  %s3706_s1 = scalar_lea.hbm %s4709_s10, 512  ;;  %s104_s24 = int_to_ptr.vmem [resolvable:$true] %s103_s24 }
  0x2d   :  { %p3707_p2 = scmp.ne.s32.totalorder %s4709_s10, %s3706_s1  ;;  %p3710_p3 = scmp.lt.u32.totalorder %s3706_s1, %s4709_s10 }
  0x2f   :  { %p3712_p4 = pnand %p3710_p3, %p3707_p2 }
  0x31   :  { %s36_s29 = sshll.u32 %s4723_s27, 4  ;;  %s37_s29 = int_to_ptr.vmem [resolvable:$true] %s36_s29 }
  0x32   :  { %3715 = shalt.err (!%p3712_p4)
}
  0x33   :  { %s3716_s8 = scalar_lea.vmem %s104_s24, 512  ;;  %p3721_p6 = scmp.lt.s32.totalorder %s104_s24, %s104_s24 }
  0x34   :  { %p3717_p5 = scmp.ne.s32.totalorder %s104_s24, %s3716_s8  ;;  %p3722_p7 = scmp.lt.s32.totalorder %s3716_s8, %s3716_s8 }
  0x36   :  { %p3723_p8 = por %p3722_p7, %p3721_p6 }
  0x38   :  { %p3724_p9 = pnand %p3723_p8, %p3717_p5 }
  0x3a   :  { %3727 = shalt.err (!%p3724_p9)
}
  0x3b   :  { %s3865_s30 = smov 128   ;;  %s3866_s5 = smov 8  }
  0x3c   :  { %109 = dma.hbm_to_vmem [thread:$0]  %s4709_s10, 512, %s104_s24, [#allocation15], %s3865_s30, %s3865_s30, %s3866_s5  }
  0x3d   :  { %s3728_s25 = scalar_lea.vmem %s37_s29, 16  ;;  %p3733_p11 = scmp.lt.s32.totalorder %s37_s29, %s37_s29 }
  0x3e   :  { %p3729_p10 = scmp.ne.s32.totalorder %s37_s29, %s3728_s25  ;;  %p3734_p12 = scmp.lt.s32.totalorder %s3728_s25, %s3728_s25 }
  0x40   :  { %p3735_p13 = por %p3734_p12, %p3733_p11 }
  0x42   :  { %p3736_p0 = pnand %p3735_p13, %p3729_p10 }
  0x44   :  { %3739 = shalt.err (!%p3736_p0)
}
  0x45   :  { %s3867_s26 = smov [#allocation4]   ;;  %s3868_s27 = smov [#allocation7]  }
  0x46   :  { %39 = dma.vmem_to_smem %s37_s29, 16, %s3867_s26, [#allocation6]  }
  0x47   :  { %s52_s0 = sshll.u32 %s3868_s27, 4  ;;  %s3869_s19 = smov [#allocation10]   ;;  %s53_s0 = int_to_ptr.vmem [resolvable:$true] %s52_s0 }
  0x48   :  { %s74_s1 = sshll.u32 %s3869_s19, 4  ;;  %s3740_s10 = scalar_lea.hbm %s4703_s4, 16  ;;  %s75_s1 = int_to_ptr.vmem [resolvable:$true] %s74_s1 }
  0x49   :  { %p3741_p1 = scmp.ne.s32.totalorder %s4703_s4, %s3740_s10  ;;  %p3744_p2 = scmp.lt.u32.totalorder %s3740_s10, %s4703_s4 }
  0x4b   :  { %p3746_p3 = pnand %p3744_p2, %p3741_p1 }
  0x4d   :  { %3749 = shalt.err (!%p3746_p3)
}
  0x4e   :  { %s3750_s29 = scalar_lea.vmem %s53_s0, 16  ;;  %s3754_s30 = scalar_lea.vmem %s53_s0, 32 }
  0x4f   :  { %p3751_p4 = scmp.ne.s32.totalorder %s53_s0, %s3750_s29  ;;  %p3755_p5 = scmp.lt.s32.totalorder %s53_s0, %s53_s0 }
  0x50   :  { %p3756_p6 = scmp.lt.s32.totalorder %s3754_s30, %s3750_s29 }
  0x52   :  { %p3757_p7 = por %p3756_p6, %p3755_p5 }
  0x54   :  { %p3758_p8 = pnand %p3757_p7, %p3751_p4 }
  0x56   :  { %3761 = shalt.err (!%p3758_p8)
}
  0x57   :  { %55 = dma.hbm_to_vmem [thread:$0]  %s4703_s4, 16, %s53_s0, [#allocation5]  }
  0x58   :  { %s3762_s26 = scalar_lea.hbm %s4706_s7, 16 }
  0x59   :  { %p3763_p9 = scmp.ne.s32.totalorder %s4706_s7, %s3762_s26  ;;  %p3766_p10 = scmp.lt.u32.totalorder %s3762_s26, %s4706_s7 }
  0x5b   :  { %p3768_p11 = pnand %p3766_p10, %p3763_p9 }
  0x5d   :  { %3771 = shalt.err (!%p3768_p11)
}
  0x5e   :  { %s3772_s10 = scalar_lea.vmem %s75_s1, 16  ;;  %s3776_s24 = scalar_lea.vmem %s75_s1, 32 }
  0x5f   :  { %p3773_p12 = scmp.ne.s32.totalorder %s75_s1, %s3772_s10  ;;  %p3777_p13 = scmp.lt.s32.totalorder %s75_s1, %s75_s1 }
  0x60   :  { %p3778_p0 = scmp.lt.s32.totalorder %s3776_s24, %s3772_s10 }
  0x62   :  { %p3779_p1 = por %p3778_p0, %p3777_p13 }
  0x64   :  { %p3780_p2 = pnand %p3779_p1, %p3773_p12 }
  0x66   :  { %3783 = shalt.err (!%p3780_p2)
}
  0x67   :  { %77 = dma.hbm_to_vmem [thread:$0]  %s4706_s7, 16, %s75_s1, [#allocation9]  }
  0x68   :  { %s3870_s22 = smov [#allocation13]   ;;  %s3871_s8 = smov [#allocation16]  }
  0x69   :  { %s94_s2 = sshll.u32 %s3870_s22, 4  ;;  %s115_s29 = sshll.u32 %s3871_s8, 4  ;;  %s95_s2 = int_to_ptr.vmem [resolvable:$true] %s94_s2  ;;  %s4038_s29 = int_to_ptr.vmem [resolvable:$true] %s115_s29 }
  0x6a   :  { %s3784_s28 = scalar_lea.hbm %s4708_s9, 16 }
  0x6b   :  { %p3785_p3 = scmp.ne.s32.totalorder %s4708_s9, %s3784_s28  ;;  %p3788_p4 = scmp.lt.u32.totalorder %s3784_s28, %s4708_s9 }
  0x6d   :  { %p3790_p5 = pnand %p3788_p4, %p3785_p3 }
  0x6f   :  { %3793 = shalt.err (!%p3790_p5)
}
  0x70   :  { %s3794_s7 = scalar_lea.vmem %s95_s2, 16  ;;  %s3798_s1 = scalar_lea.vmem %s95_s2, 32 }
  0x71   :  { %p3795_p6 = scmp.ne.s32.totalorder %s95_s2, %s3794_s7  ;;  %p3799_p7 = scmp.lt.s32.totalorder %s95_s2, %s95_s2 }
  0x72   :  { %p3800_p8 = scmp.lt.s32.totalorder %s3798_s1, %s3794_s7 }
  0x74   :  { %p3801_p9 = por %p3800_p8, %p3799_p7 }
  0x76   :  { %p3802_p10 = pnand %p3801_p9, %p3795_p6 }
  0x78   :  { %3805 = shalt.err (!%p3802_p10)
}
  0x79   :  { %97 = dma.hbm_to_vmem [thread:$0]  %s4708_s9, 16, %s95_s2, [#allocation12]  }
  0x7a   :  { %s3806_s24 = scalar_lea.hbm %s4710_s11, 1536 }
  0x7b   :  { %p3807_p11 = scmp.ne.s32.totalorder %s4710_s11, %s3806_s24  ;;  %p3810_p12 = scmp.lt.u32.totalorder %s3806_s24, %s4710_s11 }
  0x7d   :  { %p3812_p13 = pnand %p3810_p12, %p3807_p11 }
  0x7f   :  { %3815 = shalt.err (!%p3812_p13)
}
  0x80   :  { %s3816_s30 = scalar_lea.vmem %s4038_s29, 1536  ;;  %p3821_p1 = scmp.lt.s32.totalorder %s4038_s29, %s4038_s29 }
  0x81   :  { %p3817_p0 = scmp.ne.s32.totalorder %s4038_s29, %s3816_s30  ;;  %p3822_p2 = scmp.lt.s32.totalorder %s3816_s30, %s3816_s30 }
  0x83   :  { %p3823_p3 = por %p3822_p2, %p3821_p1 }
  0x85   :  { %p3824_p4 = pnand %p3823_p3, %p3817_p0 }
  0x87   :  { %3827 = shalt.err (!%p3824_p4)
}
  0x88   :  { %s3872_s9 = smov 192   ;;  %s3873_s2 = smov 12  }
  0x89   :  { %121 = dma.hbm_to_vmem [thread:$0]  %s4710_s11, 1536, %s4038_s29, [#allocation15], %s3872_s9, %s3872_s9, %s3873_s2  }
  0x8a   :  { %s3874_s23 = smov [#allocation17]   ;;  %s3828_s7 = scalar_lea.hbm %s4712_s13, 32 }
  0x8b   :  { %s130_s25 = sshll.u32 %s3874_s23, 4  ;;  %p3829_p5 = scmp.ne.s32.totalorder %s4712_s13, %s3828_s7  ;;  %s131_s25 = int_to_ptr.vmem [resolvable:$true] %s130_s25 }
  0x8c   :  { %p3832_p6 = scmp.lt.u32.totalorder %s3828_s7, %s4712_s13 }
  0x8e   :  { %p3834_p7 = pnand %p3832_p6, %p3829_p5 }
  0x90   :  { %3837 = shalt.err (!%p3834_p7)
}
  0x91   :  { %s3838_s10 = scalar_lea.vmem %s131_s25, 32  ;;  %p3843_p9 = scmp.lt.s32.totalorder %s131_s25, %s131_s25 }
  0x92   :  { %p3839_p8 = scmp.ne.s32.totalorder %s131_s25, %s3838_s10  ;;  %p3844_p10 = scmp.lt.s32.totalorder %s3838_s10, %s3838_s10 }
  0x94   :  { %p3845_p11 = por %p3844_p10, %p3843_p9 }
  0x96   :  { %p3846_p12 = pnand %p3845_p11, %p3839_p8 }
  0x98   :  { %3849 = shalt.err (!%p3846_p12)
}
  0x99   :  { %133 = dma.hbm_to_vmem [thread:$0]  %s4712_s13, 32, %s131_s25, [#allocation18]  }
  0x9a   :  { %3850 = dma.done.wait [#allocation6], 16  }
  0x9b   :  { %3851 = vsyncadd [#allocation6], 4294967280 }
  0x9c   :  { %3852 = dma.done.wait [#allocation5], 16  }
  0x9d   :  { %3853 = vsyncadd [#allocation5], 4294967280 }
  0x9e   :  { %3854 = dma.done.wait [#allocation9], 32  }
  0x9f   :  { %3855 = vsyncadd [#allocation9], 4294967264 }
  0xa0   :  { %3856 = dma.done.wait [#allocation12], 32  }
  0xa1   :  { %3857 = vsyncadd [#allocation12], 4294967264 }
  0xa2   :  { %3858 = dma.done.wait [#allocation15], 2048  }
  0xa3   :  { %3859 = vsyncadd [#allocation15], 4294965248 }
  0xa4   :  { %3860 = dma.done.wait [#allocation18], 32  }
  0xa5   :  { %3861 = vsyncadd [#allocation18], 4294967264 }
  0xa6   :  { %165 = sfence }
  0xa7   :  { %s4724_s0 = sld [smem:[#allocation26_spill]]  ;;  %vm184_vm0 = vcmask 1046528   ;;  %s4725_s9 = sld [smem:[#allocation27_spill]]  ;;  %v3876_v7 = vmov 0.0   ;;  %vm3878_vm1 = vmmov 0   ;;  %vm180_vm2 = vcmask 1040384  }
  0xa8   :  { %s3875_s2 = smov 32   ;;  %3276 = vmatprep.subr.bf16.mxu0 %v3876_v7  ;;  %3292 = vmatprep.subr.bf16.mxu1 %v3876_v7  ;;  %s3877_s23 = smov 64   ;;  %vm193_vm3 = vcmask 261120   ;;  %vm195_vm4 = vcmask 523264   ;;  %vm269_vm5 = vcmask 785408   ;;  %v3879_v30 = vmov 0  }
  0xa9   :  { %3288 = vmatprep.mubr.msk.bf16.mxu0 %vm3878_vm1, %v3876_v7  ;;  %3304 = vmatprep.mubr.msk.bf16.mxu1 %vm3878_vm1, %v3876_v7  ;;  %v3043_v31 = vld [vmem:[%s4702_s3] ss:$0 sm:$0xff]  ;;  %s169_s29 = sld [smem:[#allocation4]]  ;;  %v167_v40 = vlaneseq  ;;  %s3042_s3 = sld [smem:[#allocation4 + $0x1]]  ;;  %v3463_v57 = vld [vmem:[%s4705_s6 + $0x8] sm:$0xff]   ;;  %v3464_v58 = vld [vmem:[%s4705_s6 + $0x10] sm:$0xff]  }
  0xaa   :  { %3444 = vset.pattern.permute.xlu1 %v3879_v30  ;;  %3455 = vset.pattern.permute.xlu0 %v3879_v30  ;;  %v3462_v56 = vld [vmem:[%s4705_s6] sm:$0xff]   ;;  %v3465_v59 = vld [vmem:[%s4705_s6 + $0x18] sm:$0xff]   ;;  %vm889_vm10 = vcmask 516096   ;;  %vm891_vm11 = vcmask 517121   ;;  %vm2981_vm12 = vcmask 31744  }
  0xab   :  { %v4135_v41 = vshrl.u32 %v167_v40, 7  ;;  %3293 = vmatpush3.bf16.msra.mxu1 %v3462_v56  ;;  %v4198_v56 = vld [vmem:[#allocation16 + $0x18] ss:$12 sps:$4 sm:$0xff]  }
  0xac   :  { %3294 = vmatprep.subr.bf16.mxu1 %v3876_v7 }
  0xad   :  { %v175_v0 = vld [vmem:[%s4724_s0] sm:$0xff]  ;;  %v176_v1 = vld [vmem:[%s4724_s0 + $0x8] sm:$0xff]  ;;  %v3458_v11 = vld [vmem:[%s4725_s9 + $0x10] sm:$0xff]  }
  0xae   :  { %v201_v2 = vrot.slane %v176_v1, 1  ;;  %v3434_v3 = vpack.i.bf16 %v176_v1, %v175_v0  ;;  %v3456_v4 = vld [vmem:[%s4725_s9] sm:$0xff]   ;;  %v182_v5 = vrot.slane %v175_v0, 1  ;;  %v3457_v9 = vld [vmem:[%s4725_s9 + $0x8] sm:$0xff]   ;;  %v3459_v12 = vld [vmem:[%s4725_s9 + $0x18] sm:$0xff]   ;;  %v198_v15 = vrot.slane %v176_v1, 7 }
  0xaf   :  { %3277 = vmatpush3.bf16.msra.mxu0 %v3456_v4  ;;  %v3460_v13 = vld [vmem:[%s4725_s9 + $0x20] sm:$0xff]   ;;  %v3461_v14 = vld [vmem:[%s4725_s9 + $0x28] sm:$0xff]   ;;  %v178_v16 = vrot.slane %v175_v0, 7  ;;  %v170_v42 = vstv %s169_s29  ;;  %v172_v54 = vstv %s3042_s3  ;;  %3295 = vmatpush3.bf16.msra.mxu1 %v3463_v57  ;;  %v3051_v4 = vld [vmem:[#allocation7] ss:$0 sm:$0xff] }
  0xb0   :  { %3435 = vrot.lane.b32.xlu0 %v3434_v3, %s3875_s2  ;;  %v203_v6 = vsel %vm184_vm0, %v201_v2, 0.0  ;;  %v185_v8 = vsel %vm184_vm0, %v182_v5, 0.0  ;;  %3278 = vmatprep.subr.bf16.mxu0 %v3876_v7  ;;  %v200_v20 = vsel %vm180_vm2, 0.0, %v198_v15  ;;  %vm173_vm6 = vcmp.lt.s32.totalorder %v4135_v41, %v170_v42  ;;  %v3467_v15 = vld [vmem:[%s4705_s6 + $0x28] sm:$0xff]  }
  0xb1   :  { %v3439_v10 = vpack.i.bf16 %v203_v6, %v185_v8  ;;  %v181_v21 = vsel %vm180_vm2, 0.0, %v178_v16  ;;  %v361_v43 = vsel %vm173_vm6, 1, %v3879_v30  ;;  %vm174_vm7 = vcmp.lt.s32.totalorder %v4135_v41, %v172_v54  ;;  %3296 = vmatprep.subr.bf16.mxu1 %v3876_v7  ;;  %v3052_v6 = vld [vmem:[#allocation8] ss:$0 sm:$0xff]  ;;  %v4192_v54 = vld [vmem:[#allocation16 + $0x4] ss:$12 sps:$4 sm:$0xff]  }
  0xb2   :  { %v362_v55 = vsel %vm174_vm7, 1, %v3879_v30  ;;  %v4201_v57 = vld [vmem:[#allocation16 + $0x34] ss:$12 sps:$4 sm:$0xff]  }
  0xb3   :  { %3279 = vmatpush3.bf16.msra.mxu0 %v3457_v9  ;;  %3297 = vmatpush3.bf16.msra.mxu1 %v3464_v58  ;;  %v3466_v9 = vld [vmem:[%s4705_s6 + $0x20] sm:$0xff]   ;;  %v4204_v58 = vld [vmem:[#allocation16 + $0x30] ss:$12 sps:$4 sm:$0xff]  }
  0xb4   :  { %3440 = vrot.lane.b32.xlu0 %v3439_v10, %s3877_s23  ;;  %3280 = vmatprep.subr.bf16.mxu0 %v3876_v7 }
  0xb5   :  { %3298 = vmatprep.subr.bf16.mxu1 %v3876_v7 }
  0xb7   :  { %3281 = vmatpush3.bf16.msra.mxu0 %v3458_v11  ;;  %3299 = vmatpush3.bf16.msra.mxu1 %v3465_v59  ;;  %v4207_v59 = vld [vmem:[#allocation16 + $0x4c] ss:$12 sps:$4 sm:$0xff]  }
  0xb8   :  { %3282 = vmatprep.subr.bf16.mxu0 %v3876_v7  ;;  %3300 = vmatprep.subr.bf16.mxu1 %v3876_v7 }
  0xbb   :  { %3283 = vmatpush3.bf16.msra.mxu0 %v3459_v12  ;;  %3301 = vmatpush3.bf16.msra.mxu1 %v3466_v9  ;;  %v4228_v9 = vsub.s32 0, %v4135_v41 }
  0xbc   :  { %3284 = vmatprep.subr.bf16.mxu0 %v3876_v7  ;;  %3302 = vmatprep.subr.bf16.mxu1 %v3876_v7 }
  0xbf   :  { %3285 = vmatpush3.bf16.msra.mxu0 %v3460_v13  ;;  %3303 = vmatpush3.bf16.msra.mxu1 %v3467_v15 }
  0xc0   :  { %3286 = vmatprep.subr.bf16.mxu0 %v3876_v7  ;;  %750 = vmatprep.subr.bf16.mxu1 %v4192_v54 }
  0xc3   :  { %3287 = vmatpush3.bf16.msra.mxu0 %v3461_v14 }
 0x122   :  { %v3436_v17 = vpop.permute.xlu0 %3435 }
 0x123   :  { %v3438_v18 = vunpack.i.h.bf16 %v3436_v17  ;;  %v3437_v19 = vunpack.i.l.bf16 %v3436_v17 }
 0x125   :  { %v211_v25 = vsel %vm193_vm3, %v200_v20, %v3438_v18  ;;  %v194_v26 = vsel %vm193_vm3, %v181_v21, %v3437_v19 }
 0x126   :  { %v3441_v22 = vpop.permute.xlu0 %3440 }
 0x127   :  { %v3443_v23 = vunpack.i.h.bf16 %v3441_v22  ;;  %v3442_v24 = vunpack.i.l.bf16 %v3441_v22 }
 0x129   :  { %v212_v27 = vsel %vm195_vm4, %v211_v25, %v3443_v23  ;;  %v196_v28 = vsel %vm195_vm4, %v194_v26, %v3442_v24 }
 0x12a   :  { %v213_v29 = vpack.c.bf16 %v212_v27, %v196_v28 }
 0x12c   :  { %3289 = vmatmul.mubr.msk.bf16.vlgmr.msra.gmra.mrb[0].mxu0 %vm269_vm5, %v213_v29 }
 0x12d   :  { %625 = vmatprep.mubr.bf16.mxu0 %v3879_v30 }
 0x1ff   :  { %v307_v32 = vpop.f32.mrb[0].mxu0 }
 0x200   :  { %v308_v33 = vadd.f32 %v3043_v31, %v307_v32  ;;  %v3290_v34 = vpop.f32.mrb[1].mxu0 }
 0x201   :  { %v310_v35 = vpop.f32.mrb[2].mxu0 }
 0x202   :  { %v311_v36 = vadd.f32 %v3043_v31, %v310_v35  ;;  %v3291_v37 = vpop.f32.mrb[3].mxu0  ;;  %v314_v38 = vsel %vm193_vm3, %v308_v33, 0.0 }
 0x203   :  { %315 = vadd.xlane.f32.xlu1 %v314_v38 }
 0x204   :  { %v317_v39 = vsel %vm193_vm3, %v311_v36, 0.0 }
 0x207   :  { %318 = vadd.xlane.f32.xlu1 %v317_v39 }
 0x218   :  { %364 = vperm.xlu1 %3444, %v361_v43  }
 0x290   :  { %v316_v44 = vpop.xlane.xlu1 %315 }
 0x291   :  { %v321_v45 = vmul.f32 0.03125, %v316_v44  ;;  %v3053_v44 = vld [vmem:[#allocation10] ss:$0 sm:$0xff] }
 0x293   :  { %v323_v46 = vsub.f32 %v308_v33, %v321_v45 }
 0x294   :  { %v319_v47 = vpop.xlane.xlu1 %318 }
 0x295   :  { %v322_v48 = vmul.f32 0.03125, %v319_v47  ;;  %v325_v49 = vmul.f32 %v323_v46, %v323_v46 }
 0x297   :  { %v324_v50 = vsub.f32 %v311_v36, %v322_v48  ;;  %v327_v51 = vsel %vm193_vm3, %v325_v49, 0.0 }
 0x298   :  { %328 = vadd.xlane.f32.xlu0 %v327_v51  ;;  %v4159_v60 = vpop.permute.xlu1 %364 }
 0x299   :  { %v326_v52 = vmul.f32 %v324_v50, %v324_v50  ;;  %vm369_vm8 = vcmp.eq.s32.totalorder %v4159_v60, 1 }
 0x29b   :  { %v330_v53 = vsel %vm193_vm3, %v326_v52, 0.0 }
 0x29c   :  { %331 = vadd.xlane.f32.xlu1 %v330_v53  ;;  %v4190_v53 = vld [vmem:[#allocation16] ss:$12 sps:$4 sm:$0xff]  }
 0x2ad   :  { %367 = vperm.xlu1 %3444, %v362_v55   ;;  %v4194_v55 = vld [vmem:[#allocation16 + $0x1c] ss:$12 sps:$4 sm:$0xff]  }
 0x325   :  { %v329_v61 = vpop.xlane.xlu0 %328 }
 0x326   :  { %v333_v62 = vmul.f32 0.03125, %v329_v61  ;;  %v4210_v61 = vld [vmem:[#allocation16 + $0x48] ss:$12 sps:$4 sm:$0xff]  }
 0x328   :  { %v335_v63 = vadd.f32 1e-05, %v333_v62 }
 0x329   :  { %v332_v0 = vpop.xlane.xlu1 %331 }
 0x32a   :  { %3558 = vrsqrt.f32 %v335_v63  ;;  %v334_v1 = vmul.f32 0.03125, %v332_v0 }
 0x32c   :  { %v336_v2 = vadd.f32 1e-05, %v334_v1 }
 0x32d   :  { %v4169_v16 = vpop.permute.xlu1 %367 }
 0x32e   :  { %3560 = vrsqrt.f32 %v336_v2  ;;  %vm370_vm9 = vcmp.eq.s32.totalorder %v4169_v16, 1 }
 0x334   :  { %v3559_v3 = vpop.eup %3558 }
 0x335   :  { %v339_v5 = vmul.f32 %v3559_v3, %v323_v46 }
 0x337   :  { %v348_v8 = vmul.f32 %v3051_v4, %v339_v5 }
 0x338   :  { %v3561_v10 = vpop.eup %3560 }
 0x339   :  { %v340_v11 = vmul.f32 %v3561_v10, %v324_v50  ;;  %v357_v12 = vadd.f32 %v3052_v6, %v348_v8  ;;  %v3482_v10 = vld [vmem:[#allocation14 + $0x4] ss:$8 sps:$4 sm:$0xff]  }
 0x33a   :  { %593 = vmatprep.subr.bf16.mxu0 %v3482_v10 }
 0x33b   :  { %v349_v13 = vmul.f32 %v3051_v4, %v340_v11  ;;  %v359_v14 = vmax.f32 %v357_v12, 0.0  ;;  %v3480_v11 = vld [vmem:[#allocation14] ss:$8 sps:$4 sm:$0xff]   ;;  %v3485_v12 = vld [vmem:[#allocation14 + $0x14] ss:$8 sps:$4 sm:$0xff]  }
 0x33c   :  { %594 = vmatpush1.bf16.msra.mxu0 %v3480_v11 }
 0x33d   :  { %v358_v17 = vadd.f32 %v3052_v6, %v349_v13  ;;  %v371_v18 = vsel %vm369_vm8, %v359_v14, 0.0  ;;  %v833_v13 = vld [vmem:[#allocation17] sm:$0x3]  ;;  %v3483_v14 = vld [vmem:[#allocation14 + $0x10] ss:$8 sps:$4 sm:$0xff]   ;;  %595 = vmatprep.subr.bf16.mxu0 %v3485_v12 }
 0x33e   :  { %v377_v20 = vrot.slane %v371_v18, 1  ;;  %v374_v28 = vrot.slane %v371_v18, 7  ;;  %v838_v15 = vrot.slane %v833_v13, %v4228_v9 }
 0x33f   :  { %v360_v19 = vmax.f32 %v358_v17, 0.0  ;;  %v4234_v17 = vsub.s32 1, %v4135_v41 }
 0x340   :  { %v379_v24 = vsel %vm184_vm0, %v377_v20, 0.0  ;;  %v376_v34 = vsel %vm180_vm2, 0.0, %v374_v28  ;;  %596 = vmatpush1.bf16.msra.mxu0 %v3483_v14 }
 0x341   :  { %v372_v21 = vsel %vm370_vm9, %v360_v19, 0.0  ;;  %3308 = vmatprep.subr.bf16.mxu0 %v3876_v7 }
 0x342   :  { %v3445_v22 = vpack.i.bf16 %v372_v21, %v371_v18  ;;  %v393_v23 = vrot.slane %v372_v21, 1  ;;  %v390_v29 = vrot.slane %v372_v21, 7  ;;  %v842_v18 = vrot.slane %v833_v13, %v4234_v17 }
 0x344   :  { %3446 = vrot.lane.b32.xlu1 %v3445_v22, %s3875_s2  ;;  %v395_v25 = vsel %vm184_vm0, %v393_v23, 0.0  ;;  %v392_v35 = vsel %vm180_vm2, 0.0, %v390_v29 }
 0x345   :  { %v3450_v26 = vpack.i.bf16 %v395_v25, %v379_v24 }
 0x348   :  { %3451 = vrot.lane.b32.xlu1 %v3450_v26, %s3877_s23 }
 0x3b6   :  { %v3447_v27 = vpop.permute.xlu1 %3446 }
 0x3b7   :  { %v3449_v31 = vunpack.i.h.bf16 %v3447_v27  ;;  %v3448_v32 = vunpack.i.l.bf16 %v3447_v27 }
 0x3b9   :  { %v387_v38 = vsel %vm193_vm3, %v376_v34, %v3448_v32  ;;  %v403_v39 = vsel %vm193_vm3, %v392_v35, %v3449_v31  ;;  %v3062_v35 = vld [vmem:[#allocation13] ss:$0 sm:$0xff] }
 0x3ba   :  { %v3452_v33 = vpop.permute.xlu1 %3451 }
 0x3bb   :  { %v3454_v36 = vunpack.i.h.bf16 %v3452_v33  ;;  %v3453_v37 = vunpack.i.l.bf16 %v3452_v33  ;;  %v3061_v33 = vld [vmem:[#allocation11] ss:$0 sm:$0xff] }
 0x3bd   :  { %v388_v40 = vsel %vm195_vm4, %v387_v38, %v3453_v37  ;;  %v404_v42 = vsel %vm195_vm4, %v403_v39, %v3454_v36 }
 0x3be   :  { %v405_v43 = vpack.c.bf16 %v404_v42, %v388_v40 }
 0x3c0   :  { %3305 = vmatmul.mubr.msk.bf16.vlgmr.msra.gmra.mrb[0].mxu1 %vm269_vm5, %v405_v43 }
 0x3c1   :  { %782 = vmatprep.mubr.bf16.mxu1 %v3879_v30  ;;  %751 = vmatpush1.bf16.msra.mxu1 %v4190_v53 }
 0x3c2   :  { %752 = vmatprep.subr.bf16.mxu1 %v4194_v55 }
 0x3c5   :  { %753 = vmatpush1.bf16.msra.mxu1 %v4198_v56 }
 0x3c6   :  { %754 = vmatprep.subr.bf16.mxu1 %v4201_v57 }
 0x3c9   :  { %755 = vmatpush1.bf16.msra.mxu1 %v4204_v58 }
 0x3ca   :  { %756 = vmatprep.subr.bf16.mxu1 %v4207_v59 }
 0x3cd   :  { %757 = vmatpush1.bf16.msra.mxu1 %v4210_v61 }
 0x3ce   :  { %1008 = vmatprep.subr.bf16.mxu1 %v4192_v54 }
 0x3d0   :  { %783 = vmatmul.mubr.bf16.vlgmr.msra.gmra.mrb[4].mxu1 %v3879_v30 }
 0x3d1   :  { %1009 = vmatpush1.bf16.msra.mxu1 %v4190_v53  ;;  %1040 = vmatprep.mubr.bf16.mxu1 %v3879_v30 }
 0x3d2   :  { %1010 = vmatprep.subr.bf16.mxu1 %v4194_v55 }
 0x3d5   :  { %1011 = vmatpush1.bf16.msra.mxu1 %v4198_v56 }
 0x3d6   :  { %1012 = vmatprep.subr.bf16.mxu1 %v4201_v57 }
 0x3d9   :  { %1013 = vmatpush1.bf16.msra.mxu1 %v4204_v58 }
 0x3da   :  { %1014 = vmatprep.subr.bf16.mxu1 %v4207_v59 }
 0x3dd   :  { %1015 = vmatpush1.bf16.msra.mxu1 %v4210_v61 }
 0x3de   :  { %1264 = vmatprep.subr.bf16.mxu1 %v4192_v54 }
 0x493   :  { %v498_v45 = vpop.f32.mrb[0].mxu1 }
 0x494   :  { %v499_v46 = vadd.f32 %v3053_v44, %v498_v45  ;;  %v3306_v47 = vpop.f32.mrb[1].mxu1 }
 0x495   :  { %v501_v48 = vpop.f32.mrb[2].mxu1  ;;  %v3486_v47 = vld [vmem:[#allocation16 + $0x8] ss:$12 sps:$4 sm:$0xff]  }
 0x496   :  { %v502_v49 = vadd.f32 %v3053_v44, %v501_v48  ;;  %v3307_v50 = vpop.f32.mrb[3].mxu1  ;;  %v505_v51 = vsel %vm193_vm3, %v499_v46, 0.0 }
 0x497   :  { %506 = vadd.xlane.f32.xlu0 %v505_v51  ;;  %v3488_v50 = vld [vmem:[#allocation16 + $0x38] ss:$12 sps:$4 sm:$0xff]   ;;  %v3489_v51 = vld [vmem:[#allocation16 + $0x50] ss:$12 sps:$4 sm:$0xff]  }
 0x498   :  { %v508_v52 = vsel %vm193_vm3, %v502_v49, 0.0 }
 0x499   :  { %509 = vadd.xlane.f32.xlu1 %v508_v52  ;;  %v558_v52 = vld [vmem:[%s4711_s12] sm:$0x3] }
 0x4a3   :  { %v4238_v19 = vpop.f32.mrb[4].mxu1 }
 0x4a4   :  { %v4240_v20 = vpop.f32.mrb[5].mxu1 }
 0x4a5   :  { %v788_v21 = vpop.f32.mrb[6].mxu1 }
 0x4a6   :  { %v789_v22 = vpop.f32.mrb[7].mxu1 }
 0x524   :  { %v507_v62 = vpop.xlane.xlu0 %506 }
 0x525   :  { %v511_v63 = vmul.f32 0.03125, %v507_v62  ;;  %v563_v62 = vrot.slane %v558_v52, %v4228_v9 }
 0x526   :  { %v510_v0 = vpop.xlane.xlu1 %509 }
 0x527   :  { %v513_v1 = vsub.f32 %v499_v46, %v511_v63  ;;  %v512_v2 = vmul.f32 0.03125, %v510_v0  ;;  %v567_v63 = vrot.slane %v558_v52, %v4234_v17 }
 0x529   :  { %v514_v3 = vsub.f32 %v502_v49, %v512_v2  ;;  %v515_v4 = vmul.f32 %v513_v1, %v513_v1  ;;  %v3487_v49 = vld [vmem:[#allocation16 + $0x20] ss:$12 sps:$4 sm:$0xff]  }
 0x52b   :  { %v517_v5 = vsel %vm193_vm3, %v515_v4, 0.0  ;;  %v516_v6 = vmul.f32 %v514_v3, %v514_v3 }
 0x52c   :  { %518 = vadd.xlane.f32.xlu0 %v517_v5 }
 0x52d   :  { %v520_v8 = vsel %vm193_vm3, %v516_v6, 0.0 }
 0x530   :  { %521 = vadd.xlane.f32.xlu0 %v520_v8 }
 0x546   :  { %843 = vrot.lane.b32.xlu0 %v838_v15, %s3877_s23 }
 0x54a   :  { %845 = vrot.lane.b32.xlu0 %v842_v18, %s3877_s23 }
 0x5b9   :  { %v519_v23 = vpop.xlane.xlu0 %518 }
 0x5ba   :  { %v523_v24 = vmul.f32 0.03125, %v519_v23 }
 0x5bc   :  { %v525_v25 = vadd.f32 1e-05, %v523_v24 }
 0x5bd   :  { %v522_v26 = vpop.xlane.xlu0 %521 }
 0x5be   :  { %3562 = vrsqrt.f32 %v525_v25  ;;  %v524_v27 = vmul.f32 0.03125, %v522_v26 }
 0x5c0   :  { %v526_v28 = vadd.f32 1e-05, %v524_v27 }
 0x5c1   :  { %v844_v29 = vpop.permute.xlu0 %843 }
 0x5c2   :  { %3564 = vrsqrt.f32 %v526_v28  ;;  %v850_v31 = vadd.f32 %v844_v29, %v4240_v20 }
 0x5c4   :  { %853 = vrot.lane.b32.xlu0 %v850_v31, %s3877_s23 }
 0x5c5   :  { %v846_v10 = vpop.permute.xlu0 %845 }
 0x5c6   :  { %v847_v12 = vsel %vm195_vm4, %v844_v29, %v846_v10 }
 0x5c8   :  { %v3563_v32 = vpop.eup %3562 }
 0x5c9   :  { %v529_v34 = vmul.f32 %v3563_v32, %v513_v1 }
 0x5cb   :  { %v538_v36 = vmul.f32 %v3061_v33, %v529_v34 }
 0x5cc   :  { %v3565_v37 = vpop.eup %3564 }
 0x5cd   :  { %v530_v38 = vmul.f32 %v3565_v37, %v514_v3  ;;  %v547_v39 = vadd.f32 %v3062_v35, %v538_v36 }
 0x5cf   :  { %v539_v40 = vmul.f32 %v3061_v33, %v530_v38  ;;  %v549_v43 = vmax.f32 %v547_v39, 0.0 }
 0x5d1   :  { %v548_v42 = vadd.f32 %v3062_v35, %v539_v40  ;;  %v551_v45 = vsel %vm369_vm8, %v549_v43, 0.0 }
 0x5d3   :  { %v550_v44 = vmax.f32 %v548_v42, 0.0  ;;  %v3491_v42 = vld [vmem:[#allocation16 + $0x20] ss:$12 sps:$4 sm:$0xff]  }
 0x5d5   :  { %v552_v46 = vsel %vm370_vm9, %v550_v44, 0.0  ;;  %v3492_v44 = vld [vmem:[#allocation16 + $0x38] ss:$12 sps:$4 sm:$0xff]  }
 0x5d6   :  { %v553_v48 = vpack.c.bf16 %v552_v46, %v551_v45  ;;  %v3493_v45 = vld [vmem:[#allocation16 + $0x50] ss:$12 sps:$4 sm:$0xff]  }
 0x5d8   :  { %3067 = vmatmul.mubr.msk.bf16.vlgmr.msra.gmra.mrb[4].mxu0 %vm193_vm3, %v553_v48 }
 0x5d9   :  { %3309 = vmatpush3.bf16.msra.mxu0 %v3486_v47  ;;  %3316 = vmatprep.mubr.msk.bf16.mxu0 %vm3878_vm1, %v3876_v7 }
 0x5da   :  { %3310 = vmatprep.subr.bf16.mxu0 %v3876_v7 }
 0x5dd   :  { %3311 = vmatpush3.bf16.msra.mxu0 %v3487_v49 }
 0x5de   :  { %3312 = vmatprep.subr.bf16.mxu0 %v3876_v7 }
 0x5e1   :  { %3313 = vmatpush3.bf16.msra.mxu0 %v3488_v50 }
 0x5e2   :  { %3314 = vmatprep.subr.bf16.mxu0 %v3876_v7 }
 0x5e5   :  { %3315 = vmatpush3.bf16.msra.mxu0 %v3489_v51 }
 0x5e6   :  { %3320 = vmatprep.subr.bf16.mxu0 %v3876_v7 }
 0x5e8   :  { %3317 = vmatmul.mubr.bf16.vlgmr.msra.gmra.mrb[8].mxu0 %v3879_v30 }
 0x5e9   :  { %3328 = vmatprep.mubr.msk.bf16.mxu0 %vm3878_vm1, %v3876_v7 }
 0x636   :  { %v854_v27 = vpop.permute.xlu0 %853 }
 0x6ab   :  { %v627_v0 = vpop.f32.mrb[4].mxu0 }
 0x6ac   :  { %v628_v1 = vadd.f32 %v627_v0, %v563_v62  ;;  %v629_v2 = vpop.f32.mrb[5].mxu0  ;;  %v1091_v0 = vld [vmem:[#allocation17] sm:$0x3] }
 0x6ad   :  { %v630_v3 = vadd.f32 %v629_v2, %v567_v63  ;;  %v631_v4 = vpop.f32.mrb[6].mxu0  ;;  %v1096_v2 = vrot.slane %v1091_v0, %v4228_v9 }
 0x6ae   :  { %636 = vst [vmem:[#allocation2] sm:$0xff] %v628_v1  ;;  %v632_v5 = vadd.f32 %v631_v4, %v563_v62  ;;  %v633_v6 = vpop.f32.mrb[7].mxu0 }
 0x6af   :  { %637 = vst.msk [vmem:[#allocation2 + $0x8] sm:$0xff] %vm195_vm4, %v630_v3  ;;  %v634_v8 = vadd.f32 %v633_v6, %v567_v63  ;;  %v1100_v3 = vrot.slane %v1091_v0, %v4234_v17 }
 0x6b0   :  { %638 = vst [vmem:[#allocation2 + $0x10] sm:$0xff] %v632_v5 }
 0x6b1   :  { %639 = vst.msk [vmem:[#allocation2 + $0x18] sm:$0xff] %vm195_vm4, %v634_v8 }
 0x6b6   :  { %v640_v22 = vld [vmem:[#allocation2] ss:$8 sm:$0x3] }
 0x6b7   :  { %v647_v24 = vrot.slane %v640_v22, %v4228_v9  ;;  %v651_v34 = vrot.slane %v640_v22, %v4234_v17 }
 0x6b8   :  { %v642_v21 = vld [vmem:[#allocation2 + $0x10] ss:$8 sm:$0x3] }
 0x6b9   :  { %v658_v23 = vrot.slane %v642_v21, %v4228_v9  ;;  %v662_v33 = vrot.slane %v642_v21, %v4234_v17 }
 0x6bb   :  { %v825_v11 = vpop.f32.mrb[8].mxu0  ;;  %v665_v25 = vsel %vm180_vm2, %v647_v24, %v658_v23  ;;  %v666_v35 = vsel %vm180_vm2, %v651_v34, %v662_v33  ;;  %v896_v24 = vld [vmem:[#allocation2 + $0x11] ss:$8 sm:$0x3] }
 0x6bc   :  { %v851_v13 = vadd.f32 %v847_v12, %v825_v11  ;;  %v3318_v14 = vpop.f32.mrb[9].mxu0  ;;  %v831_v26 = vadd.f32 %v4238_v19, %v665_v25  ;;  %v832_v38 = vadd.f32 %v4240_v20, %v666_v35  ;;  %v3490_v19 = vld [vmem:[#allocation16 + $0x8] ss:$12 sps:$4 sm:$0xff]   ;;  %v894_v25 = vld [vmem:[#allocation2 + $0x1] ss:$8 sm:$0x3] }
 0x6bd   :  { %v828_v15 = vpop.f32.mrb[10].mxu0  ;;  %3321 = vmatpush3.bf16.msra.mxu0 %v3490_v19 }
 0x6be   :  { %v3319_v18 = vpop.f32.mrb[11].mxu0  ;;  %864 = vrot.lane.b32.xlu1 %v851_v13, %s3877_s23  ;;  %v856_v28 = vadd.f32 %v854_v27, %v831_v26  ;;  %3322 = vmatprep.subr.bf16.mxu0 %v3876_v7  ;;  %v901_v27 = vrot.slane %v894_v25, %v4228_v9 }
 0x6c0   :  { %v3080_v31 = vmul.f32 -1.442695, %v856_v28 }
 0x6c1   :  { %3323 = vmatpush3.bf16.msra.mxu0 %v3491_v42 }
 0x6c2   :  { %3566 = vpow2.f32 %v3080_v31  ;;  %3324 = vmatprep.subr.bf16.mxu0 %v3876_v7 }
 0x6c5   :  { %3325 = vmatpush3.bf16.msra.mxu0 %v3492_v44  ;;  %v3494_v44 = vld [vmem:[#allocation16 + $0x8] ss:$12 sps:$4 sm:$0xff]  }
 0x6c6   :  { %3326 = vmatprep.subr.bf16.mxu0 %v3876_v7 }
 0x6c9   :  { %3327 = vmatpush3.bf16.msra.mxu0 %v3493_v45  ;;  %v3495_v45 = vld [vmem:[#allocation16 + $0x20] ss:$12 sps:$4 sm:$0xff]  }
 0x6ca   :  { %3332 = vmatprep.subr.bf16.mxu0 %v3876_v7 }
 0x6cc   :  { %v3567_v29 = vpop.eup %3566 }
 0x6cd   :  { %v860_v32 = vadd.f32 1.0, %v3567_v29 }
 0x6cf   :  { %3568 = vrcp.f32 %v860_v32 }
 0x6d9   :  { %v3569_v36 = vpop.eup %3568 }
 0x730   :  { %v865_v37 = vpop.permute.xlu1 %864 }
 0x731   :  { %v874_v39 = vmul.f32 %v3569_v36, %v865_v37  ;;  %v867_v20 = vadd.f32 %v865_v37, %v831_v26  ;;  %v912_v26 = vrot.slane %v896_v24, %v4228_v9  ;;  %v916_v36 = vrot.slane %v896_v24, %v4234_v17 }
 0x732   :  { %v905_v37 = vrot.slane %v894_v25, %v4234_v17 }
 0x733   :  { %v875_v40 = vadd.f32 %v874_v39, %v832_v38  ;;  %v3081_v46 = vmul.f32 -1.442695, %v867_v20  ;;  %v919_v28 = vsel %vm180_vm2, %v901_v27, %v912_v26 }
 0x734   :  { %v920_v39 = vsel %vm180_vm2, %v905_v37, %v916_v36 }
 0x735   :  { %3570 = vtanh.f32 %v875_v40 }
 0x736   :  { %3572 = vpow2.f32 %v3081_v46  ;;  %v3496_v46 = vld [vmem:[#allocation16 + $0x38] ss:$12 sps:$4 sm:$0xff]  }
 0x73f   :  { %v3571_v43 = vpop.eup %3570 }
 0x740   :  { %879 = vrot.lane.b32.xlu0 %v3571_v43, %s3877_s23  ;;  %v3573_v47 = vpop.eup %3572 }
 0x741   :  { %v871_v48 = vadd.f32 1.0, %v3573_v47  ;;  %v3497_v47 = vld [vmem:[#allocation16 + $0x50] ss:$12 sps:$4 sm:$0xff]  }
 0x743   :  { %3574 = vrcp.f32 %v871_v48 }
 0x74d   :  { %v3575_v49 = vpop.eup %3574 }
 0x74e   :  { %v877_v50 = vsub.f32 1.0, %v3575_v49  ;;  %v883_v52 = vmul.f32 0.0, %v3575_v49 }
 0x7b2   :  { %v880_v51 = vpop.permute.xlu0 %879 }
 0x7b3   :  { %v882_v62 = vmul.f32 %v880_v51, %v877_v50 }
 0x7b5   :  { %v4280_v63 = vadd.f32 %v883_v52, %v882_v62  ;;  %v1347_v52 = vld [vmem:[#allocation17] sm:$0x3] }
 0x7b6   :  { %v1352_v62 = vrot.slane %v1347_v52, %v4228_v9 }
 0x7b7   :  { %v921_v1 = vpack.c.bf16 %v4280_v63, %v4280_v63 }
 0x7b9   :  { %939 = vrot.lane.b32.xlu0 %v921_v1, %s3877_s23 }
 0x7bd   :  { %1101 = vrot.lane.b32.xlu0 %v1096_v2, %s3877_s23 }
 0x7c1   :  { %1103 = vrot.lane.b32.xlu0 %v1100_v3, %s3877_s23 }
 0x82b   :  { %v940_v4 = vpop.permute.xlu0 %939 }
 0x82c   :  { %3094 = vmatmul.mubr.msk.bf16.vlgmr.msra.gmra.mrb[8].mxu1 %vm195_vm4, %v940_v4  ;;  %3329 = vmatmul.mubr.msk.bf16.vlgmr.msra.gmra.mrb[12].mxu0 %vm195_vm4, %v940_v4 }
 0x82d   :  { %1265 = vmatpush1.bf16.msra.mxu1 %v4190_v53  ;;  %1296 = vmatprep.mubr.bf16.mxu1 %v3879_v30 }
 0x82e   :  { %1266 = vmatprep.subr.bf16.mxu1 %v4194_v55  ;;  %3340 = vmatprep.mubr.msk.bf16.mxu0 %vm3878_vm1, %v3876_v7 }
 0x82f   :  { %v1102_v5 = vpop.permute.xlu0 %1101  ;;  %3333 = vmatpush3.bf16.msra.mxu0 %v3494_v44 }
 0x830   :  { %3334 = vmatprep.subr.bf16.mxu0 %v3876_v7 }
 0x831   :  { %1267 = vmatpush1.bf16.msra.mxu1 %v4198_v56 }
 0x832   :  { %1268 = vmatprep.subr.bf16.mxu1 %v4201_v57 }
 0x833   :  { %v1104_v6 = vpop.permute.xlu0 %1103  ;;  %3335 = vmatpush3.bf16.msra.mxu0 %v3495_v45 }
 0x834   :  { %v1105_v8 = vsel %vm195_vm4, %v1102_v5, %v1104_v6  ;;  %3336 = vmatprep.subr.bf16.mxu0 %v3876_v7 }
 0x835   :  { %1269 = vmatpush1.bf16.msra.mxu1 %v4204_v58 }
 0x836   :  { %1270 = vmatprep.subr.bf16.mxu1 %v4207_v59 }
 0x837   :  { %3337 = vmatpush3.bf16.msra.mxu0 %v3496_v46  ;;  %v3498_v46 = vld [vmem:[#allocation16 + $0x8] ss:$12 sps:$4 sm:$0xff]  }
 0x838   :  { %3338 = vmatprep.subr.bf16.mxu0 %v3876_v7 }
 0x839   :  { %1271 = vmatpush1.bf16.msra.mxu1 %v4210_v61 }
 0x83a   :  { %1520 = vmatprep.subr.bf16.mxu1 %v4192_v54 }
 0x83b   :  { %3339 = vmatpush3.bf16.msra.mxu0 %v3497_v47  ;;  %v3499_v47 = vld [vmem:[#allocation16 + $0x20] ss:$12 sps:$4 sm:$0xff]  }
 0x83c   :  { %3344 = vmatprep.subr.bf16.mxu0 %v3876_v7 }
 0x8ff   :  { %v1042_v10 = vpop.f32.mrb[8].mxu1  ;;  %v1083_v11 = vpop.f32.mrb[12].mxu0 }
 0x900   :  { %v1109_v12 = vadd.f32 %v1105_v8, %v1083_v11  ;;  %v1044_v13 = vpop.f32.mrb[9].mxu1  ;;  %v3330_v14 = vpop.f32.mrb[13].mxu0  ;;  %v1089_v31 = vadd.f32 %v1042_v10, %v919_v28  ;;  %v1356_v8 = vrot.slane %v1347_v52, %v4234_v17  ;;  %v1152_v28 = vld [vmem:[#allocation2 + $0x12] ss:$8 sm:$0x3] }
 0x901   :  { %v1108_v15 = vadd.f32 %v1102_v5, %v1044_v13  ;;  %v1046_v18 = vpop.f32.mrb[10].mxu1  ;;  %v1086_v21 = vpop.f32.mrb[14].mxu0  ;;  %v1090_v19 = vadd.f32 %v1044_v13, %v920_v39  ;;  %v1172_v39 = vrot.slane %v1152_v28, %v4234_v17 }
 0x902   :  { %v3331_v22 = vpop.f32.mrb[15].mxu0  ;;  %1122 = vrot.lane.b32.xlu0 %v1109_v12, %s3877_s23  ;;  %v1047_v23 = vpop.f32.mrb[11].mxu1 }
 0x903   :  { %1111 = vrot.lane.b32.xlu1 %v1108_v15, %s3877_s23 }
 0x974   :  { %v1123_v40 = vpop.permute.xlu0 %1122 }
 0x975   :  { %v1112_v29 = vpop.permute.xlu1 %1111  ;;  %v1125_v48 = vadd.f32 %v1123_v40, %v1089_v31 }
 0x976   :  { %v1114_v32 = vadd.f32 %v1112_v29, %v1089_v31  ;;  %v1168_v31 = vrot.slane %v1152_v28, %v4228_v9 }
 0x977   :  { %v3097_v49 = vmul.f32 -1.442695, %v1125_v48 }
 0x978   :  { %v3096_v33 = vmul.f32 -1.442695, %v1114_v32 }
 0x97a   :  { %3576 = vpow2.f32 %v3096_v33 }
 0x984   :  { %v3577_v34 = vpop.eup %3576 }
 0x985   :  { %v1118_v35 = vadd.f32 1.0, %v3577_v34 }
 0x987   :  { %3578 = vrcp.f32 %v1118_v35 }
 0x991   :  { %v3579_v38 = vpop.eup %3578 }
 0x992   :  { %v1132_v42 = vmul.f32 %v3579_v38, %v1123_v40 }
 0x994   :  { %v1133_v43 = vadd.f32 %v1132_v42, %v1090_v19 }
 0x996   :  { %3580 = vtanh.f32 %v1133_v43 }
 0x997   :  { %3582 = vpow2.f32 %v3097_v49  ;;  %v3500_v49 = vld [vmem:[#allocation16 + $0x38] ss:$12 sps:$4 sm:$0xff]  }
 0x9a0   :  { %v3581_v20 = vpop.eup %3580 }
 0x9a1   :  { %1137 = vrot.lane.b32.xlu1 %v3581_v20, %s3877_s23  ;;  %v3583_v50 = vpop.eup %3582 }
 0x9a2   :  { %v1129_v51 = vadd.f32 1.0, %v3583_v50  ;;  %v3501_v50 = vld [vmem:[#allocation16 + $0x50] ss:$12 sps:$4 sm:$0xff]  }
 0x9a4   :  { %3584 = vrcp.f32 %v1129_v51 }
 0x9a5   :  { %1357 = vrot.lane.b32.xlu1 %v1352_v62, %s3877_s23 }
 0x9ae   :  { %v3585_v0 = vpop.eup %3584 }
 0x9af   :  { %v1135_v1 = vsub.f32 1.0, %v3585_v0  ;;  %v1141_v3 = vmul.f32 %v3585_v0, %v4280_v63 }
 0xa13   :  { %v1138_v2 = vpop.permute.xlu1 %1137 }
 0xa14   :  { %v1140_v4 = vmul.f32 %v1138_v2, %v1135_v1  ;;  %v1603_v1 = vld [vmem:[#allocation17] sm:$0x3] }
 0xa15   :  { %v1608_v2 = vrot.slane %v1603_v1, %v4228_v9 }
 0xa16   :  { %v4319_v5 = vadd.f32 %v1141_v3, %v1140_v4 }
 0xa17   :  { %v1358_v12 = vpop.permute.xlu1 %1357 }
 0xa18   :  { %v1177_v6 = vpack.c.bf16 %v4319_v5, %v4319_v5 }
 0xa1a   :  { %1195 = vrot.lane.b32.xlu0 %v1177_v6, %s3877_s23 }
 0xa1e   :  { %1359 = vrot.lane.b32.xlu0 %v1356_v8, %s3877_s23 }
 0xa8c   :  { %v1196_v10 = vpop.permute.xlu0 %1195 }
 0xa8d   :  { %3110 = vmatmul.mubr.msk.bf16.vlgmr.msra.gmra.mrb[12].mxu1 %vm195_vm4, %v1196_v10  ;;  %3341 = vmatmul.mubr.msk.bf16.vlgmr.msra.gmra.mrb[16].mxu0 %vm195_vm4, %v1196_v10 }
 0xa8e   :  { %1521 = vmatpush1.bf16.msra.mxu1 %v4190_v53  ;;  %1552 = vmatprep.mubr.bf16.mxu1 %v3879_v30 }
 0xa8f   :  { %1522 = vmatprep.subr.bf16.mxu1 %v4194_v55  ;;  %3352 = vmatprep.mubr.msk.bf16.mxu0 %vm3878_vm1, %v3876_v7 }
 0xa90   :  { %v1360_v11 = vpop.permute.xlu0 %1359  ;;  %3345 = vmatpush3.bf16.msra.mxu0 %v3498_v46  ;;  %v3504_v46 = vld [vmem:[#allocation16 + $0x38] ss:$12 sps:$4 sm:$0xff]  }
 0xa91   :  { %v1361_v13 = vsel %vm195_vm4, %v1358_v12, %v1360_v11  ;;  %3346 = vmatprep.subr.bf16.mxu0 %v3876_v7 }
 0xa92   :  { %1523 = vmatpush1.bf16.msra.mxu1 %v4198_v56 }
 0xa93   :  { %1524 = vmatprep.subr.bf16.mxu1 %v4201_v57 }
 0xa94   :  { %3347 = vmatpush3.bf16.msra.mxu0 %v3499_v47  ;;  %v3505_v47 = vld [vmem:[#allocation16 + $0x50] ss:$12 sps:$4 sm:$0xff]  }
 0xa95   :  { %3348 = vmatprep.subr.bf16.mxu0 %v3876_v7 }
 0xa96   :  { %1525 = vmatpush1.bf16.msra.mxu1 %v4204_v58 }
 0xa97   :  { %1526 = vmatprep.subr.bf16.mxu1 %v4207_v59 }
 0xa98   :  { %3349 = vmatpush3.bf16.msra.mxu0 %v3500_v49 }
 0xa99   :  { %3350 = vmatprep.subr.bf16.mxu0 %v3876_v7 }
 0xa9a   :  { %1527 = vmatpush1.bf16.msra.mxu1 %v4210_v61 }
 0xa9b   :  { %1776 = vmatprep.subr.bf16.mxu1 %v4192_v54  ;;  %v1150_v54 = vld [vmem:[#allocation2 + $0x2] ss:$8 sm:$0x3] }
 0xa9c   :  { %v1157_v29 = vrot.slane %v1150_v54, %v4228_v9  ;;  %v1161_v40 = vrot.slane %v1150_v54, %v4234_v17  ;;  %3351 = vmatpush3.bf16.msra.mxu0 %v3501_v50 }
 0xa9d   :  { %3356 = vmatprep.subr.bf16.mxu0 %v3876_v7 }
 0xa9e   :  { %v1175_v32 = vsel %vm180_vm2, %v1157_v29, %v1168_v31  ;;  %v1176_v42 = vsel %vm180_vm2, %v1161_v40, %v1172_v39 }
 0xb60   :  { %v1298_v14 = vpop.f32.mrb[12].mxu1  ;;  %v1339_v15 = vpop.f32.mrb[16].mxu0 }
 0xb61   :  { %v1365_v18 = vadd.f32 %v1361_v13, %v1339_v15  ;;  %v1300_v21 = vpop.f32.mrb[13].mxu1  ;;  %v3342_v22 = vpop.f32.mrb[17].mxu0  ;;  %v1345_v33 = vadd.f32 %v1298_v14, %v1175_v32  ;;  %v1612_v13 = vrot.slane %v1603_v1, %v4234_v17 }
 0xb62   :  { %v1364_v23 = vadd.f32 %v1358_v12, %v1300_v21  ;;  %v1302_v24 = vpop.f32.mrb[14].mxu1  ;;  %v1342_v25 = vpop.f32.mrb[18].mxu0  ;;  %v1346_v44 = vadd.f32 %v1300_v21, %v1176_v42 }
 0xb63   :  { %v3343_v26 = vpop.f32.mrb[19].mxu0  ;;  %1378 = vrot.lane.b32.xlu0 %v1365_v18, %s3877_s23  ;;  %v1303_v27 = vpop.f32.mrb[15].mxu1 }
 0xb64   :  { %1367 = vrot.lane.b32.xlu1 %v1364_v23, %s3877_s23 }
 0xbd5   :  { %v1379_v43 = vpop.permute.xlu0 %1378 }
 0xbd6   :  { %v1368_v34 = vpop.permute.xlu1 %1367  ;;  %v1381_v51 = vadd.f32 %v1379_v43, %v1345_v33 }
 0xbd7   :  { %v1370_v35 = vadd.f32 %v1368_v34, %v1345_v33 }
 0xbd8   :  { %v3113_v52 = vmul.f32 -1.442695, %v1381_v51 }
 0xbd9   :  { %v3112_v36 = vmul.f32 -1.442695, %v1370_v35 }
 0xbdb   :  { %3586 = vpow2.f32 %v3112_v36 }
 0xbe5   :  { %v3587_v37 = vpop.eup %3586 }
 0xbe6   :  { %v1374_v38 = vadd.f32 1.0, %v3587_v37 }
 0xbe8   :  { %3588 = vrcp.f32 %v1374_v38 }
 0xbf2   :  { %v3589_v19 = vpop.eup %3588 }
 0xbf3   :  { %v1388_v45 = vmul.f32 %v3589_v19, %v1379_v43 }
 0xbf5   :  { %v1389_v20 = vadd.f32 %v1388_v45, %v1346_v44  ;;  %v3502_v44 = vld [vmem:[#allocation16 + $0x8] ss:$12 sps:$4 sm:$0xff]   ;;  %v3503_v45 = vld [vmem:[#allocation16 + $0x20] ss:$12 sps:$4 sm:$0xff]  }
 0xbf7   :  { %3590 = vtanh.f32 %v1389_v20 }
 0xbf8   :  { %3592 = vpow2.f32 %v3113_v52  ;;  %v1859_v52 = vld [vmem:[#allocation17] sm:$0x3] }
 0xc01   :  { %v3591_v48 = vpop.eup %3590 }
 0xc02   :  { %1393 = vrot.lane.b32.xlu1 %v3591_v48, %s3877_s23  ;;  %v3593_v62 = vpop.eup %3592 }
 0xc03   :  { %v1385_v0 = vadd.f32 1.0, %v3593_v62  ;;  %v1864_v62 = vrot.slane %v1859_v52, %v4228_v9 }
 0xc05   :  { %3594 = vrcp.f32 %v1385_v0 }
 0xc06   :  { %1613 = vrot.lane.b32.xlu1 %v1608_v2, %s3877_s23 }
 0xc0f   :  { %v3595_v3 = vpop.eup %3594 }
 0xc10   :  { %v1391_v4 = vsub.f32 1.0, %v3595_v3  ;;  %v1397_v8 = vmul.f32 %v3595_v3, %v4319_v5 }
 0xc74   :  { %v1394_v6 = vpop.permute.xlu1 %1393 }
 0xc75   :  { %v1396_v10 = vmul.f32 %v1394_v6, %v1391_v4 }
 0xc77   :  { %v4356_v11 = vadd.f32 %v1397_v8, %v1396_v10  ;;  %v1868_v10 = vrot.slane %v1859_v52, %v4234_v17  ;;  %v3521_v52 = vld [vmem:[#allocation16 + $0x50] ss:$12 sps:$4 sm:$0xff]  }
 0xc78   :  { %v1614_v18 = vpop.permute.xlu1 %1613 }
 0xc79   :  { %v1433_v12 = vpack.c.bf16 %v4356_v11, %v4356_v11 }
 0xc7b   :  { %1451 = vrot.lane.b32.xlu0 %v1433_v12, %s3877_s23 }
 0xc7f   :  { %1615 = vrot.lane.b32.xlu0 %v1612_v13, %s3877_s23 }
 0xced   :  { %v1452_v14 = vpop.permute.xlu0 %1451 }
 0xcee   :  { %3126 = vmatmul.mubr.msk.bf16.vlgmr.msra.gmra.mrb[16].mxu1 %vm195_vm4, %v1452_v14  ;;  %3353 = vmatmul.mubr.msk.bf16.vlgmr.msra.gmra.mrb[20].mxu0 %vm195_vm4, %v1452_v14 }
 0xcef   :  { %1777 = vmatpush1.bf16.msra.mxu1 %v4190_v53  ;;  %1808 = vmatprep.mubr.bf16.mxu1 %v3879_v30 }
 0xcf0   :  { %1778 = vmatprep.subr.bf16.mxu1 %v4194_v55  ;;  %3364 = vmatprep.mubr.msk.bf16.mxu0 %vm3878_vm1, %v3876_v7 }
 0xcf1   :  { %v1616_v15 = vpop.permute.xlu0 %1615  ;;  %3357 = vmatpush3.bf16.msra.mxu0 %v3502_v44  ;;  %v3509_v44 = vld [vmem:[#allocation16 + $0x8] ss:$12 sps:$4 sm:$0xff]  }
 0xcf2   :  { %v1617_v53 = vsel %vm195_vm4, %v1614_v18, %v1616_v15  ;;  %3358 = vmatprep.subr.bf16.mxu0 %v3876_v7 }
 0xcf3   :  { %1779 = vmatpush1.bf16.msra.mxu1 %v4198_v56 }
 0xcf4   :  { %1780 = vmatprep.subr.bf16.mxu1 %v4201_v57 }
 0xcf5   :  { %3359 = vmatpush3.bf16.msra.mxu0 %v3503_v45  ;;  %v4415_v45 = vld [vmem:[#allocation16 + $0x1c] ss:$12 sps:$4 sm:$0xff]  }
 0xcf6   :  { %3360 = vmatprep.subr.bf16.mxu0 %v3876_v7 }
 0xcf7   :  { %1781 = vmatpush1.bf16.msra.mxu1 %v4204_v58  ;;  %v1408_v58 = vld [vmem:[#allocation2 + $0x13] ss:$8 sm:$0x3] }
 0xcf8   :  { %1782 = vmatprep.subr.bf16.mxu1 %v4207_v59  ;;  %v1406_v59 = vld [vmem:[#allocation2 + $0x3] ss:$8 sm:$0x3]  ;;  %v1428_v36 = vrot.slane %v1408_v58, %v4234_v17 }
 0xcf9   :  { %v1413_v28 = vrot.slane %v1406_v59, %v4228_v9  ;;  %v1417_v37 = vrot.slane %v1406_v59, %v4234_v17  ;;  %3361 = vmatpush3.bf16.msra.mxu0 %v3504_v46  ;;  %v4418_v46 = vld [vmem:[#allocation16 + $0x18] ss:$12 sps:$4 sm:$0xff]  }
 0xcfa   :  { %3362 = vmatprep.subr.bf16.mxu0 %v3876_v7 }
 0xcfb   :  { %1783 = vmatpush1.bf16.msra.mxu1 %v4210_v61  ;;  %v1424_v61 = vrot.slane %v1408_v58, %v4228_v9  ;;  %v1432_v39 = vsel %vm180_vm2, %v1417_v37, %v1428_v36 }
 0xcfd   :  { %v1431_v54 = vsel %vm180_vm2, %v1413_v28, %v1424_v61  ;;  %3363 = vmatpush3.bf16.msra.mxu0 %v3505_v47  ;;  %v4422_v47 = vld [vmem:[#allocation16 + $0x34] ss:$12 sps:$4 sm:$0xff]  }
 0xcfe   :  { %3368 = vmatprep.subr.bf16.mxu0 %v3876_v7 }
 0xdc1   :  { %v1554_v21 = vpop.f32.mrb[16].mxu1  ;;  %v1595_v22 = vpop.f32.mrb[20].mxu0 }
 0xdc2   :  { %v1621_v55 = vadd.f32 %v1617_v53, %v1595_v22  ;;  %v1556_v23 = vpop.f32.mrb[17].mxu1  ;;  %v3354_v24 = vpop.f32.mrb[21].mxu0  ;;  %v1601_v31 = vadd.f32 %v1554_v21, %v1431_v54 }
 0xdc3   :  { %v1620_v25 = vadd.f32 %v1614_v18, %v1556_v23  ;;  %v1558_v26 = vpop.f32.mrb[18].mxu1  ;;  %v1598_v56 = vpop.f32.mrb[22].mxu0  ;;  %v1602_v19 = vadd.f32 %v1556_v23, %v1432_v39 }
 0xdc4   :  { %v3355_v27 = vpop.f32.mrb[23].mxu0  ;;  %1634 = vrot.lane.b32.xlu0 %v1621_v55, %s3877_s23  ;;  %v1559_v57 = vpop.f32.mrb[19].mxu1 }
 0xdc5   :  { %1623 = vrot.lane.b32.xlu1 %v1620_v25, %s3877_s23  ;;  %v1664_v27 = vld [vmem:[#allocation2 + $0x14] ss:$8 sm:$0x3]  ;;  %v1662_v57 = vld [vmem:[#allocation2 + $0x4] ss:$8 sm:$0x3] }
 0xdc6   :  { %v1680_v58 = vrot.slane %v1664_v27, %v4228_v9  ;;  %v1669_v59 = vrot.slane %v1662_v57, %v4228_v9 }
 0xdc8   :  { %v1687_v61 = vsel %vm180_vm2, %v1669_v59, %v1680_v58 }
 0xe36   :  { %v1635_v40 = vpop.permute.xlu0 %1634 }
 0xe37   :  { %v1624_v29 = vpop.permute.xlu1 %1623  ;;  %v1637_v48 = vadd.f32 %v1635_v40, %v1601_v31 }
 0xe38   :  { %v1626_v32 = vadd.f32 %v1624_v29, %v1601_v31 }
 0xe39   :  { %v3129_v49 = vmul.f32 -1.442695, %v1637_v48 }
 0xe3a   :  { %v3128_v33 = vmul.f32 -1.442695, %v1626_v32 }
 0xe3c   :  { %3596 = vpow2.f32 %v3128_v33 }
 0xe46   :  { %v3597_v34 = vpop.eup %3596 }
 0xe47   :  { %v1630_v35 = vadd.f32 1.0, %v3597_v34  ;;  %v1684_v34 = vrot.slane %v1664_v27, %v4234_v17 }
 0xe49   :  { %3598 = vrcp.f32 %v1630_v35  ;;  %v1673_v35 = vrot.slane %v1662_v57, %v4234_v17 }
 0xe4b   :  { %v1688_v37 = vsel %vm180_vm2, %v1673_v35, %v1684_v34 }
 0xe53   :  { %v3599_v38 = vpop.eup %3598 }
 0xe54   :  { %v1644_v42 = vmul.f32 %v3599_v38, %v1635_v40 }
 0xe56   :  { %v1645_v43 = vadd.f32 %v1644_v42, %v1602_v19  ;;  %v4413_v42 = vld [vmem:[#allocation16] ss:$12 sps:$4 sm:$0xff]  }
 0xe58   :  { %3600 = vtanh.f32 %v1645_v43  ;;  %v3508_v43 = vld [vmem:[#allocation16 + $0x4] ss:$12 sps:$4 sm:$0xff]  }
 0xe59   :  { %3602 = vpow2.f32 %v3129_v49  ;;  %2032 = vmatprep.subr.bf16.mxu1 %v3508_v43  ;;  %v3517_v49 = vld [vmem:[#allocation16 + $0x38] ss:$12 sps:$4 sm:$0xff]  }
 0xe62   :  { %v3601_v20 = vpop.eup %3600 }
 0xe63   :  { %1649 = vrot.lane.b32.xlu1 %v3601_v20, %s3877_s23  ;;  %v3603_v50 = vpop.eup %3602  ;;  %v3513_v20 = vld [vmem:[#allocation16 + $0x20] ss:$12 sps:$4 sm:$0xff]  }
 0xe64   :  { %v1641_v51 = vadd.f32 1.0, %v3603_v50  ;;  %v4426_v50 = vld [vmem:[#allocation16 + $0x30] ss:$12 sps:$4 sm:$0xff]  }
 0xe66   :  { %3604 = vrcp.f32 %v1641_v51  ;;  %v4430_v51 = vld [vmem:[#allocation16 + $0x4c] ss:$12 sps:$4 sm:$0xff]  }
 0xe67   :  { %1869 = vrot.lane.b32.xlu1 %v1864_v62, %s3877_s23  ;;  %v4433_v62 = vld [vmem:[#allocation16 + $0x48] ss:$12 sps:$4 sm:$0xff]  }
 0xe70   :  { %v3605_v0 = vpop.eup %3604 }
 0xe71   :  { %v1647_v1 = vsub.f32 1.0, %v3605_v0  ;;  %v1653_v3 = vmul.f32 %v3605_v0, %v4356_v11 }
 0xed5   :  { %v1650_v2 = vpop.permute.xlu1 %1649 }
 0xed6   :  { %v1652_v4 = vmul.f32 %v1650_v2, %v1647_v1 }
 0xed8   :  { %v4392_v6 = vadd.f32 %v1653_v3, %v1652_v4  ;;  %v2115_v4 = vld [vmem:[#allocation17] sm:$0x3] }
 0xed9   :  { %v1870_v14 = vpop.permute.xlu1 %1869 }
 0xeda   :  { %v1689_v8 = vpack.c.bf16 %v4392_v6, %v4392_v6 }
 0xedc   :  { %1707 = vrot.lane.b32.xlu0 %v1689_v8, %s3877_s23  ;;  %v2120_v8 = vrot.slane %v2115_v4, %v4228_v9 }
 0xee0   :  { %1871 = vrot.lane.b32.xlu0 %v1868_v10, %s3877_s23 }
 0xf4e   :  { %v1708_v12 = vpop.permute.xlu0 %1707 }
 0xf4f   :  { %3142 = vmatmul.mubr.msk.bf16.vlgmr.msra.gmra.mrb[20].mxu1 %vm195_vm4, %v1708_v12  ;;  %3365 = vmatmul.mubr.msk.bf16.vlgmr.msra.gmra.mrb[24].mxu0 %vm195_vm4, %v1708_v12 }
 0xf50   :  { %2064 = vmatprep.mubr.bf16.mxu1 %v3879_v30  ;;  %3376 = vmatprep.mubr.msk.bf16.mxu0 %vm3878_vm1, %v3876_v7 }
 0xf51   :  { %3369 = vmatpush3.bf16.msra.mxu0 %v3509_v44  ;;  %2033 = vmatpush1.bf16.msra.mxu1 %v4413_v42 }
 0xf52   :  { %v1872_v13 = vpop.permute.xlu0 %1871  ;;  %3370 = vmatprep.subr.bf16.mxu0 %v3876_v7  ;;  %2034 = vmatprep.subr.bf16.mxu1 %v4415_v45 }
 0xf53   :  { %v1873_v15 = vsel %vm195_vm4, %v1870_v14, %v1872_v13 }
 0xf55   :  { %3371 = vmatpush3.bf16.msra.mxu0 %v3513_v20  ;;  %2035 = vmatpush1.bf16.msra.mxu1 %v4418_v46 }
 0xf56   :  { %2036 = vmatprep.subr.bf16.mxu1 %v4422_v47  ;;  %3372 = vmatprep.subr.bf16.mxu0 %v3876_v7 }
 0xf59   :  { %3373 = vmatpush3.bf16.msra.mxu0 %v3517_v49  ;;  %2037 = vmatpush1.bf16.msra.mxu1 %v4426_v50 }
 0xf5a   :  { %3374 = vmatprep.subr.bf16.mxu0 %v3876_v7  ;;  %2038 = vmatprep.subr.bf16.mxu1 %v4430_v51 }
 0xf5d   :  { %3375 = vmatpush3.bf16.msra.mxu0 %v3521_v52  ;;  %2039 = vmatpush1.bf16.msra.mxu1 %v4433_v62 }
 0xf5e   :  { %3380 = vmatprep.subr.bf16.mxu0 %v3876_v7  ;;  %2288 = vmatprep.subr.bf16.mxu1 %v3508_v43 }
0x1022   :  { %v1810_v18 = vpop.f32.mrb[20].mxu1  ;;  %v1851_v53 = vpop.f32.mrb[24].mxu0 }
0x1023   :  { %v1877_v21 = vadd.f32 %v1873_v15, %v1851_v53  ;;  %v1812_v22 = vpop.f32.mrb[21].mxu1  ;;  %v3366_v55 = vpop.f32.mrb[25].mxu0  ;;  %v1857_v28 = vadd.f32 %v1810_v18, %v1687_v61 }
0x1024   :  { %v1876_v23 = vadd.f32 %v1870_v14, %v1812_v22  ;;  %v1814_v24 = vpop.f32.mrb[22].mxu1  ;;  %v1854_v25 = vpop.f32.mrb[26].mxu0  ;;  %v1858_v39 = vadd.f32 %v1812_v22, %v1688_v37 }
0x1025   :  { %v3367_v26 = vpop.f32.mrb[27].mxu0  ;;  %1890 = vrot.lane.b32.xlu0 %v1877_v21, %s3877_s23  ;;  %v1815_v56 = vpop.f32.mrb[23].mxu1  ;;  %v2124_v21 = vrot.slane %v2115_v4, %v4234_v17  ;;  %v3524_v4 = vld [vmem:[#allocation16 + $0x38] ss:$12 sps:$4 sm:$0xff]  }
0x1026   :  { %1879 = vrot.lane.b32.xlu1 %v1876_v23, %s3877_s23 }
0x1097   :  { %v1891_v38 = vpop.permute.xlu0 %1890 }
0x1098   :  { %v1880_v54 = vpop.permute.xlu1 %1879  ;;  %v1893_v0 = vadd.f32 %v1891_v38, %v1857_v28 }
0x1099   :  { %v1882_v31 = vadd.f32 %v1880_v54, %v1857_v28 }
0x109a   :  { %v3145_v1 = vmul.f32 -1.442695, %v1893_v0 }
0x109b   :  { %v3144_v29 = vmul.f32 -1.442695, %v1882_v31  ;;  %v1920_v31 = vld [vmem:[#allocation2 + $0x15] ss:$8 sm:$0x3] }
0x109d   :  { %3606 = vpow2.f32 %v3144_v29  ;;  %v1918_v29 = vld [vmem:[#allocation2 + $0x5] ss:$8 sm:$0x3] }
0x10a7   :  { %v3607_v32 = vpop.eup %3606 }
0x10a8   :  { %v1886_v33 = vadd.f32 1.0, %v3607_v32  ;;  %v1936_v32 = vrot.slane %v1920_v31, %v4228_v9 }
0x10aa   :  { %3608 = vrcp.f32 %v1886_v33  ;;  %v1925_v33 = vrot.slane %v1918_v29, %v4228_v9 }
0x10ac   :  { %v1943_v34 = vsel %vm180_vm2, %v1925_v33, %v1936_v32 }
0x10b4   :  { %v3609_v36 = vpop.eup %3608 }
0x10b5   :  { %v1900_v40 = vmul.f32 %v3609_v36, %v1891_v38 }
0x10b7   :  { %v1901_v19 = vadd.f32 %v1900_v40, %v1858_v39 }
0x10b9   :  { %3610 = vtanh.f32 %v1901_v19  ;;  %v1940_v19 = vrot.slane %v1920_v31, %v4234_v17 }
0x10ba   :  { %3612 = vpow2.f32 %v3145_v1  ;;  %v3522_v1 = vld [vmem:[#allocation16 + $0x8] ss:$12 sps:$4 sm:$0xff]  }
0x10c3   :  { %v3611_v48 = vpop.eup %3610 }
0x10c4   :  { %1905 = vrot.lane.b32.xlu1 %v3611_v48, %s3877_s23  ;;  %v3613_v2 = vpop.eup %3612 }
0x10c5   :  { %v1897_v3 = vadd.f32 1.0, %v3613_v2  ;;  %v3523_v2 = vld [vmem:[#allocation16 + $0x20] ss:$12 sps:$4 sm:$0xff]  }
0x10c7   :  { %3614 = vrcp.f32 %v1897_v3 }
0x10c8   :  { %2125 = vrot.lane.b32.xlu1 %v2120_v8, %s3877_s23  ;;  %v3525_v8 = vld [vmem:[#allocation16 + $0x50] ss:$12 sps:$4 sm:$0xff]  }
0x10d1   :  { %v3615_v10 = vpop.eup %3614 }
0x10d2   :  { %v1903_v12 = vsub.f32 1.0, %v3615_v10  ;;  %v1909_v14 = vmul.f32 %v3615_v10, %v4392_v6 }
0x1136   :  { %v1906_v13 = vpop.permute.xlu1 %1905 }
0x1137   :  { %v1908_v15 = vmul.f32 %v1906_v13, %v1903_v12 }
0x1139   :  { %v4442_v18 = vadd.f32 %v1909_v14, %v1908_v15  ;;  %v2371_v15 = vld [vmem:[#allocation17] sm:$0x3] }
0x113a   :  { %v2126_v23 = vpop.permute.xlu1 %2125 }
0x113b   :  { %v1945_v53 = vpack.c.bf16 %v4442_v18, %v4442_v18 }
0x113d   :  { %1963 = vrot.lane.b32.xlu0 %v1945_v53, %s3877_s23  ;;  %v2376_v53 = vrot.slane %v2371_v15, %v4228_v9 }
0x1141   :  { %2127 = vrot.lane.b32.xlu0 %v2124_v21, %s3877_s23 }
0x11af   :  { %v1964_v22 = vpop.permute.xlu0 %1963 }
0x11b0   :  { %3158 = vmatmul.mubr.msk.bf16.vlgmr.msra.gmra.mrb[24].mxu1 %vm195_vm4, %v1964_v22  ;;  %3377 = vmatmul.mubr.msk.bf16.vlgmr.msra.gmra.mrb[28].mxu0 %vm195_vm4, %v1964_v22 }
0x11b1   :  { %2289 = vmatpush1.bf16.msra.mxu1 %v4413_v42  ;;  %2320 = vmatprep.mubr.bf16.mxu1 %v3879_v30 }
0x11b2   :  { %2290 = vmatprep.subr.bf16.mxu1 %v4415_v45  ;;  %3388 = vmatprep.mubr.msk.bf16.mxu0 %vm3878_vm1, %v3876_v7 }
0x11b3   :  { %v2128_v55 = vpop.permute.xlu0 %2127  ;;  %3381 = vmatpush3.bf16.msra.mxu0 %v3522_v1  ;;  %v3526_v1 = vld [vmem:[#allocation16 + $0x8] ss:$12 sps:$4 sm:$0xff]  }
0x11b4   :  { %v2129_v24 = vsel %vm195_vm4, %v2126_v23, %v2128_v55  ;;  %3382 = vmatprep.subr.bf16.mxu0 %v3876_v7 }
0x11b5   :  { %2291 = vmatpush1.bf16.msra.mxu1 %v4418_v46 }
0x11b6   :  { %2292 = vmatprep.subr.bf16.mxu1 %v4422_v47 }
0x11b7   :  { %3383 = vmatpush3.bf16.msra.mxu0 %v3523_v2  ;;  %v3527_v2 = vld [vmem:[#allocation16 + $0x20] ss:$12 sps:$4 sm:$0xff]  }
0x11b8   :  { %3384 = vmatprep.subr.bf16.mxu0 %v3876_v7 }
0x11b9   :  { %2293 = vmatpush1.bf16.msra.mxu1 %v4426_v50 }
0x11ba   :  { %2294 = vmatprep.subr.bf16.mxu1 %v4430_v51 }
0x11bb   :  { %3385 = vmatpush3.bf16.msra.mxu0 %v3524_v4  ;;  %v3528_v4 = vld [vmem:[#allocation16 + $0x38] ss:$12 sps:$4 sm:$0xff]  }
0x11bc   :  { %3386 = vmatprep.subr.bf16.mxu0 %v3876_v7 }
0x11bd   :  { %2295 = vmatpush1.bf16.msra.mxu1 %v4433_v62 }
0x11be   :  { %2544 = vmatprep.subr.bf16.mxu1 %v3508_v43  ;;  %v1929_v43 = vrot.slane %v1918_v29, %v4234_v17 }
0x11bf   :  { %3387 = vmatpush3.bf16.msra.mxu0 %v3525_v8  ;;  %v3529_v8 = vld [vmem:[#allocation16 + $0x50] ss:$12 sps:$4 sm:$0xff]  }
0x11c0   :  { %v1944_v20 = vsel %vm180_vm2, %v1929_v43, %v1940_v19  ;;  %3392 = vmatprep.subr.bf16.mxu0 %v3876_v7 }
0x1283   :  { %v2066_v25 = vpop.f32.mrb[24].mxu1  ;;  %v2107_v26 = vpop.f32.mrb[28].mxu0 }
0x1284   :  { %v2133_v56 = vadd.f32 %v2129_v24, %v2107_v26  ;;  %v2068_v27 = vpop.f32.mrb[25].mxu1  ;;  %v3378_v57 = vpop.f32.mrb[29].mxu0  ;;  %v2113_v35 = vadd.f32 %v2066_v25, %v1943_v34 }
0x1285   :  { %v2132_v58 = vadd.f32 %v2126_v23, %v2068_v27  ;;  %v2070_v59 = vpop.f32.mrb[26].mxu1  ;;  %v2110_v61 = vpop.f32.mrb[30].mxu0  ;;  %v2114_v49 = vadd.f32 %v2068_v27, %v1944_v20 }
0x1286   :  { %v3379_v28 = vpop.f32.mrb[31].mxu0  ;;  %2146 = vrot.lane.b32.xlu0 %v2133_v56, %s3877_s23  ;;  %v2071_v54 = vpop.f32.mrb[27].mxu1  ;;  %v2380_v56 = vrot.slane %v2371_v15, %v4234_v17  ;;  %v2627_v15 = vld [vmem:[#allocation17] sm:$0x3] }
0x1287   :  { %2135 = vrot.lane.b32.xlu1 %v2132_v58, %s3877_s23 }
0x12f8   :  { %v2147_v48 = vpop.permute.xlu0 %2146 }
0x12f9   :  { %v2136_v36 = vpop.permute.xlu1 %2135  ;;  %v2149_v10 = vadd.f32 %v2147_v48, %v2113_v35 }
0x12fa   :  { %v2138_v37 = vadd.f32 %v2136_v36, %v2113_v35 }
0x12fb   :  { %v3161_v12 = vmul.f32 -1.442695, %v2149_v10 }
0x12fc   :  { %v3160_v38 = vmul.f32 -1.442695, %v2138_v37 }
0x12fe   :  { %3616 = vpow2.f32 %v3160_v38 }
0x1308   :  { %v3617_v39 = vpop.eup %3616 }
0x1309   :  { %v2142_v40 = vadd.f32 1.0, %v3617_v39 }
0x130b   :  { %3618 = vrcp.f32 %v2142_v40 }
0x1315   :  { %v3619_v44 = vpop.eup %3618 }
0x1316   :  { %v2156_v52 = vmul.f32 %v3619_v44, %v2147_v48 }
0x1318   :  { %v2157_v0 = vadd.f32 %v2156_v52, %v2114_v49 }
0x131a   :  { %3620 = vtanh.f32 %v2157_v0 }
0x131b   :  { %3622 = vpow2.f32 %v3161_v12 }
0x1324   :  { %v3621_v3 = vpop.eup %3620 }
0x1325   :  { %2161 = vrot.lane.b32.xlu1 %v3621_v3, %s3877_s23  ;;  %v3623_v13 = vpop.eup %3622 }
0x1326   :  { %v2153_v14 = vadd.f32 1.0, %v3623_v13 }
0x1328   :  { %3624 = vrcp.f32 %v2153_v14 }
0x1329   :  { %2381 = vrot.lane.b32.xlu1 %v2376_v53, %s3877_s23  ;;  %v2632_v53 = vrot.slane %v2627_v15, %v4228_v9 }
0x1332   :  { %v3625_v21 = vpop.eup %3624 }
0x1333   :  { %v2159_v22 = vsub.f32 1.0, %v3625_v21  ;;  %v2165_v23 = vmul.f32 %v3625_v21, %v4442_v18 }
0x1397   :  { %v2162_v55 = vpop.permute.xlu1 %2161 }
0x1398   :  { %v2164_v24 = vmul.f32 %v2162_v55, %v2159_v22 }
0x139a   :  { %v4478_v25 = vadd.f32 %v2165_v23, %v2164_v24 }
0x139b   :  { %v2382_v58 = vpop.permute.xlu1 %2381 }
0x139c   :  { %v2201_v26 = vpack.c.bf16 %v4478_v25, %v4478_v25 }
0x139e   :  { %2219 = vrot.lane.b32.xlu0 %v2201_v26, %s3877_s23 }
0x13a2   :  { %2383 = vrot.lane.b32.xlu0 %v2380_v56, %s3877_s23 }
0x1410   :  { %v2220_v27 = vpop.permute.xlu0 %2219 }
0x1411   :  { %3174 = vmatmul.mubr.msk.bf16.vlgmr.msra.gmra.mrb[28].mxu1 %vm195_vm4, %v2220_v27  ;;  %3389 = vmatmul.mubr.msk.bf16.vlgmr.msra.gmra.mrb[32].mxu0 %vm195_vm4, %v2220_v27  ;;  %v2636_v27 = vrot.slane %v2627_v15, %v4234_v17  ;;  %v3536_v15 = vld [vmem:[%s4713_s14 + $0x28] ss:$20 sps:$4 sm:$0xff]  }
0x1412   :  { %2545 = vmatpush1.bf16.msra.mxu1 %v4413_v42  ;;  %2576 = vmatprep.mubr.bf16.mxu1 %v3879_v30 }
0x1413   :  { %2546 = vmatprep.subr.bf16.mxu1 %v4415_v45  ;;  %3400 = vmatprep.mubr.msk.bf16.mxu0 %vm3878_vm1, %v3876_v7 }
0x1414   :  { %v2384_v57 = vpop.permute.xlu0 %2383  ;;  %3393 = vmatpush3.bf16.msra.mxu0 %v3526_v1 }
0x1415   :  { %v2385_v42 = vsel %vm195_vm4, %v2382_v58, %v2384_v57  ;;  %3394 = vmatprep.subr.bf16.mxu0 %v3876_v7 }
0x1416   :  { %2547 = vmatpush1.bf16.msra.mxu1 %v4418_v46 }
0x1417   :  { %2548 = vmatprep.subr.bf16.mxu1 %v4422_v47 }
0x1418   :  { %3395 = vmatpush3.bf16.msra.mxu0 %v3527_v2 }
0x1419   :  { %3396 = vmatprep.subr.bf16.mxu0 %v3876_v7 }
0x141a   :  { %2549 = vmatpush1.bf16.msra.mxu1 %v4426_v50  ;;  %v2176_v50 = vld [vmem:[#allocation2 + $0x16] ss:$8 sm:$0x3] }
0x141b   :  { %2550 = vmatprep.subr.bf16.mxu1 %v4430_v51  ;;  %v2174_v51 = vld [vmem:[#allocation2 + $0x6] ss:$8 sm:$0x3]  ;;  %v2196_v19 = vrot.slane %v2176_v50, %v4234_v17 }
0x141c   :  { %v2181_v33 = vrot.slane %v2174_v51, %v4228_v9  ;;  %v2185_v43 = vrot.slane %v2174_v51, %v4234_v17  ;;  %3397 = vmatpush3.bf16.msra.mxu0 %v3528_v4  ;;  %v2430_v51 = vld [vmem:[#allocation2 + $0x7] ss:$8 sm:$0x3]  ;;  %v3530_v4 = vld [vmem:[%s4713_s14] ss:$20 sps:$4 sm:$0xff]  }
0x141d   :  { %3398 = vmatprep.subr.bf16.mxu0 %v3876_v7 }
0x141e   :  { %2551 = vmatpush1.bf16.msra.mxu1 %v4433_v62  ;;  %v2192_v62 = vrot.slane %v2176_v50, %v4228_v9  ;;  %v2200_v20 = vsel %vm180_vm2, %v2185_v43, %v2196_v19 }
0x1420   :  { %v2199_v34 = vsel %vm180_vm2, %v2181_v33, %v2192_v62  ;;  %3399 = vmatpush3.bf16.msra.mxu0 %v3529_v8  ;;  %v2437_v33 = vrot.slane %v2430_v51, %v4228_v9  ;;  %v3532_v8 = vld [vmem:[%s4713_s14 + $0x4] ss:$20 sps:$4 sm:$0xff]  }
0x1421   :  { %2846 = vmatprep.subr.bf16.mxu1 %v3532_v8 }
0x14e4   :  { %v2322_v59 = vpop.f32.mrb[28].mxu1  ;;  %v2363_v61 = vpop.f32.mrb[32].mxu0 }
0x14e5   :  { %v2389_v45 = vadd.f32 %v2385_v42, %v2363_v61  ;;  %v2324_v28 = vpop.f32.mrb[29].mxu1  ;;  %v3390_v54 = vpop.f32.mrb[33].mxu0  ;;  %v2369_v35 = vadd.f32 %v2322_v59, %v2199_v34 }
0x14e6   :  { %v2388_v31 = vadd.f32 %v2382_v58, %v2324_v28  ;;  %v2326_v29 = vpop.f32.mrb[30].mxu1  ;;  %v2366_v46 = vpop.f32.mrb[34].mxu0  ;;  %v2370_v49 = vadd.f32 %v2324_v28, %v2200_v20 }
0x14e7   :  { %v3391_v32 = vpop.f32.mrb[35].mxu0  ;;  %2402 = vrot.lane.b32.xlu0 %v2389_v45, %s3877_s23  ;;  %v2327_v47 = vpop.f32.mrb[31].mxu1 }
0x14e8   :  { %2391 = vrot.lane.b32.xlu1 %v2388_v31, %s3877_s23 }
0x1559   :  { %v2403_v48 = vpop.permute.xlu0 %2402 }
0x155a   :  { %v2392_v36 = vpop.permute.xlu1 %2391  ;;  %v2405_v10 = vadd.f32 %v2403_v48, %v2369_v35 }
0x155b   :  { %v2394_v37 = vadd.f32 %v2392_v36, %v2369_v35 }
0x155c   :  { %v3177_v12 = vmul.f32 -1.442695, %v2405_v10  ;;  %v3533_v10 = vld [vmem:[%s4713_s14 + $0x8] ss:$20 sps:$4 sm:$0xff]  }
0x155d   :  { %v3176_v38 = vmul.f32 -1.442695, %v2394_v37 }
0x155f   :  { %3626 = vpow2.f32 %v3176_v38 }
0x1569   :  { %v3627_v39 = vpop.eup %3626 }
0x156a   :  { %v2398_v40 = vadd.f32 1.0, %v3627_v39 }
0x156c   :  { %3628 = vrcp.f32 %v2398_v40 }
0x1576   :  { %v3629_v44 = vpop.eup %3628 }
0x1577   :  { %v2412_v52 = vmul.f32 %v3629_v44, %v2403_v48  ;;  %v2441_v48 = vrot.slane %v2430_v51, %v4234_v17  ;;  %v3556_v51 = vld [vmem:[%s4713_s14 + $0x60] ss:$20 sps:$4 sm:$0xff]  }
0x1579   :  { %v2413_v0 = vadd.f32 %v2412_v52, %v2370_v49 }
0x157b   :  { %3630 = vtanh.f32 %v2413_v0 }
0x157c   :  { %3632 = vpow2.f32 %v3177_v12  ;;  %v3535_v12 = vld [vmem:[%s4713_s14 + $0xc] ss:$20 sps:$4 sm:$0xff]  }
0x157d   :  { %2889 = vmatprep.subr.bf16.mxu0 %v3535_v12 }
0x1585   :  { %v3631_v3 = vpop.eup %3630 }
0x1586   :  { %2417 = vrot.lane.b32.xlu1 %v3631_v3, %s3877_s23  ;;  %v3633_v13 = vpop.eup %3632 }
0x1587   :  { %v2409_v14 = vadd.f32 1.0, %v3633_v13  ;;  %v3538_v13 = vld [vmem:[%s4713_s14 + $0x2c] ss:$20 sps:$4 sm:$0xff]  }
0x1589   :  { %3634 = vrcp.f32 %v2409_v14  ;;  %v3541_v14 = vld [vmem:[%s4713_s14 + $0x34] ss:$20 sps:$4 sm:$0xff]  }
0x158a   :  { %2637 = vrot.lane.b32.xlu1 %v2632_v53, %s3877_s23  ;;  %v3539_v53 = vld [vmem:[%s4713_s14 + $0x30] ss:$20 sps:$4 sm:$0xff]  }
0x1593   :  { %v3635_v21 = vpop.eup %3634 }
0x1594   :  { %v2415_v22 = vsub.f32 1.0, %v3635_v21  ;;  %v2421_v23 = vmul.f32 %v3635_v21, %v4478_v25 }
0x15f8   :  { %v2418_v55 = vpop.permute.xlu1 %2417 }
0x15f9   :  { %v2420_v24 = vmul.f32 %v2418_v55, %v2415_v22 }
0x15fb   :  { %v4513_v26 = vadd.f32 %v2421_v23, %v2420_v24  ;;  %v3542_v23 = vld [vmem:[%s4713_s14 + $0x50] ss:$20 sps:$4 sm:$0xff]  }
0x15fc   :  { %v2638_v42 = vpop.permute.xlu1 %2637  ;;  %v3550_v24 = vld [vmem:[%s4713_s14 + $0x7c] ss:$20 sps:$4 sm:$0xff]  }
0x15fd   :  { %v2457_v56 = vpack.c.bf16 %v4513_v26, %v4513_v26 }
0x15ff   :  { %2475 = vrot.lane.b32.xlu0 %v2457_v56, %s3877_s23  ;;  %v3553_v56 = vld [vmem:[%s4713_s14 + $0x84] ss:$20 sps:$4 sm:$0xff]  }
0x1603   :  { %2639 = vrot.lane.b32.xlu0 %v2636_v27, %s3877_s23  ;;  %v3548_v27 = vld [vmem:[%s4713_s14 + $0x78] ss:$20 sps:$4 sm:$0xff]  }
0x1671   :  { %v2476_v57 = vpop.permute.xlu0 %2475 }
0x1672   :  { %3190 = vmatmul.mubr.msk.bf16.vlgmr.msra.gmra.mrb[32].mxu1 %vm195_vm4, %v2476_v57  ;;  %3401 = vmatmul.mubr.msk.bf16.vlgmr.msra.gmra.mrb[36].mxu0 %vm195_vm4, %v2476_v57 }
0x1673   :  { %2878 = vmatprep.mubr.bf16.mxu1 %v3879_v30  ;;  %2921 = vmatprep.mubr.bf16.mxu0 %v3879_v30  ;;  %v2432_v30 = vld [vmem:[#allocation2 + $0x17] ss:$8 sm:$0x3] }
0x1674   :  { %v2448_v62 = vrot.slane %v2432_v30, %v4228_v9  ;;  %v2452_v20 = vrot.slane %v2432_v30, %v4234_v17  ;;  %2847 = vmatpush1.bf16.msra.mxu1 %v3530_v4  ;;  %2890 = vmatpush1.bf16.msra.mxu0 %v3533_v10  ;;  %v3555_v30 = vld [vmem:[%s4713_s14 + $0x38] ss:$20 sps:$4 sm:$0xff]  }
0x1675   :  { %v2640_v58 = vpop.permute.xlu0 %2639  ;;  %2848 = vmatprep.subr.bf16.mxu1 %v3538_v13  ;;  %2891 = vmatprep.subr.bf16.mxu0 %v3541_v14 }
0x1676   :  { %v2641_v59 = vsel %vm195_vm4, %v2638_v42, %v2640_v58  ;;  %v2455_v34 = vsel %vm180_vm2, %v2437_v33, %v2448_v62  ;;  %v2456_v52 = vsel %vm180_vm2, %v2441_v48, %v2452_v20  ;;  %v3551_v58 = vld [vmem:[%s4713_s14 + $0x80] ss:$20 sps:$4 sm:$0xff]   ;;  %v3557_v62 = vld [vmem:[%s4713_s14 + $0x88] ss:$20 sps:$4 sm:$0xff]   ;;  %v2724_v33 = vsub.s32 2, %v4135_v41 }
0x1678   :  { %2849 = vmatpush1.bf16.msra.mxu1 %v3536_v15  ;;  %2892 = vmatpush1.bf16.msra.mxu0 %v3539_v53  ;;  %v2732_v15 = vsub.s32 4, %v4135_v41 }
0x1745   :  { %v2578_v61 = vpop.f32.mrb[32].mxu1  ;;  %v2619_v45 = vpop.f32.mrb[36].mxu0 }
0x1746   :  { %v2645_v28 = vadd.f32 %v2641_v59, %v2619_v45  ;;  %v2580_v54 = vpop.f32.mrb[33].mxu1  ;;  %v3402_v31 = vpop.f32.mrb[37].mxu0  ;;  %v2625_v35 = vadd.f32 %v2578_v61, %v2455_v34  ;;  %v2712_v34 = vld [vmem:[%s4714_s15] sm:$0x1f] }
0x1747   :  { %v2644_v29 = vadd.f32 %v2638_v42, %v2580_v54  ;;  %v2582_v46 = vpop.f32.mrb[34].mxu1  ;;  %v2622_v32 = vpop.f32.mrb[38].mxu0  ;;  %v2626_v0 = vadd.f32 %v2580_v54, %v2456_v52  ;;  %v2733_v53 = vrot.slane %v2712_v34, %v2732_v15 }
0x1748   :  { %v3403_v47 = vpop.f32.mrb[39].mxu0  ;;  %2658 = vrot.lane.b32.xlu0 %v2645_v28, %s3877_s23  ;;  %v2583_v50 = vpop.f32.mrb[35].mxu1 }
0x1749   :  { %2647 = vrot.lane.b32.xlu1 %v2644_v29, %s3877_s23  ;;  %v3554_v47 = vld [vmem:[%s4713_s14 + $0x10] ss:$20 sps:$4 sm:$0xff]  }
0x174c   :  { %886 = vrot.lane.b32.xlu0 %v4280_v63, %s3877_s23 }
0x1750   :  { %1400 = vrot.lane.b32.xlu0 %v4356_v11, %s3877_s23 }
0x1754   :  { %1912 = vrot.lane.b32.xlu0 %v4442_v18, %s3877_s23 }
0x1758   :  { %2424 = vrot.lane.b32.xlu0 %v4513_v26, %s3877_s23 }
0x17ba   :  { %v2659_v36 = vpop.permute.xlu0 %2658 }
0x17bb   :  { %v2661_v63 = vadd.f32 %v2659_v36, %v2625_v35  ;;  %v2648_v37 = vpop.permute.xlu1 %2647 }
0x17bc   :  { %v2650_v38 = vadd.f32 %v2648_v37, %v2625_v35  ;;  %v2728_v35 = vsub.s32 3, %v4135_v41  ;;  %v2721_v37 = vrot.slane %v2712_v34, %v4234_v17 }
0x17bd   :  { %v3193_v21 = vmul.f32 -1.442695, %v2661_v63  ;;  %v2725_v63 = vrot.slane %v2712_v34, %v2724_v33 }
0x17be   :  { %v3192_v11 = vmul.f32 -1.442695, %v2650_v38  ;;  %v887_v18 = vpop.permute.xlu0 %886  ;;  %v2729_v38 = vrot.slane %v2712_v34, %v2728_v35 }
0x17bf   :  { %890 = vst.msk [vmem:[#allocation3] sm:$0x1] %vm889_vm10, %v887_v18 }
0x17c0   :  { %892 = vst.msk [vmem:[#allocation3 + $0x7] sm:$0x2] %vm891_vm11, %v887_v18  ;;  %3636 = vpow2.f32 %v3192_v11 }
0x17c2   :  { %v1401_v39 = vpop.permute.xlu0 %1400 }
0x17c3   :  { %1403 = vst.msk [vmem:[#allocation3 + $0x2] sm:$0x1] %vm889_vm10, %v1401_v39 }
0x17c4   :  { %1404 = vst.msk [vmem:[#allocation3 + $0x9] sm:$0x2] %vm891_vm11, %v1401_v39 }
0x17c6   :  { %v1913_v40 = vpop.permute.xlu0 %1912 }
0x17c7   :  { %1915 = vst.msk [vmem:[#allocation3 + $0x4] sm:$0x1] %vm889_vm10, %v1913_v40 }
0x17c8   :  { %1916 = vst.msk [vmem:[#allocation3 + $0xb] sm:$0x2] %vm891_vm11, %v1913_v40 }
0x17ca   :  { %v3637_v19 = vpop.eup %3636  ;;  %v2425_v43 = vpop.permute.xlu0 %2424 }
0x17cb   :  { %v2654_v44 = vadd.f32 1.0, %v3637_v19  ;;  %2427 = vst.msk [vmem:[#allocation3 + $0x6] sm:$0x1] %vm889_vm10, %v2425_v43 }
0x17cc   :  { %2428 = vst.msk [vmem:[#allocation3 + $0xd] sm:$0x2] %vm891_vm11, %v2425_v43 }
0x17cd   :  { %3638 = vrcp.f32 %v2654_v44 }
0x17d7   :  { %v3639_v49 = vpop.eup %3638 }
0x17d8   :  { %v2668_v1 = vmul.f32 %v3639_v49, %v2659_v36  ;;  %v2717_v36 = vrot.slane %v2712_v34, %v4228_v9 }
0x17da   :  { %v2669_v2 = vadd.f32 %v2668_v1, %v2626_v0 }
0x17dc   :  { %3640 = vtanh.f32 %v2669_v2 }
0x17dd   :  { %3642 = vpow2.f32 %v3193_v21 }
0x17e6   :  { %v3641_v3 = vpop.eup %3640 }
0x17e7   :  { %2673 = vrot.lane.b32.xlu1 %v3641_v3, %s3877_s23  ;;  %v3643_v22 = vpop.eup %3642 }
0x17e8   :  { %v2665_v55 = vadd.f32 1.0, %v3643_v22 }
0x17ea   :  { %3644 = vrcp.f32 %v2665_v55 }
0x17eb   :  { %1144 = vrot.lane.b32.xlu1 %v4319_v5, %s3877_s23  ;;  %v3544_v5 = vld [vmem:[%s4713_s14 + $0x54] ss:$20 sps:$4 sm:$0xff]  }
0x17ec   :  { %2850 = vmatprep.subr.bf16.mxu1 %v3544_v5 }
0x17ed   :  { %2851 = vmatpush1.bf16.msra.mxu1 %v3542_v23 }
0x17ee   :  { %2852 = vmatprep.subr.bf16.mxu1 %v3550_v24 }
0x17ef   :  { %1656 = vrot.lane.b32.xlu1 %v4392_v6, %s3877_s23  ;;  %v3545_v6 = vld [vmem:[%s4713_s14 + $0x58] ss:$20 sps:$4 sm:$0xff]  }
0x17f1   :  { %2853 = vmatpush1.bf16.msra.mxu1 %v3548_v27 }
0x17f2   :  { %3404 = vmatprep.subr.bf16.mxu1 %v3876_v7 }
0x17f3   :  { %2168 = vrot.lane.b32.xlu1 %v4478_v25, %s3877_s23  ;;  %v3547_v25 = vld [vmem:[%s4713_s14 + $0x5c] ss:$20 sps:$4 sm:$0xff]  }
0x17f4   :  { %2893 = vmatprep.subr.bf16.mxu0 %v3547_v25  ;;  %v3645_v57 = vpop.eup %3644 }
0x17f5   :  { %2894 = vmatpush1.bf16.msra.mxu0 %v3545_v6  ;;  %v2671_v42 = vsub.f32 1.0, %v3645_v57  ;;  %v2677_v61 = vmul.f32 %v3645_v57, %v4513_v26 }
0x17f6   :  { %2895 = vmatprep.subr.bf16.mxu0 %v3553_v56 }
0x17f9   :  { %2896 = vmatpush1.bf16.msra.mxu0 %v3551_v58 }
0x1859   :  { %v2674_v59 = vpop.permute.xlu1 %2673 }
0x185a   :  { %v2676_v45 = vmul.f32 %v2674_v59, %v2671_v42 }
0x185c   :  { %v2678_v28 = vadd.f32 %v2677_v61, %v2676_v45 }
0x185d   :  { %v1145_v54 = vpop.permute.xlu1 %1144 }
0x185e   :  { %1147 = vst.msk [vmem:[#allocation3 + $0x1] sm:$0x1] %vm889_vm10, %v1145_v54  ;;  %2680 = vrot.lane.b32.xlu1 %v2678_v28, %s3877_s23 }
0x185f   :  { %1148 = vst.msk [vmem:[#allocation3 + $0x8] sm:$0x2] %vm891_vm11, %v1145_v54 }
0x1861   :  { %v1657_v31 = vpop.permute.xlu1 %1656 }
0x1862   :  { %1659 = vst.msk [vmem:[#allocation3 + $0x3] sm:$0x1] %vm889_vm10, %v1657_v31 }
0x1863   :  { %1660 = vst.msk [vmem:[#allocation3 + $0xa] sm:$0x2] %vm891_vm11, %v1657_v31 }
0x1865   :  { %v2169_v29 = vpop.permute.xlu1 %2168 }
0x1866   :  { %2171 = vst.msk [vmem:[#allocation3 + $0x5] sm:$0x1] %vm889_vm10, %v2169_v29 }
0x1867   :  { %2172 = vst.msk [vmem:[#allocation3 + $0xc] sm:$0x2] %vm891_vm11, %v2169_v29 }
0x18d0   :  { %v2681_v26 = vpop.permute.xlu1 %2680 }
0x18d1   :  { %2683 = vst.msk [vmem:[#allocation3 + $0x7] sm:$0x1] %vm889_vm10, %v2681_v26 }
0x18d2   :  { %2684 = vst.msk [vmem:[#allocation3 + $0xe] sm:$0x2] %vm891_vm11, %v2681_v26 }
0x18d8   :  { %v2685_v46 = vld [vmem:[#allocation3] sm:$0xff] }
0x18d9   :  { %v2686_v32 = vld [vmem:[#allocation3 + $0x8] sm:$0xff] }
0x18da   :  { %v2687_v50 = vpack.c.bf16 %v2686_v32, %v2685_v46 }
0x18dc   :  { %3214 = vmatmul.mubr.msk.bf16.vlgmr.msra.gmra.mrb[36].mxu1 %vm195_vm4, %v2687_v50  ;;  %3215 = vmatmul.mubr.msk.bf16.vlgmr.msra.gmra.mrb[40].mxu0 %vm195_vm4, %v2687_v50 }
0x18dd   :  { %3405 = vmatpush3.bf16.msra.mxu1 %v3554_v47  ;;  %3412 = vmatprep.mubr.msk.bf16.mxu1 %vm3878_vm1, %v3876_v7 }
0x18de   :  { %3406 = vmatprep.subr.bf16.mxu1 %v3876_v7 }
0x18e1   :  { %3407 = vmatpush3.bf16.msra.mxu1 %v3555_v30 }
0x18e2   :  { %3408 = vmatprep.subr.bf16.mxu1 %v3876_v7 }
0x18e5   :  { %3409 = vmatpush3.bf16.msra.mxu1 %v3556_v51 }
0x18e6   :  { %3410 = vmatprep.subr.bf16.mxu1 %v3876_v7 }
0x18e9   :  { %3411 = vmatpush3.bf16.msra.mxu1 %v3557_v62 }
0x18ec   :  { %3413 = vmatmul.mubr.msk.bf16.vlgmr.msra.gmra.mrb[40].mxu1 %vm195_vm4, %v2687_v50 }
0x19af   :  { %v2880_v11 = vpop.f32.mrb[36].mxu1  ;;  %v2923_v18 = vpop.f32.mrb[40].mxu0 }
0x19b0   :  { %v2881_v7 = vadd.f32 %v2880_v11, %v2717_v36  ;;  %v2924_v39 = vadd.f32 %v2923_v18, %v2725_v63  ;;  %v2882_v40 = vpop.f32.mrb[37].mxu1  ;;  %v2925_v19 = vpop.f32.mrb[41].mxu0 }
0x19b1   :  { %v2883_v43 = vadd.f32 %v2882_v40, %v2721_v37  ;;  %v2926_v44 = vadd.f32 %v2925_v19, %v2729_v38  ;;  %v2884_v20 = vpop.f32.mrb[38].mxu1  ;;  %v2927_v48 = vpop.f32.mrb[42].mxu0 }
0x19b2   :  { %v2973_v49 = vmul.f32 1.442695, %v2881_v7  ;;  %v3016_v52 = vsel %vm369_vm8, %v2924_v39, 0.0  ;;  %v2885_v0 = vadd.f32 %v2884_v20, %v2717_v36  ;;  %v2928_v9 = vadd.f32 %v2927_v48, %v2725_v63  ;;  %v2886_v1 = vpop.f32.mrb[39].mxu1  ;;  %v2929_v2 = vpop.f32.mrb[43].mxu0 }
0x19b3   :  { %3020 = vst [vmem:[%s4717_s18] sm:$0xff] %v3016_v52  ;;  %v2975_v17 = vmul.f32 1.442695, %v2883_v43  ;;  %v3017_v3 = vsel %vm369_vm8, %v2926_v44, 0.0  ;;  %v2887_v4 = vadd.f32 %v2886_v1, %v2721_v37  ;;  %v2930_v8 = vadd.f32 %v2929_v2, %v2729_v38 }
0x19b4   :  { %3646 = vpow2.f32 %v2973_v49  ;;  %3021 = vst [vmem:[%s4717_s18 + $0x8] sm:$0xff] %v3017_v3  ;;  %v2977_v10 = vmul.f32 1.442695, %v2885_v0  ;;  %v3018_v12 = vsel %vm370_vm9, %v2928_v9, 0.0 }
0x19b5   :  { %3648 = vpow2.f32 %v2975_v17  ;;  %3022 = vst [vmem:[%s4717_s18 + $0x10] sm:$0xff] %v3018_v12  ;;  %v2979_v13 = vmul.f32 1.442695, %v2887_v4  ;;  %v3019_v14 = vsel %vm370_vm9, %v2930_v8, 0.0 }
0x19b6   :  { %3650 = vpow2.f32 %v2977_v10  ;;  %3023 = vst [vmem:[%s4717_s18 + $0x18] sm:$0xff] %v3019_v14 }
0x19b7   :  { %3652 = vpow2.f32 %v2979_v13 }
0x19be   :  { %v3647_v21 = vpop.eup %3646 }
0x19bf   :  { %v3649_v22 = vpop.eup %3648  ;;  %v3008_v55 = vsel %vm369_vm8, %v3647_v21, 0.0  ;;  %v2966_v23 = vpop.f32.mrb[40].mxu1 }
0x19c0   :  { %v3651_v5 = vpop.eup %3650  ;;  %3012 = vst [vmem:[%s4716_s17] sm:$0xff] %v3008_v55  ;;  %v3009_v6 = vsel %vm369_vm8, %v3649_v22, 0.0  ;;  %v2967_v25 = vadd.f32 %v2966_v23, %v2733_v53  ;;  %v3414_v24 = vpop.f32.mrb[41].mxu1 }
0x19c1   :  { %v3653_v56 = vpop.eup %3652  ;;  %3013 = vst [vmem:[%s4716_s17 + $0x8] sm:$0xff] %v3009_v6  ;;  %v3010_v41 = vsel %vm370_vm9, %v3651_v5, 0.0  ;;  %v2969_v27 = vpop.f32.mrb[42].mxu1 }
0x19c2   :  { %3014 = vst [vmem:[%s4716_s17 + $0x10] sm:$0xff] %v3010_v41  ;;  %v3011_v57 = vsel %vm370_vm9, %v3653_v56, 0.0  ;;  %v2970_v58 = vadd.f32 %v2969_v27, %v2733_v53  ;;  %v3415_v42 = vpop.f32.mrb[43].mxu1  ;;  %v2982_v59 = vsel %vm2981_vm12, %v2967_v25, -inf }
0x19c3   :  { %3015 = vst [vmem:[%s4716_s17 + $0x18] sm:$0xff] %v3011_v57  ;;  %2983 = vmax.xlane.f32.xlu0 %v2982_v59 }
0x19c4   :  { %v2985_v61 = vsel %vm2981_vm12, %v2970_v58, -inf }
0x19c5   :  { %2986 = vmax.xlane.f32.xlu1 %v2985_v61 }
0x1a50   :  { %v2984_v45 = vpop.xlane.xlu0 %2983 }
0x1a51   :  { %v2988_v28 = vsub.f32 %v2967_v25, %v2984_v45 }
0x1a52   :  { %v2987_v54 = vpop.xlane.xlu1 %2986 }
0x1a53   :  { %v2990_v31 = vmul.f32 1.442695, %v2988_v28  ;;  %v2989_v29 = vsub.f32 %v2970_v58, %v2987_v54 }
0x1a55   :  { %3654 = vpow2.f32 %v2990_v31  ;;  %v2992_v26 = vmul.f32 1.442695, %v2989_v29 }
0x1a57   :  { %3656 = vpow2.f32 %v2992_v26 }
0x1a5f   :  { %v3655_v46 = vpop.eup %3654 }
0x1a60   :  { %v2994_v32 = vsel %vm2981_vm12, %v3655_v46, 0.0 }
0x1a61   :  { %v3657_v47 = vpop.eup %3656  ;;  %2995 = vadd.xlane.f32.xlu0 %v2994_v32 }
0x1a62   :  { %v2997_v50 = vsel %vm2981_vm12, %v3657_v47, 0.0 }
0x1a65   :  { %2998 = vadd.xlane.f32.xlu0 %v2997_v50 }
0x1aee   :  { %v2996_v30 = vpop.xlane.xlu0 %2995 }
0x1aef   :  { %3658 = vrcp.f32 %v2996_v30 }
0x1af2   :  { %v2999_v51 = vpop.xlane.xlu0 %2998 }
0x1af3   :  { %3660 = vrcp.f32 %v2999_v51 }
0x1af9   :  { %v3659_v62 = vpop.eup %3658 }
0x1afa   :  { %v3001_v33 = vmul.f32 %v3659_v62, %v3655_v46 }
0x1afc   :  { %v3004_v34 = vsel %vm369_vm8, %v3001_v33, 1e-09 }
0x1afd   :  { %v3661_v35 = vpop.eup %3660  ;;  %3006 = vst.msk [vmem:[%s4715_s16] sm:$0xff] %vm2981_vm12, %v3004_v34 }
0x1afe   :  { %v3003_v36 = vmul.f32 %v3661_v35, %v3657_v47 }
0x1b00   :  { %v3005_v63 = vsel %vm370_vm9, %v3003_v36, 1e-09 }
0x1b01   :  { %3007 = vst.msk [vmem:[%s4715_s16 + $0x8] sm:$0xff] %vm2981_vm12, %v3005_v63 }
0x1b02   :  { %3036 = vsyncpa [#allocation5], 1 }
0x1b03   :  { %3037 = vsyncpa [#allocation9], 1 }
0x1b04   :  { %3038 = vsyncpa [#allocation12], 1 }
0x1b05   :  { %3039 = vsyncpa [#allocation15], 1 }
0x1b06   :  { %3040 = vsyncpa [#allocation18], 1 }
0x1b07   :  { %3041 = vsyncpa [#allocation6], 1 }

</bundles_post_ra>
